<compile_context>
chip_gen: v7x
topology: tpu7x:2x2x1
jax: 0.10.0
libtpu: 0.0.40
codegen_flags: <defaults>
</compile_context>

<pallas_src>
import functools
import math

import jax
import jax.numpy as jnp
from jax import lax
from jax.experimental import pallas as pl
from jax.experimental.pallas import tpu as pltpu

CPAD = 128        # lane-dense padded out-channel count
BN_EPS = 1e-5


# ---------------- Pallas kernels ----------------

def _conv_bn_relu_kernel(a_ref, w_ref, b_ref, g_ref, be_ref, o_ref, sum_ref, sq_ref,
                         *, nsteps, nrows, eps):
    """Fused: y = A @ W + b (bf16 in, f32 acc); accumulate per-channel sum / sumsq;
    on the last grid step apply training-mode BN + ReLU to the VMEM-resident output."""
    i = pl.program_id(0)
    tm = a_ref.shape[0]

    @pl.when(i == 0)
    def _():
        sum_ref[...] = jnp.zeros_like(sum_ref)
        sq_ref[...] = jnp.zeros_like(sq_ref)

    y = jnp.dot(a_ref[...], w_ref[...], preferred_element_type=jnp.float32) + b_ref[...]
    sum_ref[...] += jnp.sum(y, axis=0, keepdims=True)
    sq_ref[...] += jnp.sum(y * y, axis=0, keepdims=True)

    start = pl.multiple_of(i * tm, tm)
    o_ref[pl.ds(start, tm), :] = y            # o_ref doubles as the f32 y buffer

    @pl.when(i == nsteps - 1)
    def _():
        inv_n = 1.0 / nrows
        mean = sum_ref[...] * inv_n
        var = sq_ref[...] * inv_n - mean * mean       # biased variance (train-mode BN)
        scale = g_ref[...] * lax.rsqrt(var + eps)
        shift = be_ref[...] - mean * scale
        # static per-tile loop keeps the vector temporaries tile-sized
        for t in range(nsteps):
            blk = o_ref[t * tm:(t + 1) * tm, :]
            o_ref[t * tm:(t + 1) * tm, :] = jnp.maximum(blk * scale + shift, 0.0)


def _matmul_bias_kernel(a_ref, w_ref, b_ref, o_ref):
    """Stats-free lane-dense GEMM + bias (used by the transpose-conv phase grid)."""
    o_ref[...] = (jnp.dot(a_ref[...], w_ref[...], preferred_element_type=jnp.float32)
                  + b_ref[...]).astype(o_ref.dtype)


# ---------------- pallas_call wrappers ----------------

def _pick_tile(rows, target=512):
    if rows <= target:
        return rows
    for tm in range(target, 0, -8):
        if rows % tm == 0:
            return tm
    return rows


def fused_matmul_bn_relu(a, w, b, gamma, beta, eps=BN_EPS, tm_target=512):
    """a: (rows, K) bf16, w: (K, CPAD) bf16, b/gamma/beta: (1, CPAD) f32 -> (rows, CPAD) f32."""
    rows, K = a.shape
    cpad = w.shape[1]
    tm = _pick_tile(rows, tm_target)
    assert rows % tm == 0 and rows % 8 == 0, (rows, tm)
    nsteps = rows // tm
    kernel = functools.partial(_conv_bn_relu_kernel, nsteps=nsteps, nrows=rows, eps=eps)
    return pl.pallas_call(
        kernel,
        out_shape=jax.ShapeDtypeStruct((rows, cpad), jnp.float32),
        grid_spec=pltpu.PrefetchScalarGridSpec(
            num_scalar_prefetch=0,
            grid=(nsteps,),
            in_specs=[pl.BlockSpec((tm, K), lambda i: (i, 0)),
                      pl.BlockSpec((K, cpad), lambda i: (0, 0)),
                      pl.BlockSpec((1, cpad), lambda i: (0, 0)),
                      pl.BlockSpec((1, cpad), lambda i: (0, 0)),
                      pl.BlockSpec((1, cpad), lambda i: (0, 0))],
            out_specs=pl.BlockSpec((rows, cpad), lambda i: (0, 0)),   # VMEM-resident
            scratch_shapes=[pltpu.VMEM((1, cpad), jnp.float32),
                            pltpu.VMEM((1, cpad), jnp.float32)]),
        compiler_params=pltpu.CompilerParams(
            dimension_semantics=("arbitrary",)),   # sequential: stats + resident output
    )(a, w, b, gamma, beta)


def _im2col(xp, kd_size, kh_size, d_out, h_out):
    """xp: padded (B, Dp, Hp, Cin) -> (B, d_out, h_out, kd*kh*Cin), (kd, kh)-major order."""
    cols = []
    for kd in range(kd_size):
        for kh in range(kh_size):
            cols.append(xp[:, kd:kd + d_out, kh:kh + h_out, :])
    return jnp.concatenate(cols, axis=-1)


def conv3x3_bn_relu(x, wm, b, gamma, beta, cout, eps=BN_EPS):
    """Conv3d k=(3,3,1) pad=(1,1,0) + BatchNorm3d (batch stats) + ReLU, one fused kernel."""
    B, D, H, Cin = x.shape
    xp = jnp.pad(x.astype(jnp.bfloat16), ((0, 0), (1, 1), (1, 1), (0, 0)))
    a = _im2col(xp, 3, 3, D, H).reshape(B * D * H, 9 * Cin)
    y = fused_matmul_bn_relu(a, wm, b, gamma, beta, eps)          # (rows, CPAD) f32
    return y[:, :cout].reshape(B, D, H, cout)


def _up_phase_im2col(x):
    """4-phase im2col for ConvTranspose (4,4),(2,2),(1,1): (B,D,H,Cin) -> (4, B*D*H, 4*Cin).
    Phase p = 2*pd + ph holds output positions (2d+pd, 2h+ph); column order (dd, dh, ci)."""
    B, D, H, Cin = x.shape
    xp = jnp.pad(x.astype(jnp.bfloat16), ((0, 0), (1, 1), (1, 1), (0, 0)))
    phases = []
    for pd in (0, 1):
        for ph in (0, 1):
            cols = [xp[:, pd + dd:pd + dd + D, ph + dh:ph + dh + H, :]
                    for dd in (0, 1) for dh in (0, 1)]
            phases.append(jnp.concatenate(cols, axis=-1).reshape(B * D * H, 4 * Cin))
    return jnp.stack(phases, axis=0)


def conv_transpose_up(x, w_ph, b, cout):
    """ConvTranspose3d k=(4,4,1) s=(2,2,1) p=(1,1,0) via 4 output-parity sub-convs
    (no zero-stuffed input, no structural-zero MXU work)."""
    B, D, H, Cin = x.shape
    a = _up_phase_im2col(x)                      # (4, B*D*H, 4*Cin) bf16
    rows_p, k4, cpad = B * D * H, 4 * Cin, w_ph.shape[-1]
    y = pl.pallas_call(
        _matmul_bias_kernel,
        out_shape=jax.ShapeDtypeStruct((4, rows_p, cpad), jnp.float32),
        grid_spec=pltpu.PrefetchScalarGridSpec(
            num_scalar_prefetch=0,
            grid=(4,),
            in_specs=[pl.BlockSpec((None, rows_p, k4), lambda p: (p, 0, 0)),
                      pl.BlockSpec((None, k4, cpad), lambda p: (p, 0, 0)),
                      pl.BlockSpec((1, cpad), lambda p: (0, 0))],
            out_specs=pl.BlockSpec((None, rows_p, cpad), lambda p: (p, 0, 0))),
        compiler_params=pltpu.CompilerParams(
            dimension_semantics=("parallel",)),   # phases independent (v7x megacore OK)
    )(a, w_ph, b)
    # interleave parities: (pd, ph, b, d, h, c) -> (b, d, pd, h, ph, c) -> (B, 2D, 2H, C)
    y = (y.reshape(2, 2, B, D, H, cpad)
          .transpose(2, 3, 0, 4, 1, 5)
          .reshape(B, 2 * D, 2 * H, cpad))
    return y[..., :cout]


# ---------------- parameters ----------------

def init_params(key, in_size, out_size, cpad=CPAD):
    """Synthetic init mirroring the torch module's shapes / kaiming init, plus packed
    bf16 GEMM operands with out-channels zero-padded to `cpad` lanes."""
    Cin, Cout = in_size, out_size
    k = jax.random.split(key, 8)

    def kaiming(kk, shape, fan_in):
        return jax.random.normal(kk, shape, jnp.float32) * math.sqrt(2.0 / fan_in)

    p = {}
    # up: ConvTranspose3d(in, out, (4,4,1), (2,2,1), (1,1,0)); torch weight (Cin,Cout,4,4,1)
    p['w_up'] = kaiming(k[0], (Cin, Cout, 4, 4, 1), Cout * 16)
    p['b_up'] = 0.05 * jax.random.normal(k[1], (Cout,), jnp.float32)
    # conv1: Conv3d(in, out, (3,3,1), 1, (1,1,0)); torch weight (Cout,Cin,3,3,1)
    p['w_c1'] = kaiming(k[2], (Cout, Cin, 3, 3, 1), Cin * 9)
    p['b_c1'] = 0.05 * jax.random.normal(k[3], (Cout,), jnp.float32)
    p['g1'] = 1.0 + 0.02 * jax.random.normal(k[4], (Cout,), jnp.float32)   # BN weight ~ N(1,0.02)
    p['be1'] = jnp.zeros((Cout,), jnp.float32)
    # conv2: Conv3d(out, out, (3,3,1), 1, (1,1,0))
    p['w_c2'] = kaiming(k[5], (Cout, Cout, 3, 3, 1), Cout * 9)
    p['b_c2'] = 0.05 * jax.random.normal(k[6], (Cout,), jnp.float32)
    p['g2'] = 1.0 + 0.02 * jax.random.normal(k[7], (Cout,), jnp.float32)
    p['be2'] = jnp.zeros((Cout,), jnp.float32)

    def pad_cols(m):
        return jnp.pad(m, ((0, 0), (0, cpad - m.shape[-1])))

    def pad_vec(v):
        return jnp.pad(v, (0, cpad - v.shape[0])).reshape(1, cpad).astype(jnp.float32)

    # conv GEMM weights: row order (kd, kh, ci) matches _im2col; bf16, lane-padded cols.
    p['w_c1_m'] = pad_cols(jnp.transpose(p['w_c1'][..., 0], (2, 3, 1, 0))
                           .reshape(9 * Cin, Cout)).astype(jnp.bfloat16)
    p['w_c2_m'] = pad_cols(jnp.transpose(p['w_c2'][..., 0], (2, 3, 1, 0))
                           .reshape(9 * Cout, Cout)).astype(jnp.bfloat16)

    # transpose-conv 4-phase sub-kernels. For output index o = 2*i - 1 + k:
    #   even rows use taps (k=3, k=1) on padded-window offsets (0, 1),
    #   odd  rows use taps (k=2, k=0) on padded-window offsets (1, 2).
    w4 = p['w_up'][..., 0]                      # (Cin, Cout, kd, kh)
    kidx = ((3, 1), (2, 0))                     # [parity][window offset dd/dh]
    phase_ws = []
    for pd in (0, 1):
        for ph in (0, 1):
            blocks = [w4[:, :, kidx[pd][dd], kidx[ph][dh]]
                      for dd in (0, 1) for dh in (0, 1)]
            phase_ws.append(jnp.concatenate(blocks, axis=0))       # (4*Cin, Cout)
    p['w_up_ph'] = jnp.pad(jnp.stack(phase_ws, 0),
                           ((0, 0), (0, 0), (0, cpad - Cout))).astype(jnp.bfloat16)

    p['b_up_p'] = pad_vec(p['b_up'])
    p['b_c1_p'] = pad_vec(p['b_c1']); p['g1_p'] = pad_vec(p['g1']); p['be1_p'] = pad_vec(p['be1'])
    p['b_c2_p'] = pad_vec(p['b_c2']); p['g2_p'] = pad_vec(p['g2']); p['be2_p'] = pad_vec(p['be2'])
    return p


# ---------------- forward ----------------

def unet_up3_forward(params, inputs1, inputs2):
    """UnetUp3.forward(inputs1, inputs2), is_deconv=True, is_batchnorm=True (training BN)."""
    N, C1, D1, H1, W = inputs1.shape
    _, C2, D2, H2, _ = inputs2.shape
    Cout = params['b_up'].shape[0]

    # F.pad(inputs1, 2*[offset//2, offset//2, 0])  (offset == 0 for matched U-Net shapes)
    offset = 2 * D2 - D1
    po = offset // 2
    x1 = jnp.pad(inputs1, ((0, 0), (0, 0), (po, 0), (0, po), (po, po)))

    def fold(x):  # NCDHW -> (N*W, D, H, C); every kernel is size-1 along W
        n, c, d, h, w = x.shape
        return jnp.transpose(x, (0, 4, 2, 3, 1)).reshape(n * w, d, h, c)

    x1f = fold(x1)
    x2f = fold(inputs2)

    up = conv_transpose_up(x2f, params['w_up_ph'], params['b_up_p'], Cout)   # self.up
    cat = jnp.concatenate([x1f, up], axis=-1)                                # torch.cat(dim=1)

    h = conv3x3_bn_relu(cat, params['w_c1_m'], params['b_c1_p'],
                        params['g1_p'], params['be1_p'], Cout)
    h = conv3x3_bn_relu(h, params['w_c2_m'], params['b_c2_p'],
                        params['g2_p'], params['be2_p'], Cout)

    Do, Ho = h.shape[1], h.shape[2]
    return jnp.transpose(h.reshape(N, W, Do, Ho, Cout), (0, 4, 2, 3, 1))     # back to NCDHW


# ---------------- pure-JAX reference (correctness check) ----------------

def reference_forward(params, inputs1, inputs2, eps=BN_EPS):
    dn = ('NCDHW', 'OIDHW', 'NCDHW')
    hp = lax.Precision.HIGHEST
    # transpose conv as dilated conv with flipped kernel
    w_eq = jnp.transpose(params['w_up'], (1, 0, 2, 3, 4))[:, :, ::-1, ::-1, :]
    out2 = lax.conv_general_dilated(
        inputs2, w_eq, window_strides=(1, 1, 1),
        padding=((2, 2), (2, 2), (0, 0)), lhs_dilation=(2, 2, 1),
        dimension_numbers=dn, precision=hp) + params['b_up'].reshape(1, -1, 1, 1, 1)
    offset = out2.shape[2] - inputs1.shape[2]
    po = offset // 2
    x1 = jnp.pad(inputs1, ((0, 0), (0, 0), (po, 0), (0, po), (po, po)))
    x = jnp.concatenate([x1, out2], axis=1)

    def conv_bn_relu(x, w, b, g, be):
        y = lax.conv_general_dilated(x, w, (1, 1, 1), ((1, 1), (1, 1), (0, 0)),
                                     dimension_numbers=dn, precision=hp)
        y = y + b.reshape(1, -1, 1, 1, 1)
        mean = jnp.mean(y, axis=(0, 2, 3, 4), keepdims=True)
        var = jnp.mean((y - mean) ** 2, axis=(0, 2, 3, 4), keepdims=True)
        y = (y - mean) / jnp.sqrt(var + eps)
        y = y * g.reshape(1, -1, 1, 1, 1) + be.reshape(1, -1, 1, 1, 1)
        return jnp.maximum(y, 0.0)

    x = conv_bn_relu(x, params['w_c1'], params['b_c1'], params['g1'], params['be1'])
    x = conv_bn_relu(x, params['w_c2'], params['b_c2'], params['g2'], params['be2'])
    return x


if __name__ == "__main__":
    in_size, out_size = 16, 8
    N, W = 2, 3
    D2 = H2 = 8   # inputs2 spatial; skip connection has 2x along D, H

    key = jax.random.PRNGKey(0)
    k1, k2, kp = jax.random.split(key, 3)
    inputs2 = jax.random.normal(k1, (N, in_size, D2, H2, W), jnp.float32)
    inputs1 = jax.random.normal(k2, (N, in_size - out_size, 2 * D2, 2 * H2, W), jnp.float32)
    params = init_params(kp, in_size, out_size)

    fwd = jax.jit(unet_up3_forward)
    out = jax.block_until_ready(fwd(params, inputs1, inputs2))
    ref = jax.block_until_ready(reference_forward(params, inputs1, inputs2))

    assert out.shape == (N, out_size, 2 * D2, 2 * H2, W), out.shape
    max_err = float(jnp.max(jnp.abs(out - ref)))
    mean_err = float(jnp.mean(jnp.abs(out - ref)))
    # bf16 GEMM inputs with f32 accumulation (perf review) vs. f32-HIGHEST reference:
    # tolerance sized for two chained bf16 GEMMs; BN renormalizes per channel.
    assert max_err < 8e-2 and mean_err < 8e-3, (max_err, mean_err)
    print("KERNEL_OK")
</pallas_src>

<mosaic_0001>
module attributes {stable_mosaic.version = 11 : i64} {
  func.func @_matmul_bias_kernel(%arg0: i32, %arg1: memref<1x384x64xbf16, #tpu.memory_space<vmem>>, %arg2: memref<1x64x128xbf16, #tpu.memory_space<vmem>>, %arg3: memref<1x128xf32, #tpu.memory_space<vmem>>, %arg4: memref<1x384x128xf32, #tpu.memory_space<vmem>>) attributes {dimension_semantics = [#tpu.dimension_semantics<parallel>], iteration_bounds = array<i64: 4>, scalar_prefetch = 0 : i64, scratch_operands = 0 : i64, tpu.core_type = #tpu.core_type<tc>, window_params = [{transform_indices = @transform_0, window_bounds = array<i64: 1, 384, 64>}, {transform_indices = @transform_1, window_bounds = array<i64: 1, 64, 128>}, {pipeline_mode = #tpu.pipeline_mode<synchronous>, transform_indices = @transform_2, window_bounds = array<i64: 1, 128>}, {transform_indices = @transform_3, window_bounds = array<i64: 1, 384, 128>}]} {
    %c0 = arith.constant 0 : index
    %c0_0 = arith.constant 0 : index
    %c0_1 = arith.constant 0 : index
    %0 = vector.load %arg1[%c0, %c0_0, %c0_1] : memref<1x384x64xbf16, #tpu.memory_space<vmem>>, vector<1x384x64xbf16>
    %1 = vector.shape_cast %0 : vector<1x384x64xbf16> to vector<384x64xbf16>
    %c0_2 = arith.constant 0 : index
    %c0_3 = arith.constant 0 : index
    %c0_4 = arith.constant 0 : index
    %2 = vector.load %arg2[%c0_2, %c0_3, %c0_4] : memref<1x64x128xbf16, #tpu.memory_space<vmem>>, vector<1x64x128xbf16>
    %3 = vector.shape_cast %2 : vector<1x64x128xbf16> to vector<64x128xbf16>
    %cst = arith.constant dense<0.000000e+00> : vector<384x128xf32>
    %4 = tpu.matmul %1, %3, %cst {dimension_numbers = #tpu.dot_dimension_numbers<[1], [0], [0], [1], [0, 0, 1, 1], [], []>} : vector<384x64xbf16>, vector<64x128xbf16>, vector<384x128xf32> -> vector<384x128xf32>
    %c0_5 = arith.constant 0 : index
    %c0_6 = arith.constant 0 : index
    %5 = vector.load %arg3[%c0_5, %c0_6] : memref<1x128xf32, #tpu.memory_space<vmem>>, vector<1x128xf32>
    %6 = vector.broadcast %5 : vector<1x128xf32> to vector<384x128xf32>
    %7 = arith.addf %4, %6 : vector<384x128xf32>
    %c0_7 = arith.constant 0 : index
    %c0_8 = arith.constant 0 : index
    %c0_9 = arith.constant 0 : index
    %8 = vector.load %arg4[%c0_7, %c0_8, %c0_9] : memref<1x384x128xf32, #tpu.memory_space<vmem>>, vector<1x384x128xf32>
    %9 = vector.shape_cast %8 : vector<1x384x128xf32> to vector<384x128xf32>
    %10 = vector.shape_cast %7 : vector<384x128xf32> to vector<1x384x128xf32>
    tpu.vector_store %arg4[%c0_7, %c0_8, %c0_9], %10 {strides = array<i32>} : memref<1x384x128xf32, #tpu.memory_space<vmem>>, vector<1x384x128xf32>,
    return
  }
  func.func @transform_0(%arg0: i32) -> (i32, i32, i32) {
    %c0_i32 = arith.constant 0 : i32
    %c0_i32_0 = arith.constant 0 : i32
    %c0_i32_1 = arith.constant 0 : i32
    return %arg0, %c0_i32, %c0_i32_0 : i32, i32, i32
  }
  func.func @transform_1(%arg0: i32) -> (i32, i32, i32) {
    %c0_i32 = arith.constant 0 : i32
    %c0_i32_0 = arith.constant 0 : i32
    %c0_i32_1 = arith.constant 0 : i32
    return %arg0, %c0_i32, %c0_i32_0 : i32, i32, i32
  }
  func.func @transform_2(%arg0: i32) -> (i32, i32) {
    %c0_i32 = arith.constant 0 : i32
    %c0_i32_0 = arith.constant 0 : i32
    %c0_i32_1 = arith.constant 0 : i32
    return %c0_i32, %c0_i32_0 : i32, i32
  }
  func.func @transform_3(%arg0: i32) -> (i32, i32, i32) {
    %c0_i32 = arith.constant 0 : i32
    %c0_i32_0 = arith.constant 0 : i32
    %c0_i32_1 = arith.constant 0 : i32
    return %arg0, %c0_i32, %c0_i32_0 : i32, i32, i32
  }
}

module attributes {stable_mosaic.version = 11 : i64} {
  func.func @_conv_bn_relu_kernel(%arg0: i32, %arg1: memref<512x144xbf16, #tpu.memory_space<vmem>>, %arg2: memref<144x128xbf16, #tpu.memory_space<vmem>>, %arg3: memref<1x128xf32, #tpu.memory_space<vmem>>, %arg4: memref<1x128xf32, #tpu.memory_space<vmem>>, %arg5: memref<1x128xf32, #tpu.memory_space<vmem>>, %arg6: memref<1536x128xf32, #tpu.memory_space<vmem>>, %arg7: memref<1x128xf32, #tpu.memory_space<vmem>>, %arg8: memref<1x128xf32, #tpu.memory_space<vmem>>) attributes {dimension_semantics = [#tpu.dimension_semantics<arbitrary>], iteration_bounds = array<i64: 3>, scalar_prefetch = 0 : i64, scratch_operands = 2 : i64, tpu.core_type = #tpu.core_type<tc>, window_params = [{transform_indices = @transform_0, window_bounds = array<i64: 512, 144>}, {pipeline_mode = #tpu.pipeline_mode<synchronous>, transform_indices = @transform_1, window_bounds = array<i64: 144, 128>}, {pipeline_mode = #tpu.pipeline_mode<synchronous>, transform_indices = @transform_2, window_bounds = array<i64: 1, 128>}, {pipeline_mode = #tpu.pipeline_mode<synchronous>, transform_indices = @transform_3, window_bounds = array<i64: 1, 128>}, {pipeline_mode = #tpu.pipeline_mode<synchronous>, transform_indices = @transform_4, window_bounds = array<i64: 1, 128>}, {pipeline_mode = #tpu.pipeline_mode<synchronous>, transform_indices = @transform_5, window_bounds = array<i64: 1536, 128>}]} {
    %c0_i32 = arith.constant 0 : i32
    %0 = arith.cmpi eq, %arg0, %c0_i32 : i32
    %1 = arith.extui %0 : i1 to i32
    %c0_i32_0 = arith.constant 0 : i32
    %2 = arith.cmpi ne, %1, %c0_i32_0 : i32
    scf.if %2 {
      %cst_18 = arith.constant 0.000000e+00 : f32
      %27 = vector.broadcast %cst_18 : f32 to vector<1x128xf32>
      %c0_19 = arith.constant 0 : index
      %c0_20 = arith.constant 0 : index
      %28 = vector.load %arg7[%c0_19, %c0_20] : memref<1x128xf32, #tpu.memory_space<vmem>>, vector<1x128xf32>
      tpu.vector_store %arg7[%c0_19, %c0_20], %27 {strides = array<i32>} : memref<1x128xf32, #tpu.memory_space<vmem>>, vector<1x128xf32>,
      %cst_21 = arith.constant 0.000000e+00 : f32
      %29 = vector.broadcast %cst_21 : f32 to vector<1x128xf32>
      %c0_22 = arith.constant 0 : index
      %c0_23 = arith.constant 0 : index
      %30 = vector.load %arg8[%c0_22, %c0_23] : memref<1x128xf32, #tpu.memory_space<vmem>>, vector<1x128xf32>
      tpu.vector_store %arg8[%c0_22, %c0_23], %29 {strides = array<i32>} : memref<1x128xf32, #tpu.memory_space<vmem>>, vector<1x128xf32>,
    } else {
    }
    %c0 = arith.constant 0 : index
    %c0_1 = arith.constant 0 : index
    %3 = vector.load %arg1[%c0, %c0_1] : memref<512x144xbf16, #tpu.memory_space<vmem>>, vector<512x144xbf16>
    %c0_2 = arith.constant 0 : index
    %c0_3 = arith.constant 0 : index
    %4 = vector.load %arg2[%c0_2, %c0_3] : memref<144x128xbf16, #tpu.memory_space<vmem>>, vector<144x128xbf16>
    %cst = arith.constant dense<0.000000e+00> : vector<512x128xf32>
    %5 = tpu.matmul %3, %4, %cst {dimension_numbers = #tpu.dot_dimension_numbers<[1], [0], [0], [1], [0, 0, 1, 1], [], []>} : vector<512x144xbf16>, vector<144x128xbf16>, vector<512x128xf32> -> vector<512x128xf32>
    %c0_4 = arith.constant 0 : index
    %c0_5 = arith.constant 0 : index
    %6 = vector.load %arg3[%c0_4, %c0_5] : memref<1x128xf32, #tpu.memory_space<vmem>>, vector<1x128xf32>
    %7 = vector.broadcast %6 : vector<1x128xf32> to vector<512x128xf32>
    %8 = arith.addf %5, %7 : vector<512x128xf32>
    %c0_6 = arith.constant 0 : index
    %c0_7 = arith.constant 0 : index
    %9 = vector.load %arg7[%c0_6, %c0_7] : memref<1x128xf32, #tpu.memory_space<vmem>>, vector<1x128xf32>
    %cst_8 = arith.constant dense<0.000000e+00> : vector<128xf32>
    %10 = vector.multi_reduction <add>, %8, %cst_8 [0] : vector<512x128xf32> to vector<128xf32>
    %11 = vector.shape_cast %10 : vector<128xf32> to vector<1x128xf32>
    %12 = arith.addf %9, %11 : vector<1x128xf32>
    %c0_9 = arith.constant 0 : index
    %c0_10 = arith.constant 0 : index
    %13 = vector.load %arg7[%c0_9, %c0_10] : memref<1x128xf32, #tpu.memory_space<vmem>>, vector<1x128xf32>
    tpu.vector_store %arg7[%c0_9, %c0_10], %12 {strides = array<i32>} : memref<1x128xf32, #tpu.memory_space<vmem>>, vector<1x128xf32>,
    %c0_11 = arith.constant 0 : index
    %c0_12 = arith.constant 0 : index
    %14 = vector.load %arg8[%c0_11, %c0_12] : memref<1x128xf32, #tpu.memory_space<vmem>>, vector<1x128xf32>
    %15 = arith.mulf %8, %8 : vector<512x128xf32>
    %cst_13 = arith.constant dense<0.000000e+00> : vector<128xf32>
    %16 = vector.multi_reduction <add>, %15, %cst_13 [0] : vector<512x128xf32> to vector<128xf32>
    %17 = vector.shape_cast %16 : vector<128xf32> to vector<1x128xf32>
    %18 = arith.addf %14, %17 : vector<1x128xf32>
    %c0_14 = arith.constant 0 : index
    %c0_15 = arith.constant 0 : index
    %19 = vector.load %arg8[%c0_14, %c0_15] : memref<1x128xf32, #tpu.memory_space<vmem>>, vector<1x128xf32>
    tpu.vector_store %arg8[%c0_14, %c0_15], %18 {strides = array<i32>} : memref<1x128xf32, #tpu.memory_space<vmem>>, vector<1x128xf32>,
    %c512_i32 = arith.constant 512 : i32
    %20 = arith.muli %arg0, %c512_i32 : i32
    %21 = tpu.assume_multiple %20, 512 : i32
    %22 = arith.index_cast %21 : i32 to index
    %c0_16 = arith.constant 0 : index
    %23 = vector.load %arg6[%22, %c0_16] : memref<1536x128xf32, #tpu.memory_space<vmem>>, vector<512x128xf32>
    tpu.vector_store %arg6[%22, %c0_16], %8 {strides = array<i32>} : memref<1536x128xf32, #tpu.memory_space<vmem>>, vector<512x128xf32>,
    %c2_i32 = arith.constant 2 : i32
    %24 = arith.cmpi eq, %arg0, %c2_i32 : i32
    %25 = arith.extui %24 : i1 to i32
    %c0_i32_17 = arith.constant 0 : i32
    %26 = arith.cmpi ne, %25, %c0_i32_17 : i32
    scf.if %26 {
      %c0_18 = arith.constant 0 : index
      %c0_19 = arith.constant 0 : index
      %27 = vector.load %arg7[%c0_18, %c0_19] : memref<1x128xf32, #tpu.memory_space<vmem>>, vector<1x128xf32>
      %cst_20 = arith.constant 6.51041686E-4 : f32
      %28 = vector.broadcast %cst_20 : f32 to vector<1x128xf32>
      %29 = arith.mulf %27, %28 : vector<1x128xf32>
      %c0_21 = arith.constant 0 : index
      %c0_22 = arith.constant 0 : index
      %30 = vector.load %arg8[%c0_21, %c0_22] : memref<1x128xf32, #tpu.memory_space<vmem>>, vector<1x128xf32>
      %cst_23 = arith.constant 6.51041686E-4 : f32
      %31 = vector.broadcast %cst_23 : f32 to vector<1x128xf32>
      %32 = arith.mulf %30, %31 : vector<1x128xf32>
      %33 = arith.mulf %29, %29 : vector<1x128xf32>
      %34 = arith.subf %32, %33 : vector<1x128xf32>
      %c0_24 = arith.constant 0 : index
      %c0_25 = arith.constant 0 : index
      %35 = vector.load %arg4[%c0_24, %c0_25] : memref<1x128xf32, #tpu.memory_space<vmem>>, vector<1x128xf32>
      %cst_26 = arith.constant 9.99999974E-6 : f32
      %36 = vector.broadcast %cst_26 : f32 to vector<1x128xf32>
      %37 = arith.addf %34, %36 : vector<1x128xf32>
      %38 = math.rsqrt %37 : vector<1x128xf32>
      %39 = arith.mulf %35, %38 : vector<1x128xf32>
      %c0_27 = arith.constant 0 : index
      %c0_28 = arith.constant 0 : index
      %40 = vector.load %arg5[%c0_27, %c0_28] : memref<1x128xf32, #tpu.memory_space<vmem>>, vector<1x128xf32>
      %41 = arith.mulf %29, %39 : vector<1x128xf32>
      %42 = arith.subf %40, %41 : vector<1x128xf32>
      %c0_29 = arith.constant 0 : index
      %c0_30 = arith.constant 0 : index
      %43 = vector.load %arg6[%c0_29, %c0_30] : memref<1536x128xf32, #tpu.memory_space<vmem>>, vector<512x128xf32>
      %44 = vector.broadcast %39 : vector<1x128xf32> to vector<512x128xf32>
      %45 = arith.mulf %43, %44 : vector<512x128xf32>
      %46 = vector.broadcast %42 : vector<1x128xf32> to vector<512x128xf32>
      %47 = arith.addf %45, %46 : vector<512x128xf32>
      %cst_31 = arith.constant 0.000000e+00 : f32
      %48 = vector.broadcast %cst_31 : f32 to vector<512x128xf32>
      %49 = arith.maximumf %47, %48 : vector<512x128xf32>
      %c0_32 = arith.constant 0 : index
      %c0_33 = arith.constant 0 : index
      %50 = vector.load %arg6[%c0_32, %c0_33] : memref<1536x128xf32, #tpu.memory_space<vmem>>, vector<512x128xf32>
      tpu.vector_store %arg6[%c0_32, %c0_33], %49 {strides = array<i32>} : memref<1536x128xf32, #tpu.memory_space<vmem>>, vector<512x128xf32>,
      %c512 = arith.constant 512 : index
      %c0_34 = arith.constant 0 : index
      %51 = vector.load %arg6[%c512, %c0_34] : memref<1536x128xf32, #tpu.memory_space<vmem>>, vector<512x128xf32>
      %52 = vector.broadcast %39 : vector<1x128xf32> to vector<512x128xf32>
      %53 = arith.mulf %51, %52 : vector<512x128xf32>
      %54 = vector.broadcast %42 : vector<1x128xf32> to vector<512x128xf32>
      %55 = arith.addf %53, %54 : vector<512x128xf32>
      %cst_35 = arith.constant 0.000000e+00 : f32
      %56 = vector.broadcast %cst_35 : f32 to vector<512x128xf32>
      %57 = arith.maximumf %55, %56 : vector<512x128xf32>
      %c512_36 = arith.constant 512 : index
      %c0_37 = arith.constant 0 : index
      %58 = vector.load %arg6[%c512_36, %c0_37] : memref<1536x128xf32, #tpu.memory_space<vmem>>, vector<512x128xf32>
      tpu.vector_store %arg6[%c512_36, %c0_37], %57 {strides = array<i32>} : memref<1536x128xf32, #tpu.memory_space<vmem>>, vector<512x128xf32>,
      %c1024 = arith.constant 1024 : index
      %c0_38 = arith.constant 0 : index
      %59 = vector.load %arg6[%c1024, %c0_38] : memref<1536x128xf32, #tpu.memory_space<vmem>>, vector<512x128xf32>
      %60 = vector.broadcast %39 : vector<1x128xf32> to vector<512x128xf32>
      %61 = arith.mulf %59, %60 : vector<512x128xf32>
      %62 = vector.broadcast %42 : vector<1x128xf32> to vector<512x128xf32>
      %63 = arith.addf %61, %62 : vector<512x128xf32>
      %cst_39 = arith.constant 0.000000e+00 : f32
      %64 = vector.broadcast %cst_39 : f32 to vector<512x128xf32>
      %65 = arith.maximumf %63, %64 : vector<512x128xf32>
      %c1024_40 = arith.constant 1024 : index
      %c0_41 = arith.constant 0 : index
      %66 = vector.load %arg6[%c1024_40, %c0_41] : memref<1536x128xf32, #tpu.memory_space<vmem>>, vector<512x128xf32>
      tpu.vector_store %arg6[%c1024_40, %c0_41], %65 {strides = array<i32>} : memref<1536x128xf32, #tpu.memory_space<vmem>>, vector<512x128xf32>,
    } else {
    }
    return
  }
  func.func @transform_0(%arg0: i32) -> (i32, i32) {
    %c0_i32 = arith.constant 0 : i32
    %c0_i32_0 = arith.constant 0 : i32
    return %arg0, %c0_i32 : i32, i32
  }
  func.func @transform_1(%arg0: i32) -> (i32, i32) {
    %c0_i32 = arith.constant 0 : i32
    %c0_i32_0 = arith.constant 0 : i32
    %c0_i32_1 = arith.constant 0 : i32
    return %c0_i32, %c0_i32_0 : i32, i32
  }
  func.func @transform_2(%arg0: i32) -> (i32, i32) {
    %c0_i32 = arith.constant 0 : i32
    %c0_i32_0 = arith.constant 0 : i32
    %c0_i32_1 = arith.constant 0 : i32
    return %c0_i32, %c0_i32_0 : i32, i32
  }
  func.func @transform_3(%arg0: i32) -> (i32, i32) {
    %c0_i32 = arith.constant 0 : i32
    %c0_i32_0 = arith.constant 0 : i32
    %c0_i32_1 = arith.constant 0 : i32
    return %c0_i32, %c0_i32_0 : i32, i32
  }
  func.func @transform_4(%arg0: i32) -> (i32, i32) {
    %c0_i32 = arith.constant 0 : i32
    %c0_i32_0 = arith.constant 0 : i32
    %c0_i32_1 = arith.constant 0 : i32
    return %c0_i32, %c0_i32_0 : i32, i32
  }
  func.func @transform_5(%arg0: i32) -> (i32, i32) {
    %c0_i32 = arith.constant 0 : i32
    %c0_i32_0 = arith.constant 0 : i32
    %c0_i32_1 = arith.constant 0 : i32
    return %c0_i32, %c0_i32_0 : i32, i32
  }
}

module attributes {stable_mosaic.version = 11 : i64} {
  func.func @_conv_bn_relu_kernel(%arg0: i32, %arg1: memref<512x72xbf16, #tpu.memory_space<vmem>>, %arg2: memref<72x128xbf16, #tpu.memory_space<vmem>>, %arg3: memref<1x128xf32, #tpu.memory_space<vmem>>, %arg4: memref<1x128xf32, #tpu.memory_space<vmem>>, %arg5: memref<1x128xf32, #tpu.memory_space<vmem>>, %arg6: memref<1536x128xf32, #tpu.memory_space<vmem>>, %arg7: memref<1x128xf32, #tpu.memory_space<vmem>>, %arg8: memref<1x128xf32, #tpu.memory_space<vmem>>) attributes {dimension_semantics = [#tpu.dimension_semantics<arbitrary>], iteration_bounds = array<i64: 3>, scalar_prefetch = 0 : i64, scratch_operands = 2 : i64, tpu.core_type = #tpu.core_type<tc>, window_params = [{transform_indices = @transform_0, window_bounds = array<i64: 512, 72>}, {pipeline_mode = #tpu.pipeline_mode<synchronous>, transform_indices = @transform_1, window_bounds = array<i64: 72, 128>}, {pipeline_mode = #tpu.pipeline_mode<synchronous>, transform_indices = @transform_2, window_bounds = array<i64: 1, 128>}, {pipeline_mode = #tpu.pipeline_mode<synchronous>, transform_indices = @transform_3, window_bounds = array<i64: 1, 128>}, {pipeline_mode = #tpu.pipeline_mode<synchronous>, transform_indices = @transform_4, window_bounds = array<i64: 1, 128>}, {pipeline_mode = #tpu.pipeline_mode<synchronous>, transform_indices = @transform_5, window_bounds = array<i64: 1536, 128>}]} {
    %c0_i32 = arith.constant 0 : i32
    %0 = arith.cmpi eq, %arg0, %c0_i32 : i32
    %1 = arith.extui %0 : i1 to i32
    %c0_i32_0 = arith.constant 0 : i32
    %2 = arith.cmpi ne, %1, %c0_i32_0 : i32
    scf.if %2 {
      %cst_18 = arith.constant 0.000000e+00 : f32
      %27 = vector.broadcast %cst_18 : f32 to vector<1x128xf32>
      %c0_19 = arith.constant 0 : index
      %c0_20 = arith.constant 0 : index
      %28 = vector.load %arg7[%c0_19, %c0_20] : memref<1x128xf32, #tpu.memory_space<vmem>>, vector<1x128xf32>
      tpu.vector_store %arg7[%c0_19, %c0_20], %27 {strides = array<i32>} : memref<1x128xf32, #tpu.memory_space<vmem>>, vector<1x128xf32>,
      %cst_21 = arith.constant 0.000000e+00 : f32
      %29 = vector.broadcast %cst_21 : f32 to vector<1x128xf32>
      %c0_22 = arith.constant 0 : index
      %c0_23 = arith.constant 0 : index
      %30 = vector.load %arg8[%c0_22, %c0_23] : memref<1x128xf32, #tpu.memory_space<vmem>>, vector<1x128xf32>
      tpu.vector_store %arg8[%c0_22, %c0_23], %29 {strides = array<i32>} : memref<1x128xf32, #tpu.memory_space<vmem>>, vector<1x128xf32>,
    } else {
    }
    %c0 = arith.constant 0 : index
    %c0_1 = arith.constant 0 : index
    %3 = vector.load %arg1[%c0, %c0_1] : memref<512x72xbf16, #tpu.memory_space<vmem>>, vector<512x72xbf16>
    %c0_2 = arith.constant 0 : index
    %c0_3 = arith.constant 0 : index
    %4 = vector.load %arg2[%c0_2, %c0_3] : memref<72x128xbf16, #tpu.memory_space<vmem>>, vector<72x128xbf16>
    %cst = arith.constant dense<0.000000e+00> : vector<512x128xf32>
    %5 = tpu.matmul %3, %4, %cst {dimension_numbers = #tpu.dot_dimension_numbers<[1], [0], [0], [1], [0, 0, 1, 1], [], []>} : vector<512x72xbf16>, vector<72x128xbf16>, vector<512x128xf32> -> vector<512x128xf32>
    %c0_4 = arith.constant 0 : index
    %c0_5 = arith.constant 0 : index
    %6 = vector.load %arg3[%c0_4, %c0_5] : memref<1x128xf32, #tpu.memory_space<vmem>>, vector<1x128xf32>
    %7 = vector.broadcast %6 : vector<1x128xf32> to vector<512x128xf32>
    %8 = arith.addf %5, %7 : vector<512x128xf32>
    %c0_6 = arith.constant 0 : index
    %c0_7 = arith.constant 0 : index
    %9 = vector.load %arg7[%c0_6, %c0_7] : memref<1x128xf32, #tpu.memory_space<vmem>>, vector<1x128xf32>
    %cst_8 = arith.constant dense<0.000000e+00> : vector<128xf32>
    %10 = vector.multi_reduction <add>, %8, %cst_8 [0] : vector<512x128xf32> to vector<128xf32>
    %11 = vector.shape_cast %10 : vector<128xf32> to vector<1x128xf32>
    %12 = arith.addf %9, %11 : vector<1x128xf32>
    %c0_9 = arith.constant 0 : index
    %c0_10 = arith.constant 0 : index
    %13 = vector.load %arg7[%c0_9, %c0_10] : memref<1x128xf32, #tpu.memory_space<vmem>>, vector<1x128xf32>
    tpu.vector_store %arg7[%c0_9, %c0_10], %12 {strides = array<i32>} : memref<1x128xf32, #tpu.memory_space<vmem>>, vector<1x128xf32>,
    %c0_11 = arith.constant 0 : index
    %c0_12 = arith.constant 0 : index
    %14 = vector.load %arg8[%c0_11, %c0_12] : memref<1x128xf32, #tpu.memory_space<vmem>>, vector<1x128xf32>
    %15 = arith.mulf %8, %8 : vector<512x128xf32>
    %cst_13 = arith.constant dense<0.000000e+00> : vector<128xf32>
    %16 = vector.multi_reduction <add>, %15, %cst_13 [0] : vector<512x128xf32> to vector<128xf32>
    %17 = vector.shape_cast %16 : vector<128xf32> to vector<1x128xf32>
    %18 = arith.addf %14, %17 : vector<1x128xf32>
    %c0_14 = arith.constant 0 : index
    %c0_15 = arith.constant 0 : index
    %19 = vector.load %arg8[%c0_14, %c0_15] : memref<1x128xf32, #tpu.memory_space<vmem>>, vector<1x128xf32>
    tpu.vector_store %arg8[%c0_14, %c0_15], %18 {strides = array<i32>} : memref<1x128xf32, #tpu.memory_space<vmem>>, vector<1x128xf32>,
    %c512_i32 = arith.constant 512 : i32
    %20 = arith.muli %arg0, %c512_i32 : i32
    %21 = tpu.assume_multiple %20, 512 : i32
    %22 = arith.index_cast %21 : i32 to index
    %c0_16 = arith.constant 0 : index
    %23 = vector.load %arg6[%22, %c0_16] : memref<1536x128xf32, #tpu.memory_space<vmem>>, vector<512x128xf32>
    tpu.vector_store %arg6[%22, %c0_16], %8 {strides = array<i32>} : memref<1536x128xf32, #tpu.memory_space<vmem>>, vector<512x128xf32>,
    %c2_i32 = arith.constant 2 : i32
    %24 = arith.cmpi eq, %arg0, %c2_i32 : i32
    %25 = arith.extui %24 : i1 to i32
    %c0_i32_17 = arith.constant 0 : i32
    %26 = arith.cmpi ne, %25, %c0_i32_17 : i32
    scf.if %26 {
      %c0_18 = arith.constant 0 : index
      %c0_19 = arith.constant 0 : index
      %27 = vector.load %arg7[%c0_18, %c0_19] : memref<1x128xf32, #tpu.memory_space<vmem>>, vector<1x128xf32>
      %cst_20 = arith.constant 6.51041686E-4 : f32
      %28 = vector.broadcast %cst_20 : f32 to vector<1x128xf32>
      %29 = arith.mulf %27, %28 : vector<1x128xf32>
      %c0_21 = arith.constant 0 : index
      %c0_22 = arith.constant 0 : index
      %30 = vector.load %arg8[%c0_21, %c0_22] : memref<1x128xf32, #tpu.memory_space<vmem>>, vector<1x128xf32>
      %cst_23 = arith.constant 6.51041686E-4 : f32
      %31 = vector.broadcast %cst_23 : f32 to vector<1x128xf32>
      %32 = arith.mulf %30, %31 : vector<1x128xf32>
      %33 = arith.mulf %29, %29 : vector<1x128xf32>
      %34 = arith.subf %32, %33 : vector<1x128xf32>
      %c0_24 = arith.constant 0 : index
      %c0_25 = arith.constant 0 : index
      %35 = vector.load %arg4[%c0_24, %c0_25] : memref<1x128xf32, #tpu.memory_space<vmem>>, vector<1x128xf32>
      %cst_26 = arith.constant 9.99999974E-6 : f32
      %36 = vector.broadcast %cst_26 : f32 to vector<1x128xf32>
      %37 = arith.addf %34, %36 : vector<1x128xf32>
      %38 = math.rsqrt %37 : vector<1x128xf32>
      %39 = arith.mulf %35, %38 : vector<1x128xf32>
      %c0_27 = arith.constant 0 : index
      %c0_28 = arith.constant 0 : index
      %40 = vector.load %arg5[%c0_27, %c0_28] : memref<1x128xf32, #tpu.memory_space<vmem>>, vector<1x128xf32>
      %41 = arith.mulf %29, %39 : vector<1x128xf32>
      %42 = arith.subf %40, %41 : vector<1x128xf32>
      %c0_29 = arith.constant 0 : index
      %c0_30 = arith.constant 0 : index
      %43 = vector.load %arg6[%c0_29, %c0_30] : memref<1536x128xf32, #tpu.memory_space<vmem>>, vector<512x128xf32>
      %44 = vector.broadcast %39 : vector<1x128xf32> to vector<512x128xf32>
      %45 = arith.mulf %43, %44 : vector<512x128xf32>
      %46 = vector.broadcast %42 : vector<1x128xf32> to vector<512x128xf32>
      %47 = arith.addf %45, %46 : vector<512x128xf32>
      %cst_31 = arith.constant 0.000000e+00 : f32
      %48 = vector.broadcast %cst_31 : f32 to vector<512x128xf32>
      %49 = arith.maximumf %47, %48 : vector<512x128xf32>
      %c0_32 = arith.constant 0 : index
      %c0_33 = arith.constant 0 : index
      %50 = vector.load %arg6[%c0_32, %c0_33] : memref<1536x128xf32, #tpu.memory_space<vmem>>, vector<512x128xf32>
      tpu.vector_store %arg6[%c0_32, %c0_33], %49 {strides = array<i32>} : memref<1536x128xf32, #tpu.memory_space<vmem>>, vector<512x128xf32>,
      %c512 = arith.constant 512 : index
      %c0_34 = arith.constant 0 : index
      %51 = vector.load %arg6[%c512, %c0_34] : memref<1536x128xf32, #tpu.memory_space<vmem>>, vector<512x128xf32>
      %52 = vector.broadcast %39 : vector<1x128xf32> to vector<512x128xf32>
      %53 = arith.mulf %51, %52 : vector<512x128xf32>
      %54 = vector.broadcast %42 : vector<1x128xf32> to vector<512x128xf32>
      %55 = arith.addf %53, %54 : vector<512x128xf32>
      %cst_35 = arith.constant 0.000000e+00 : f32
      %56 = vector.broadcast %cst_35 : f32 to vector<512x128xf32>
      %57 = arith.maximumf %55, %56 : vector<512x128xf32>
      %c512_36 = arith.constant 512 : index
      %c0_37 = arith.constant 0 : index
      %58 = vector.load %arg6[%c512_36, %c0_37] : memref<1536x128xf32, #tpu.memory_space<vmem>>, vector<512x128xf32>
      tpu.vector_store %arg6[%c512_36, %c0_37], %57 {strides = array<i32>} : memref<1536x128xf32, #tpu.memory_space<vmem>>, vector<512x128xf32>,
      %c1024 = arith.constant 1024 : index
      %c0_38 = arith.constant 0 : index
      %59 = vector.load %arg6[%c1024, %c0_38] : memref<1536x128xf32, #tpu.memory_space<vmem>>, vector<512x128xf32>
      %60 = vector.broadcast %39 : vector<1x128xf32> to vector<512x128xf32>
      %61 = arith.mulf %59, %60 : vector<512x128xf32>
      %62 = vector.broadcast %42 : vector<1x128xf32> to vector<512x128xf32>
      %63 = arith.addf %61, %62 : vector<512x128xf32>
      %cst_39 = arith.constant 0.000000e+00 : f32
      %64 = vector.broadcast %cst_39 : f32 to vector<512x128xf32>
      %65 = arith.maximumf %63, %64 : vector<512x128xf32>
      %c1024_40 = arith.constant 1024 : index
      %c0_41 = arith.constant 0 : index
      %66 = vector.load %arg6[%c1024_40, %c0_41] : memref<1536x128xf32, #tpu.memory_space<vmem>>, vector<512x128xf32>
      tpu.vector_store %arg6[%c1024_40, %c0_41], %65 {strides = array<i32>} : memref<1536x128xf32, #tpu.memory_space<vmem>>, vector<512x128xf32>,
    } else {
    }
    return
  }
  func.func @transform_0(%arg0: i32) -> (i32, i32) {
    %c0_i32 = arith.constant 0 : i32
    %c0_i32_0 = arith.constant 0 : i32
    return %arg0, %c0_i32 : i32, i32
  }
  func.func @transform_1(%arg0: i32) -> (i32, i32) {
    %c0_i32 = arith.constant 0 : i32
    %c0_i32_0 = arith.constant 0 : i32
    %c0_i32_1 = arith.constant 0 : i32
    return %c0_i32, %c0_i32_0 : i32, i32
  }
  func.func @transform_2(%arg0: i32) -> (i32, i32) {
    %c0_i32 = arith.constant 0 : i32
    %c0_i32_0 = arith.constant 0 : i32
    %c0_i32_1 = arith.constant 0 : i32
    return %c0_i32, %c0_i32_0 : i32, i32
  }
  func.func @transform_3(%arg0: i32) -> (i32, i32) {
    %c0_i32 = arith.constant 0 : i32
    %c0_i32_0 = arith.constant 0 : i32
    %c0_i32_1 = arith.constant 0 : i32
    return %c0_i32, %c0_i32_0 : i32, i32
  }
  func.func @transform_4(%arg0: i32) -> (i32, i32) {
    %c0_i32 = arith.constant 0 : i32
    %c0_i32_0 = arith.constant 0 : i32
    %c0_i32_1 = arith.constant 0 : i32
    return %c0_i32, %c0_i32_0 : i32, i32
  }
  func.func @transform_5(%arg0: i32) -> (i32, i32) {
    %c0_i32 = arith.constant 0 : i32
    %c0_i32_0 = arith.constant 0 : i32
    %c0_i32_1 = arith.constant 0 : i32
    return %c0_i32, %c0_i32_0 : i32, i32
  }
}

</mosaic_0001>

<bundles_post_ra>
// kernel: unet_up3_forward.3
= control target key start
LH: loop header
LB: loop body
LE: loop exit
PB: predicated region body
PF: predicated region fallthrough
CT: control target
= control target key end

     0   :  { %s1035_s12 = smov 0   ;;  %s1213_s0 = inlined_call_operand.vmem [shape: bf16[4,384,64], index: 0, kind: input, shape index: {}]   ;;  %s1214_s1 = inlined_call_operand.vmem [shape: bf16[4,64,128], index: 1, kind: input, shape index: {}]   ;;  %s1215_s2 = inlined_call_operand.vmem [shape: f32[1,128], index: 2, kind: input, shape index: {}]   ;;  %s1216_s3 = inlined_call_operand.vmem [shape: f32[4,384,128], index: 3, kind: output, shape index: {}]  }
   0x1 LB: > { %s812_s13 = sadd.s32 4294967295, %s1013_s12   ;;  %p816_p0 = scmp.ge.s32.totalorder %s1013_s12, 1  ;;  %s1013_s12 = sphi %s1035_s12, %s13_s12  }
   0x2   : > { %p147_p1 = scmp.lt.s32.totalorder %s1013_s12, 5 }
   0x4   : > { %p148_p2 = pnand %p816_p0, %p147_p1 }
   0x5   : > { %p176_p3 = scmp.lt.s32.totalorder (!%p148_p2), %s812_s13, 3  ;;  %vm399_vm0 = vcmask (!%p148_p2), 523264   ;;  %v1107_v28 = vld [vmem:[%s1215_s2] ss:$0 sm:$0xff] (!%p148_p2) }
   0x6   : > { %151 = sbr.rel (%p148_p2) target bundleno = 291 (0x123), region = 32 }
   0xd   : > { %s1218_s13 = smov (!%p176_p3, %s812_s13), 3 }
   0xe   : > { %s969_s14 = smul.u32 192, %s1218_s13  ;;  %s876_s15 = sshll.u32 %s1218_s13, 5 }
   0xf   : > { %s185_s18 = scalar_lea.vmem %s1214_s1, %s876_s15  ;;  %s970_s22 = smul.u32 384, %s1218_s13 }
  0x10   : > { %v979_v0 = vld [vmem:[%s185_s18] sm:$0xff]   ;;  %s1053_s21 = scalar_lea.vmem %s1213_s0, %s969_s14  ;;  %v980_v1 = vld [vmem:[%s185_s18 + $0x8] sm:$0xff]   ;;  %v981_v2 = vld [vmem:[%s185_s18 + $0x10] sm:$0xff]  }
  0x11   : > { %905 = vmatprep.subr.bf16.mxu0 %v979_v0  ;;  %961 = vmatprep.subr.bf16.mxu1 %v979_v0  ;;  %v983_v3 = vld [vmem:[%s1053_s21] sm:$0xff]   ;;  %v982_v5 = vld [vmem:[%s185_s18 + $0x18] sm:$0xff]   ;;  %v985_v6 = vld [vmem:[%s1053_s21 + $0x8] sm:$0xff]   ;;  %s1112_s27 = scalar_lea.vmem %s1216_s3, %s970_s22 }
  0x12   : > { %906 = vmatpush3.bf16.msra.mxu0 %v979_v0  ;;  %965 = vmatpush3.bf16.msra.mxu1 %v979_v0  ;;  %v984_v4 = vld [vmem:[%s1053_s21 + $0x60] sm:$0xff]   ;;  %v986_v7 = vld [vmem:[%s1053_s21 + $0x68] sm:$0xff]   ;;  %v987_v8 = vld [vmem:[%s1053_s21 + $0x10] sm:$0xff]  }
  0x13   : > { %907 = vmatprep.subr.bf16.mxu0 %v980_v1  ;;  %962 = vmatprep.subr.bf16.mxu1 %v980_v1  ;;  %v988_v9 = vld [vmem:[%s1053_s21 + $0x70] sm:$0xff]   ;;  %v989_v10 = vld [vmem:[%s1053_s21 + $0x18] sm:$0xff]   ;;  %v991_v12 = vld [vmem:[%s1053_s21 + $0x20] sm:$0xff]  }
  0x14   : > { %913 = vmatprep.mubr.msk.bf16.mxu0 %vm399_vm0, %v983_v3  ;;  %937 = vmatprep.mubr.msk.bf16.mxu1 %vm399_vm0, %v984_v4  ;;  %v990_v11 = vld [vmem:[%s1053_s21 + $0x78] sm:$0xff]   ;;  %v992_v13 = vld [vmem:[%s1053_s21 + $0x80] sm:$0xff]   ;;  %v993_v14 = vld [vmem:[%s1053_s21 + $0x28] sm:$0xff]  }
  0x15   : > { %v994_v15 = vld [vmem:[%s1053_s21 + $0x88] sm:$0xff]   ;;  %v995_v16 = vld [vmem:[%s1053_s21 + $0x30] sm:$0xff]   ;;  %v997_v18 = vld [vmem:[%s1053_s21 + $0x38] sm:$0xff]  }
  0x16   : > { %908 = vmatpush3.bf16.msra.mxu0 %v980_v1  ;;  %966 = vmatpush3.bf16.msra.mxu1 %v980_v1  ;;  %v996_v17 = vld [vmem:[%s1053_s21 + $0x90] sm:$0xff]   ;;  %v998_v19 = vld [vmem:[%s1053_s21 + $0x98] sm:$0xff]   ;;  %v999_v20 = vld [vmem:[%s1053_s21 + $0x40] sm:$0xff]  }
  0x17   : > { %909 = vmatprep.subr.bf16.mxu0 %v981_v2  ;;  %963 = vmatprep.subr.bf16.mxu1 %v981_v2  ;;  %v1000_v21 = vld [vmem:[%s1053_s21 + $0xa0] sm:$0xff]   ;;  %v1001_v22 = vld [vmem:[%s1053_s21 + $0x48] sm:$0xff]   ;;  %v1003_v24 = vld [vmem:[%s1053_s21 + $0x50] sm:$0xff]  }
  0x18   : > { %v1002_v23 = vld [vmem:[%s1053_s21 + $0xa8] sm:$0xff]   ;;  %v1004_v25 = vld [vmem:[%s1053_s21 + $0xb0] sm:$0xff]   ;;  %v1005_v26 = vld [vmem:[%s1053_s21 + $0x58] sm:$0xff]  }
  0x19   : > { %v1006_v27 = vld [vmem:[%s1053_s21 + $0xb8] sm:$0xff]  }
  0x1a   : > { %910 = vmatpush3.bf16.msra.mxu0 %v981_v2  ;;  %967 = vmatpush3.bf16.msra.mxu1 %v981_v2 }
  0x1b   : > { %911 = vmatprep.subr.bf16.mxu0 %v982_v5  ;;  %964 = vmatprep.subr.bf16.mxu1 %v982_v5 }
  0x1e   : > { %912 = vmatpush3.bf16.msra.mxu0 %v982_v5  ;;  %968 = vmatpush3.bf16.msra.mxu1 %v982_v5 }
  0x21   : > { %914 = vmatmul.mubr.msk.bf16.vlgmr.msra.gmra.mrb[0].mxu0 %vm399_vm0, %v985_v6  ;;  %938 = vmatmul.mubr.msk.bf16.vlgmr.msra.gmra.mrb[0].mxu1 %vm399_vm0, %v986_v7 }
  0x22   : > { %917 = vmatprep.mubr.msk.bf16.mxu0 %vm399_vm0, %v987_v8  ;;  %941 = vmatprep.mubr.msk.bf16.mxu1 %vm399_vm0, %v988_v9 }
  0x29   : > { %918 = vmatmul.mubr.msk.bf16.gmra.mrb[4].mxu0 %vm399_vm0, %v989_v10  ;;  %942 = vmatmul.mubr.msk.bf16.gmra.mrb[4].mxu1 %vm399_vm0, %v990_v11 }
  0x2a   : > { %921 = vmatprep.mubr.msk.bf16.mxu0 %vm399_vm0, %v991_v12  ;;  %945 = vmatprep.mubr.msk.bf16.mxu1 %vm399_vm0, %v992_v13 }
  0x31   : > { %922 = vmatmul.mubr.msk.bf16.gmra.mrb[8].mxu0 %vm399_vm0, %v993_v14  ;;  %946 = vmatmul.mubr.msk.bf16.gmra.mrb[8].mxu1 %vm399_vm0, %v994_v15 }
  0x32   : > { %925 = vmatprep.mubr.msk.bf16.mxu0 %vm399_vm0, %v995_v16  ;;  %949 = vmatprep.mubr.msk.bf16.mxu1 %vm399_vm0, %v996_v17 }
  0x39   : > { %926 = vmatmul.mubr.msk.bf16.gmra.mrb[12].mxu0 %vm399_vm0, %v997_v18  ;;  %950 = vmatmul.mubr.msk.bf16.gmra.mrb[12].mxu1 %vm399_vm0, %v998_v19 }
  0x3a   : > { %929 = vmatprep.mubr.msk.bf16.mxu0 %vm399_vm0, %v999_v20  ;;  %953 = vmatprep.mubr.msk.bf16.mxu1 %vm399_vm0, %v1000_v21 }
  0x41   : > { %930 = vmatmul.mubr.msk.bf16.gmra.mrb[16].mxu0 %vm399_vm0, %v1001_v22  ;;  %954 = vmatmul.mubr.msk.bf16.gmra.mrb[16].mxu1 %vm399_vm0, %v1002_v23 }
  0x42   : > { %933 = vmatprep.mubr.msk.bf16.mxu0 %vm399_vm0, %v1003_v24  ;;  %957 = vmatprep.mubr.msk.bf16.mxu1 %vm399_vm0, %v1004_v25 }
  0x49   : > { %934 = vmatmul.mubr.msk.bf16.gmra.mrb[20].mxu0 %vm399_vm0, %v1005_v26  ;;  %958 = vmatmul.mubr.msk.bf16.gmra.mrb[20].mxu1 %vm399_vm0, %v1006_v27 }
  0xf4   : > { %v915_v29 = vpop.f32.mrb[0].mxu0  ;;  %v939_v30 = vpop.f32.mrb[0].mxu1 }
  0xf5   : > { %v515_v31 = vadd.f32 %v915_v29, %v1107_v28  ;;  %v611_v32 = vadd.f32 %v939_v30, %v1107_v28  ;;  %v506_v33 = vpop.f32.mrb[1].mxu0  ;;  %v602_v34 = vpop.f32.mrb[1].mxu1 }
  0xf6   : > { %v507_v35 = vadd.f32 %v1107_v28, %v506_v33  ;;  %v603_v36 = vadd.f32 %v1107_v28, %v602_v34  ;;  %v916_v37 = vpop.f32.mrb[2].mxu0  ;;  %v940_v38 = vpop.f32.mrb[2].mxu1 }
  0xf7   : > { %699 = vst [vmem:[%s1112_s27 + $0x10] sm:$0xff] %v515_v31  ;;  %723 = vst [vmem:[%s1112_s27 + $0xd0] sm:$0xff] %v611_v32  ;;  %v518_v39 = vadd.f32 %v916_v37, %v1107_v28  ;;  %v614_v40 = vadd.f32 %v940_v38, %v1107_v28  ;;  %v509_v41 = vpop.f32.mrb[3].mxu0  ;;  %v605_v42 = vpop.f32.mrb[3].mxu1 }
  0xf8   : > { %697 = vst [vmem:[%s1112_s27] sm:$0xff] %v507_v35  ;;  %721 = vst [vmem:[%s1112_s27 + $0xc0] sm:$0xff] %v603_v36  ;;  %v510_v43 = vadd.f32 %v1107_v28, %v509_v41  ;;  %v606_v44 = vadd.f32 %v1107_v28, %v605_v42 }
  0xf9   : > { %700 = vst [vmem:[%s1112_s27 + $0x18] sm:$0xff] %v518_v39  ;;  %724 = vst [vmem:[%s1112_s27 + $0xd8] sm:$0xff] %v614_v40 }
  0xfa   : > { %698 = vst [vmem:[%s1112_s27 + $0x8] sm:$0xff] %v510_v43  ;;  %722 = vst [vmem:[%s1112_s27 + $0xc8] sm:$0xff] %v606_v44 }
  0xfc   : > { %v919_v45 = vpop.f32.mrb[4].mxu0  ;;  %v943_v46 = vpop.f32.mrb[4].mxu1 }
  0xfd   : > { %v531_v47 = vadd.f32 %v919_v45, %v1107_v28  ;;  %v627_v48 = vadd.f32 %v943_v46, %v1107_v28  ;;  %v522_v49 = vpop.f32.mrb[5].mxu0  ;;  %v618_v50 = vpop.f32.mrb[5].mxu1 }
  0xfe   : > { %v523_v51 = vadd.f32 %v1107_v28, %v522_v49  ;;  %v619_v52 = vadd.f32 %v1107_v28, %v618_v50  ;;  %v920_v53 = vpop.f32.mrb[6].mxu0  ;;  %v944_v54 = vpop.f32.mrb[6].mxu1 }
  0xff   : > { %703 = vst [vmem:[%s1112_s27 + $0x30] sm:$0xff] %v531_v47  ;;  %727 = vst [vmem:[%s1112_s27 + $0xf0] sm:$0xff] %v627_v48  ;;  %v534_v55 = vadd.f32 %v920_v53, %v1107_v28  ;;  %v630_v56 = vadd.f32 %v944_v54, %v1107_v28  ;;  %v525_v57 = vpop.f32.mrb[7].mxu0  ;;  %v621_v58 = vpop.f32.mrb[7].mxu1 }
 0x100   : > { %701 = vst [vmem:[%s1112_s27 + $0x20] sm:$0xff] %v523_v51  ;;  %725 = vst [vmem:[%s1112_s27 + $0xe0] sm:$0xff] %v619_v52  ;;  %v526_v59 = vadd.f32 %v1107_v28, %v525_v57  ;;  %v622_v60 = vadd.f32 %v1107_v28, %v621_v58 }
 0x101   : > { %704 = vst [vmem:[%s1112_s27 + $0x38] sm:$0xff] %v534_v55  ;;  %728 = vst [vmem:[%s1112_s27 + $0xf8] sm:$0xff] %v630_v56 }
 0x102   : > { %702 = vst [vmem:[%s1112_s27 + $0x28] sm:$0xff] %v526_v59  ;;  %726 = vst [vmem:[%s1112_s27 + $0xe8] sm:$0xff] %v622_v60 }
 0x104   : > { %v923_v61 = vpop.f32.mrb[8].mxu0  ;;  %v947_v62 = vpop.f32.mrb[8].mxu1 }
 0x105   : > { %v547_v63 = vadd.f32 %v923_v61, %v1107_v28  ;;  %v643_v0 = vadd.f32 %v947_v62, %v1107_v28  ;;  %v538_v1 = vpop.f32.mrb[9].mxu0  ;;  %v634_v2 = vpop.f32.mrb[9].mxu1 }
 0x106   : > { %v539_v3 = vadd.f32 %v1107_v28, %v538_v1  ;;  %v635_v4 = vadd.f32 %v1107_v28, %v634_v2  ;;  %v924_v5 = vpop.f32.mrb[10].mxu0  ;;  %v948_v6 = vpop.f32.mrb[10].mxu1 }
 0x107   : > { %707 = vst [vmem:[%s1112_s27 + $0x50] sm:$0xff] %v547_v63  ;;  %731 = vst [vmem:[%s1112_s27 + $0x110] sm:$0xff] %v643_v0  ;;  %v550_v7 = vadd.f32 %v924_v5, %v1107_v28  ;;  %v646_v8 = vadd.f32 %v948_v6, %v1107_v28  ;;  %v541_v9 = vpop.f32.mrb[11].mxu0  ;;  %v637_v10 = vpop.f32.mrb[11].mxu1 }
 0x108   : > { %705 = vst [vmem:[%s1112_s27 + $0x40] sm:$0xff] %v539_v3  ;;  %729 = vst [vmem:[%s1112_s27 + $0x100] sm:$0xff] %v635_v4  ;;  %v542_v11 = vadd.f32 %v1107_v28, %v541_v9  ;;  %v638_v12 = vadd.f32 %v1107_v28, %v637_v10 }
 0x109   : > { %708 = vst [vmem:[%s1112_s27 + $0x58] sm:$0xff] %v550_v7  ;;  %732 = vst [vmem:[%s1112_s27 + $0x118] sm:$0xff] %v646_v8 }
 0x10a   : > { %706 = vst [vmem:[%s1112_s27 + $0x48] sm:$0xff] %v542_v11  ;;  %730 = vst [vmem:[%s1112_s27 + $0x108] sm:$0xff] %v638_v12 }
 0x10c   : > { %v927_v13 = vpop.f32.mrb[12].mxu0  ;;  %v951_v14 = vpop.f32.mrb[12].mxu1 }
 0x10d   : > { %v563_v15 = vadd.f32 %v927_v13, %v1107_v28  ;;  %v659_v16 = vadd.f32 %v951_v14, %v1107_v28  ;;  %v554_v17 = vpop.f32.mrb[13].mxu0  ;;  %v650_v18 = vpop.f32.mrb[13].mxu1 }
 0x10e   : > { %v555_v19 = vadd.f32 %v1107_v28, %v554_v17  ;;  %v651_v20 = vadd.f32 %v1107_v28, %v650_v18  ;;  %v928_v21 = vpop.f32.mrb[14].mxu0  ;;  %v952_v22 = vpop.f32.mrb[14].mxu1 }
 0x10f   : > { %711 = vst [vmem:[%s1112_s27 + $0x70] sm:$0xff] %v563_v15  ;;  %735 = vst [vmem:[%s1112_s27 + $0x130] sm:$0xff] %v659_v16  ;;  %v566_v23 = vadd.f32 %v928_v21, %v1107_v28  ;;  %v662_v24 = vadd.f32 %v952_v22, %v1107_v28  ;;  %v557_v25 = vpop.f32.mrb[15].mxu0  ;;  %v653_v26 = vpop.f32.mrb[15].mxu1 }
 0x110   : > { %709 = vst [vmem:[%s1112_s27 + $0x60] sm:$0xff] %v555_v19  ;;  %733 = vst [vmem:[%s1112_s27 + $0x120] sm:$0xff] %v651_v20  ;;  %v558_v27 = vadd.f32 %v1107_v28, %v557_v25  ;;  %v654_v29 = vadd.f32 %v1107_v28, %v653_v26 }
 0x111   : > { %712 = vst [vmem:[%s1112_s27 + $0x78] sm:$0xff] %v566_v23  ;;  %736 = vst [vmem:[%s1112_s27 + $0x138] sm:$0xff] %v662_v24 }
 0x112   : > { %710 = vst [vmem:[%s1112_s27 + $0x68] sm:$0xff] %v558_v27  ;;  %734 = vst [vmem:[%s1112_s27 + $0x128] sm:$0xff] %v654_v29 }
 0x114   : > { %v931_v30 = vpop.f32.mrb[16].mxu0  ;;  %v955_v31 = vpop.f32.mrb[16].mxu1 }
 0x115   : > { %v579_v32 = vadd.f32 %v931_v30, %v1107_v28  ;;  %v675_v33 = vadd.f32 %v955_v31, %v1107_v28  ;;  %v570_v34 = vpop.f32.mrb[17].mxu0  ;;  %v666_v35 = vpop.f32.mrb[17].mxu1 }
 0x116   : > { %v571_v36 = vadd.f32 %v1107_v28, %v570_v34  ;;  %v667_v37 = vadd.f32 %v1107_v28, %v666_v35  ;;  %v932_v38 = vpop.f32.mrb[18].mxu0  ;;  %v956_v39 = vpop.f32.mrb[18].mxu1 }
 0x117   : > { %715 = vst [vmem:[%s1112_s27 + $0x90] sm:$0xff] %v579_v32  ;;  %739 = vst [vmem:[%s1112_s27 + $0x150] sm:$0xff] %v675_v33  ;;  %v582_v40 = vadd.f32 %v932_v38, %v1107_v28  ;;  %v678_v41 = vadd.f32 %v956_v39, %v1107_v28  ;;  %v573_v42 = vpop.f32.mrb[19].mxu0  ;;  %v669_v43 = vpop.f32.mrb[19].mxu1 }
 0x118   : > { %713 = vst [vmem:[%s1112_s27 + $0x80] sm:$0xff] %v571_v36  ;;  %737 = vst [vmem:[%s1112_s27 + $0x140] sm:$0xff] %v667_v37  ;;  %v574_v44 = vadd.f32 %v1107_v28, %v573_v42  ;;  %v670_v45 = vadd.f32 %v1107_v28, %v669_v43 }
 0x119   : > { %716 = vst [vmem:[%s1112_s27 + $0x98] sm:$0xff] %v582_v40  ;;  %740 = vst [vmem:[%s1112_s27 + $0x158] sm:$0xff] %v678_v41 }
 0x11a   : > { %714 = vst [vmem:[%s1112_s27 + $0x88] sm:$0xff] %v574_v44  ;;  %738 = vst [vmem:[%s1112_s27 + $0x148] sm:$0xff] %v670_v45 }
 0x11c   : > { %v935_v46 = vpop.f32.mrb[20].mxu0  ;;  %v959_v47 = vpop.f32.mrb[20].mxu1 }
 0x11d   : > { %v595_v48 = vadd.f32 %v935_v46, %v1107_v28  ;;  %v691_v49 = vadd.f32 %v959_v47, %v1107_v28  ;;  %v586_v50 = vpop.f32.mrb[21].mxu0  ;;  %v682_v51 = vpop.f32.mrb[21].mxu1 }
 0x11e   : > { %v587_v52 = vadd.f32 %v1107_v28, %v586_v50  ;;  %v683_v53 = vadd.f32 %v1107_v28, %v682_v51  ;;  %v936_v54 = vpop.f32.mrb[22].mxu0  ;;  %v960_v55 = vpop.f32.mrb[22].mxu1 }
 0x11f   : > { %719 = vst [vmem:[%s1112_s27 + $0xb0] sm:$0xff] %v595_v48  ;;  %743 = vst [vmem:[%s1112_s27 + $0x170] sm:$0xff] %v691_v49  ;;  %v598_v56 = vadd.f32 %v936_v54, %v1107_v28  ;;  %v694_v57 = vadd.f32 %v960_v55, %v1107_v28  ;;  %v589_v58 = vpop.f32.mrb[23].mxu0  ;;  %v685_v59 = vpop.f32.mrb[23].mxu1 }
 0x120   : > { %717 = vst [vmem:[%s1112_s27 + $0xa0] sm:$0xff] %v587_v52  ;;  %741 = vst [vmem:[%s1112_s27 + $0x160] sm:$0xff] %v683_v53  ;;  %v590_v60 = vadd.f32 %v1107_v28, %v589_v58  ;;  %v686_v61 = vadd.f32 %v1107_v28, %v685_v59 }
 0x121   : > { %720 = vst [vmem:[%s1112_s27 + $0xb8] sm:$0xff] %v598_v56  ;;  %744 = vst [vmem:[%s1112_s27 + $0x178] sm:$0xff] %v694_v57 }
 0x122   : > { %718 = vst [vmem:[%s1112_s27 + $0xa8] sm:$0xff] %v590_v60  ;;  %742 = vst [vmem:[%s1112_s27 + $0x168] sm:$0xff] %v686_v61 }
 0x123 PF: > { %s13_s12 = sadd.s32 1, %s1013_s12  }
 0x124   : > { %p10_p4 = scmp.ge.s32.totalorder %s13_s12, 6  }
 0x126   :  { %12 = sbr.rel (!%p10_p4) target bundleno = 1 (0x1), region = 65 }

// kernel: unet_up3_forward.4
= control target key start
LH: loop header
LB: loop body
LE: loop exit
PB: predicated region body
PF: predicated region fallthrough
CT: control target
= control target key end

     0   :  { %s2626_s18 = smov 0   ;;  %s4647_s0 = inlined_call_operand.vmem [shape: bf16[1536,144], index: 0, kind: input, shape index: {}]   ;;  %s4648_s1 = inlined_call_operand.vmem [shape: bf16[144,128], index: 1, kind: input, shape index: {}]   ;;  %s4649_s2 = inlined_call_operand.vmem [shape: f32[1,128], index: 2, kind: input, shape index: {}]   ;;  %s4650_s3 = inlined_call_operand.vmem [shape: f32[1,128], index: 3, kind: input, shape index: {}]   ;;  %s4651_s4 = inlined_call_operand.vmem [shape: f32[1,128], index: 4, kind: input, shape index: {}]   ;;  %s4652_s5 = inlined_call_operand.vmem [shape: f32[1536,128], index: 5, kind: output, shape index: {}]  }
   0x1 LB: > { %s2632_s19 = sadd.s32 4294967295, %s2592_s18   ;;  %p2335_p0 = scmp.ge.s32.totalorder %s2592_s18, 1  ;;  %s2592_s18 = sphi %s2626_s18, %s15_s18  }
   0x2   : > { %p184_p1 = scmp.lt.s32.totalorder %s2592_s18, 4 }
   0x4   : > { %p185_p2 = pnand %p2335_p0, %p184_p1 }
   0x5   : > { %s2336_s20 = sshll.u32 (!%p185_p2), %s2632_s19, 6  ;;  %p2339_p4 = scmp.ne.s32.totalorder (!%p185_p2), %s2632_s19, 0 }
   0x6   : > { %188 = sbr.rel (%p185_p2) target bundleno = 654 (0x28e), region = 40  ;;  %p209_p3 = scmp.lt.s32.totalorder (!%p185_p2), %s2336_s20, 191 }
   0xd   : > { %s4654_s20 = smov (!%p209_p3, %s2336_s20), 191  ;;  %219 = sbr.rel (%p2339_p4) target bundleno = 20 (0x14), region = 44 }
   0xe   : > { %s2450_s21 = sshll.u32 %s4654_s20, 3  ;;  %v2594_v0 = vmov (!%p2339_p4), 0.0  }
   0xf   : > { %s2640_s24 = scalar_lea.vmem %s4647_s0, %s2450_s21  ;;  %220 = vst [vmem:[#allocation2] sm:$0x1] (!%p2339_p4), %v2594_v0  ;;  %221 = vst [vmem:[#allocation3] sm:$0x1] (!%p2339_p4), %v2594_v0 }
  0x14 PF: > { %v2479_v1 = vld [vmem:[%s4648_s1] sm:$0xff]   ;;  %v2595_v2 = vmov 0   ;;  %v2480_v3 = vld [vmem:[%s4648_s1 + $0x8] sm:$0xff]   ;;  %v2481_v4 = vld [vmem:[%s4648_s1 + $0x10] sm:$0xff]   ;;  %vm653_vm0 = vcmask 130048   ;;  %s2446_s20 = sshll.u32 %s2632_s19, 9 }
  0x15   : > { %750 = vmatprep.subr.bf16.mxu0 %v2595_v2  ;;  %2451 = vmatprep.subr.bf16.mxu1 %v2595_v2  ;;  %v2482_v5 = vld [vmem:[%s4648_s1 + $0x18] sm:$0xff]   ;;  %v2490_v6 = vld [vmem:[%s2640_s24 + $0x4] ss:$8 sps:$4 sm:$0xff]   ;;  %v2485_v10 = vld [vmem:[%s4648_s1 + $0x30] sm:$0xff]   ;;  %s2775_s26 = scalar_lea.vmem %s4652_s5, %s2446_s20  ;;  %p2447_p5 = scmp.ne.s32.totalorder %s2632_s19, 2 }
  0x16   : > { %751 = vmatpush1.bf16.msra.mxu0 %v2479_v1  ;;  %2460 = vmatpush1.bf16.msra.mxu1 %v2479_v1  ;;  %v2483_v7 = vld [vmem:[%s4648_s1 + $0x20] sm:$0xff]   ;;  %v2484_v8 = vld [vmem:[%s4648_s1 + $0x28] sm:$0xff]   ;;  %v2486_v11 = vld [vmem:[%s4648_s1 + $0x38] sm:$0xff]  }
  0x17   : > { %752 = vmatprep.subr.bf16.mxu0 %v2595_v2  ;;  %2452 = vmatprep.subr.bf16.mxu1 %v2595_v2  ;;  %v2514_v9 = vld [vmem:[%s2640_s24 + $0x104] ss:$8 sps:$4 sm:$0xff]   ;;  %v2488_v13 = vld [vmem:[%s2640_s24] ss:$8 sps:$4 sm:$0xff]   ;;  %v2491_v14 = vld [vmem:[%s2640_s24 + $0x14] ss:$8 sps:$4 sm:$0xff]  }
  0x18   : > { %2414 = vmatprep.mubr.msk.bf16.mxu0 %vm653_vm0, %v2490_v6  ;;  %2430 = vmatprep.mubr.msk.bf16.mxu1 %vm653_vm0, %v2514_v9  ;;  %v2487_v12 = vld [vmem:[%s4648_s1 + $0x40] sm:$0xff]   ;;  %v2518_v16 = vld [vmem:[%s2640_s24 + $0x114] ss:$8 sps:$4 sm:$0xff]   ;;  %v2493_v17 = vld [vmem:[%s2640_s24 + $0x10] ss:$8 sps:$4 sm:$0xff]  }
  0x19   : > { %v2512_v15 = vld [vmem:[%s2640_s24 + $0x100] ss:$8 sps:$4 sm:$0xff]   ;;  %v2494_v18 = vld [vmem:[%s2640_s24 + $0x24] ss:$8 sps:$4 sm:$0xff]   ;;  %v2520_v19 = vld [vmem:[%s2640_s24 + $0x110] ss:$8 sps:$4 sm:$0xff]  }
  0x1a   : > { %753 = vmatpush1.bf16.msra.mxu0 %v2480_v3  ;;  %2461 = vmatpush1.bf16.msra.mxu1 %v2480_v3  ;;  %v2524_v20 = vld [vmem:[%s2640_s24 + $0x124] ss:$8 sps:$4 sm:$0xff]   ;;  %v2496_v21 = vld [vmem:[%s2640_s24 + $0x20] ss:$8 sps:$4 sm:$0xff]   ;;  %v2497_v22 = vld [vmem:[%s2640_s24 + $0x34] ss:$8 sps:$4 sm:$0xff]  }
  0x1b   : > { %754 = vmatprep.subr.bf16.mxu0 %v2595_v2  ;;  %2453 = vmatprep.subr.bf16.mxu1 %v2595_v2  ;;  %v2526_v23 = vld [vmem:[%s2640_s24 + $0x120] ss:$8 sps:$4 sm:$0xff]   ;;  %v2530_v24 = vld [vmem:[%s2640_s24 + $0x134] ss:$8 sps:$4 sm:$0xff]   ;;  %v2499_v25 = vld [vmem:[%s2640_s24 + $0x30] ss:$8 sps:$4 sm:$0xff]  }
  0x1c   : > { %v2532_v26 = vld [vmem:[%s2640_s24 + $0x130] ss:$8 sps:$4 sm:$0xff]   ;;  %v2500_v27 = vld [vmem:[%s2640_s24 + $0x44] ss:$8 sps:$4 sm:$0xff]   ;;  %v2502_v29 = vld [vmem:[%s2640_s24 + $0x40] ss:$8 sps:$4 sm:$0xff]  }
  0x1d   : > { %v2536_v28 = vld [vmem:[%s2640_s24 + $0x144] ss:$8 sps:$4 sm:$0xff]   ;;  %v2538_v30 = vld [vmem:[%s2640_s24 + $0x140] ss:$8 sps:$4 sm:$0xff]   ;;  %v2503_v31 = vld [vmem:[%s2640_s24 + $0x54] ss:$8 sps:$4 sm:$0xff]  }
  0x1e   : > { %755 = vmatpush1.bf16.msra.mxu0 %v2481_v4  ;;  %2462 = vmatpush1.bf16.msra.mxu1 %v2481_v4  ;;  %v2542_v32 = vld [vmem:[%s2640_s24 + $0x154] ss:$8 sps:$4 sm:$0xff]   ;;  %v2505_v33 = vld [vmem:[%s2640_s24 + $0x50] ss:$8 sps:$4 sm:$0xff]   ;;  %v2506_v35 = vld [vmem:[%s2640_s24 + $0x64] ss:$8 sps:$4 sm:$0xff]  }
  0x1f   : > { %756 = vmatprep.subr.bf16.mxu0 %v2595_v2  ;;  %2454 = vmatprep.subr.bf16.mxu1 %v2595_v2  ;;  %v2544_v34 = vld [vmem:[%s2640_s24 + $0x150] ss:$8 sps:$4 sm:$0xff]   ;;  %v2548_v36 = vld [vmem:[%s2640_s24 + $0x164] ss:$8 sps:$4 sm:$0xff]   ;;  %v2508_v37 = vld [vmem:[%s2640_s24 + $0x60] ss:$8 sps:$4 sm:$0xff]  }
  0x20   : > { %v2550_v38 = vld [vmem:[%s2640_s24 + $0x160] ss:$8 sps:$4 sm:$0xff]   ;;  %v2509_v39 = vld [vmem:[%s2640_s24 + $0x74] ss:$8 sps:$4 sm:$0xff]   ;;  %v2511_v41 = vld [vmem:[%s2640_s24 + $0x70] ss:$8 sps:$4 sm:$0xff]  }
  0x21   : > { %v2554_v40 = vld [vmem:[%s2640_s24 + $0x174] ss:$8 sps:$4 sm:$0xff]   ;;  %v2556_v42 = vld [vmem:[%s2640_s24 + $0x170] ss:$8 sps:$4 sm:$0xff]   ;;  %v2515_v43 = vld [vmem:[%s2640_s24 + $0x84] ss:$8 sps:$4 sm:$0xff]  }
  0x22   : > { %757 = vmatpush1.bf16.msra.mxu0 %v2482_v5  ;;  %2463 = vmatpush1.bf16.msra.mxu1 %v2482_v5  ;;  %v2560_v44 = vld [vmem:[%s2640_s24 + $0x184] ss:$8 sps:$4 sm:$0xff]   ;;  %v2517_v45 = vld [vmem:[%s2640_s24 + $0x80] ss:$8 sps:$4 sm:$0xff]   ;;  %v2521_v47 = vld [vmem:[%s2640_s24 + $0x94] ss:$8 sps:$4 sm:$0xff]  }
  0x23   : > { %758 = vmatprep.subr.bf16.mxu0 %v2595_v2  ;;  %2455 = vmatprep.subr.bf16.mxu1 %v2595_v2  ;;  %v2562_v46 = vld [vmem:[%s2640_s24 + $0x180] ss:$8 sps:$4 sm:$0xff]   ;;  %v2563_v48 = vld [vmem:[%s2640_s24 + $0x194] ss:$8 sps:$4 sm:$0xff]   ;;  %v2523_v49 = vld [vmem:[%s2640_s24 + $0x90] ss:$8 sps:$4 sm:$0xff]  }
  0x24   : > { %v2565_v50 = vld [vmem:[%s2640_s24 + $0x190] ss:$8 sps:$4 sm:$0xff]   ;;  %v2527_v51 = vld [vmem:[%s2640_s24 + $0xa4] ss:$8 sps:$4 sm:$0xff]   ;;  %v2529_v53 = vld [vmem:[%s2640_s24 + $0xa0] ss:$8 sps:$4 sm:$0xff]  }
  0x25   : > { %v2566_v52 = vld [vmem:[%s2640_s24 + $0x1a4] ss:$8 sps:$4 sm:$0xff]   ;;  %v2568_v54 = vld [vmem:[%s2640_s24 + $0x1a0] ss:$8 sps:$4 sm:$0xff]   ;;  %v2533_v55 = vld [vmem:[%s2640_s24 + $0xb4] ss:$8 sps:$4 sm:$0xff]  }
  0x26   : > { %759 = vmatpush1.bf16.msra.mxu0 %v2483_v7  ;;  %2464 = vmatpush1.bf16.msra.mxu1 %v2483_v7  ;;  %v2569_v56 = vld [vmem:[%s2640_s24 + $0x1b4] ss:$8 sps:$4 sm:$0xff]   ;;  %v2535_v57 = vld [vmem:[%s2640_s24 + $0xb0] ss:$8 sps:$4 sm:$0xff]   ;;  %v2539_v59 = vld [vmem:[%s2640_s24 + $0xc4] ss:$8 sps:$4 sm:$0xff]  }
  0x27   : > { %760 = vmatprep.subr.bf16.mxu0 %v2595_v2  ;;  %2456 = vmatprep.subr.bf16.mxu1 %v2595_v2  ;;  %v2571_v58 = vld [vmem:[%s2640_s24 + $0x1b0] ss:$8 sps:$4 sm:$0xff]   ;;  %v2572_v60 = vld [vmem:[%s2640_s24 + $0x1c4] ss:$8 sps:$4 sm:$0xff]   ;;  %v2541_v61 = vld [vmem:[%s2640_s24 + $0xc0] ss:$8 sps:$4 sm:$0xff]  }
  0x28   : > { %v2574_v62 = vld [vmem:[%s2640_s24 + $0x1c0] ss:$8 sps:$4 sm:$0xff]   ;;  %v2545_v63 = vld [vmem:[%s2640_s24 + $0xd4] ss:$8 sps:$4 sm:$0xff]   ;;  %v2547_v1 = vld [vmem:[%s2640_s24 + $0xd0] ss:$8 sps:$4 sm:$0xff]  }
  0x29   : > { %v2575_v0 = vld [vmem:[%s2640_s24 + $0x1d4] ss:$8 sps:$4 sm:$0xff]   ;;  %v2551_v3 = vld [vmem:[%s2640_s24 + $0xe4] ss:$8 sps:$4 sm:$0xff]   ;;  %v2553_v5 = vld [vmem:[%s2640_s24 + $0xe0] ss:$8 sps:$4 sm:$0xff]  }
  0x2a   : > { %761 = vmatpush1.bf16.msra.mxu0 %v2484_v8  ;;  %2465 = vmatpush1.bf16.msra.mxu1 %v2484_v8  ;;  %v2578_v4 = vld [vmem:[%s2640_s24 + $0x1e4] ss:$8 sps:$4 sm:$0xff]   ;;  %v2580_v6 = vld [vmem:[%s2640_s24 + $0x1e0] ss:$8 sps:$4 sm:$0xff]   ;;  %v2557_v7 = vld [vmem:[%s2640_s24 + $0xf4] ss:$8 sps:$4 sm:$0xff]  }
  0x2b   : > { %762 = vmatprep.subr.bf16.mxu0 %v2595_v2  ;;  %2457 = vmatprep.subr.bf16.mxu1 %v2595_v2  ;;  %v2581_v8 = vld [vmem:[%s2640_s24 + $0x1f4] ss:$8 sps:$4 sm:$0xff]   ;;  %v2559_v9 = vld [vmem:[%s2640_s24 + $0xf0] ss:$8 sps:$4 sm:$0xff]  }
  0x2e   : > { %763 = vmatpush1.bf16.msra.mxu0 %v2485_v10  ;;  %2466 = vmatpush1.bf16.msra.mxu1 %v2485_v10  ;;  %v2583_v10 = vld [vmem:[%s2640_s24 + $0x1f0] ss:$8 sps:$4 sm:$0xff]  }
  0x2f   : > { %764 = vmatprep.subr.bf16.mxu0 %v2595_v2  ;;  %2458 = vmatprep.subr.bf16.mxu1 %v2595_v2 }
  0x32   : > { %765 = vmatpush1.bf16.msra.mxu0 %v2486_v11  ;;  %2467 = vmatpush1.bf16.msra.mxu1 %v2486_v11  ;;  %v2770_v11 = vld [vmem:[%s4649_s2] ss:$0 sm:$0xff] }
  0x33   : > { %766 = vmatprep.subr.bf16.mxu0 %v2595_v2  ;;  %2459 = vmatprep.subr.bf16.mxu1 %v2595_v2  ;;  %v2577_v2 = vld [vmem:[%s2640_s24 + $0x1d0] ss:$8 sps:$4 sm:$0xff]  }
  0x36   : > { %767 = vmatpush1.bf16.msra.mxu0 %v2487_v12  ;;  %2468 = vmatpush1.bf16.msra.mxu1 %v2487_v12 }
  0x39   : > { %783 = vmatmul.mubr.bf16.vlgmr.msra.gmra.mrb[0].mxu0 %v2488_v13  ;;  %911 = vmatmul.mubr.bf16.vlgmr.msra.gmra.mrb[0].mxu1 %v2512_v15 }
  0x3a   : > { %2415 = vmatprep.mubr.msk.bf16.mxu0 %vm653_vm0, %v2491_v14  ;;  %2431 = vmatprep.mubr.msk.bf16.mxu1 %vm653_vm0, %v2518_v16 }
  0x41   : > { %791 = vmatmul.mubr.bf16.gmra.mrb[4].mxu0 %v2493_v17  ;;  %919 = vmatmul.mubr.bf16.gmra.mrb[4].mxu1 %v2520_v19 }
  0x42   : > { %2416 = vmatprep.mubr.msk.bf16.mxu0 %vm653_vm0, %v2494_v18  ;;  %2432 = vmatprep.mubr.msk.bf16.mxu1 %vm653_vm0, %v2524_v20 }
  0x49   : > { %799 = vmatmul.mubr.bf16.gmra.mrb[8].mxu0 %v2496_v21  ;;  %927 = vmatmul.mubr.bf16.gmra.mrb[8].mxu1 %v2526_v23 }
  0x4a   : > { %2417 = vmatprep.mubr.msk.bf16.mxu0 %vm653_vm0, %v2497_v22  ;;  %2433 = vmatprep.mubr.msk.bf16.mxu1 %vm653_vm0, %v2530_v24 }
  0x51   : > { %807 = vmatmul.mubr.bf16.gmra.mrb[12].mxu0 %v2499_v25  ;;  %935 = vmatmul.mubr.bf16.gmra.mrb[12].mxu1 %v2532_v26 }
  0x52   : > { %2418 = vmatprep.mubr.msk.bf16.mxu0 %vm653_vm0, %v2500_v27  ;;  %2434 = vmatprep.mubr.msk.bf16.mxu1 %vm653_vm0, %v2536_v28 }
  0x59   : > { %815 = vmatmul.mubr.bf16.gmra.mrb[16].mxu0 %v2502_v29  ;;  %943 = vmatmul.mubr.bf16.gmra.mrb[16].mxu1 %v2538_v30 }
  0x5a   : > { %2419 = vmatprep.mubr.msk.bf16.mxu0 %vm653_vm0, %v2503_v31  ;;  %2435 = vmatprep.mubr.msk.bf16.mxu1 %vm653_vm0, %v2542_v32 }
  0x61   : > { %823 = vmatmul.mubr.bf16.gmra.mrb[20].mxu0 %v2505_v33  ;;  %951 = vmatmul.mubr.bf16.gmra.mrb[20].mxu1 %v2544_v34 }
  0x62   : > { %2420 = vmatprep.mubr.msk.bf16.mxu0 %vm653_vm0, %v2506_v35  ;;  %2436 = vmatprep.mubr.msk.bf16.mxu1 %vm653_vm0, %v2548_v36 }
  0x69   : > { %831 = vmatmul.mubr.bf16.gmra.mrb[24].mxu0 %v2508_v37  ;;  %959 = vmatmul.mubr.bf16.gmra.mrb[24].mxu1 %v2550_v38 }
  0x6a   : > { %2421 = vmatprep.mubr.msk.bf16.mxu0 %vm653_vm0, %v2509_v39  ;;  %2437 = vmatprep.mubr.msk.bf16.mxu1 %vm653_vm0, %v2554_v40 }
  0x71   : > { %839 = vmatmul.mubr.bf16.gmra.mrb[28].mxu0 %v2511_v41  ;;  %967 = vmatmul.mubr.bf16.gmra.mrb[28].mxu1 %v2556_v42 }
  0x72   : > { %2422 = vmatprep.mubr.msk.bf16.mxu0 %vm653_vm0, %v2515_v43  ;;  %2438 = vmatprep.mubr.msk.bf16.mxu1 %vm653_vm0, %v2560_v44 }
  0x79   : > { %847 = vmatmul.mubr.bf16.gmra.mrb[32].mxu0 %v2517_v45  ;;  %975 = vmatmul.mubr.bf16.gmra.mrb[32].mxu1 %v2562_v46 }
  0x7a   : > { %2423 = vmatprep.mubr.msk.bf16.mxu0 %vm653_vm0, %v2521_v47  ;;  %2439 = vmatprep.mubr.msk.bf16.mxu1 %vm653_vm0, %v2563_v48 }
  0x81   : > { %855 = vmatmul.mubr.bf16.gmra.mrb[36].mxu0 %v2523_v49  ;;  %983 = vmatmul.mubr.bf16.gmra.mrb[36].mxu1 %v2565_v50 }
  0x82   : > { %2424 = vmatprep.mubr.msk.bf16.mxu0 %vm653_vm0, %v2527_v51  ;;  %2440 = vmatprep.mubr.msk.bf16.mxu1 %vm653_vm0, %v2566_v52 }
  0x89   : > { %863 = vmatmul.mubr.bf16.gmra.mrb[40].mxu0 %v2529_v53  ;;  %991 = vmatmul.mubr.bf16.gmra.mrb[40].mxu1 %v2568_v54 }
  0x8a   : > { %2425 = vmatprep.mubr.msk.bf16.mxu0 %vm653_vm0, %v2533_v55  ;;  %2441 = vmatprep.mubr.msk.bf16.mxu1 %vm653_vm0, %v2569_v56 }
  0x91   : > { %871 = vmatmul.mubr.bf16.gmra.mrb[44].mxu0 %v2535_v57  ;;  %999 = vmatmul.mubr.bf16.gmra.mrb[44].mxu1 %v2571_v58 }
  0x92   : > { %2426 = vmatprep.mubr.msk.bf16.mxu0 %vm653_vm0, %v2539_v59  ;;  %2442 = vmatprep.mubr.msk.bf16.mxu1 %vm653_vm0, %v2572_v60 }
  0x99   : > { %879 = vmatmul.mubr.bf16.gmra.mrb[48].mxu0 %v2541_v61  ;;  %1007 = vmatmul.mubr.bf16.gmra.mrb[48].mxu1 %v2574_v62 }
  0x9a   : > { %2427 = vmatprep.mubr.msk.bf16.mxu0 %vm653_vm0, %v2545_v63  ;;  %2443 = vmatprep.mubr.msk.bf16.mxu1 %vm653_vm0, %v2575_v0 }
  0xa1   : > { %887 = vmatmul.mubr.bf16.gmra.mrb[52].mxu0 %v2547_v1  ;;  %1015 = vmatmul.mubr.bf16.gmra.mrb[52].mxu1 %v2577_v2 }
  0xa2   : > { %2428 = vmatprep.mubr.msk.bf16.mxu0 %vm653_vm0, %v2551_v3  ;;  %2444 = vmatprep.mubr.msk.bf16.mxu1 %vm653_vm0, %v2578_v4 }
  0xa9   : > { %895 = vmatmul.mubr.bf16.gmra.mrb[56].mxu0 %v2553_v5  ;;  %1023 = vmatmul.mubr.bf16.gmra.mrb[56].mxu1 %v2580_v6 }
  0xaa   : > { %2429 = vmatprep.mubr.msk.bf16.mxu0 %vm653_vm0, %v2557_v7  ;;  %2445 = vmatprep.mubr.msk.bf16.mxu1 %vm653_vm0, %v2581_v8 }
  0xb1   : > { %903 = vmatmul.mubr.bf16.gmra.mrb[60].mxu0 %v2559_v9  ;;  %1031 = vmatmul.mubr.bf16.gmra.mrb[60].mxu1 %v2583_v10 }
 0x10c   : > { %v784_v12 = vpop.f32.mrb[0].mxu0  ;;  %v912_v13 = vpop.f32.mrb[0].mxu1 }
 0x10d   : > { %v785_v14 = vadd.f32 %v2770_v11, %v784_v12  ;;  %v786_v15 = vpop.f32.mrb[1].mxu0  ;;  %v2779_v16 = vadd.f32 %v2770_v11, %v912_v13  ;;  %v914_v17 = vpop.f32.mrb[1].mxu1 }
 0x10e   : > { %v787_v18 = vpop.f32.mrb[2].mxu0  ;;  %v915_v19 = vpop.f32.mrb[2].mxu1 }
 0x10f   : > { %1249 = vst [vmem:[%s2775_s26] sm:$0xff] %v785_v14  ;;  %v788_v20 = vadd.f32 %v2770_v11, %v787_v18  ;;  %v789_v21 = vpop.f32.mrb[3].mxu0  ;;  %1281 = vst [vmem:[%s2775_s26 + $0x100] sm:$0xff] %v2779_v16  ;;  %v2786_v22 = vadd.f32 %v2770_v11, %v915_v19  ;;  %v917_v23 = vpop.f32.mrb[3].mxu1  ;;  %v1112_v24 = vmul.f32 %v785_v14, %v785_v14 }
 0x111   : > { %v1040_v25 = vadd.f32 %v788_v20, %v785_v14  ;;  %v1113_v26 = vmul.f32 %v788_v20, %v788_v20  ;;  %1250 = vst [vmem:[%s2775_s26 + $0x8] sm:$0xff] %v788_v20  ;;  %1282 = vst [vmem:[%s2775_s26 + $0x108] sm:$0xff] %v2786_v22 }
 0x113   : > { %v1176_v27 = vadd.f32 %v1113_v26, %v1112_v24 }
 0x114   : > { %v792_v28 = vpop.f32.mrb[4].mxu0  ;;  %v920_v29 = vpop.f32.mrb[4].mxu1 }
 0x115   : > { %v793_v30 = vadd.f32 %v2770_v11, %v792_v28  ;;  %v794_v31 = vpop.f32.mrb[5].mxu0  ;;  %v2793_v32 = vadd.f32 %v2770_v11, %v920_v29  ;;  %v922_v33 = vpop.f32.mrb[5].mxu1 }
 0x116   : > { %v795_v34 = vpop.f32.mrb[6].mxu0  ;;  %v923_v35 = vpop.f32.mrb[6].mxu1 }
 0x117   : > { %v1041_v36 = vadd.f32 %v1040_v25, %v793_v30  ;;  %v1114_v37 = vmul.f32 %v793_v30, %v793_v30  ;;  %1251 = vst [vmem:[%s2775_s26 + $0x10] sm:$0xff] %v793_v30  ;;  %v796_v38 = vadd.f32 %v2770_v11, %v795_v34  ;;  %v797_v39 = vpop.f32.mrb[7].mxu0  ;;  %1283 = vst [vmem:[%s2775_s26 + $0x110] sm:$0xff] %v2793_v32  ;;  %v925_v40 = vpop.f32.mrb[7].mxu1 }
 0x118   : > { %v2800_v41 = vadd.f32 %v2770_v11, %v923_v35 }
 0x119   : > { %v1177_v42 = vadd.f32 %v1176_v27, %v1114_v37  ;;  %v1042_v43 = vadd.f32 %v1041_v36, %v796_v38  ;;  %v1115_v44 = vmul.f32 %v796_v38, %v796_v38  ;;  %1252 = vst [vmem:[%s2775_s26 + $0x18] sm:$0xff] %v796_v38 }
 0x11a   : > { %1284 = vst [vmem:[%s2775_s26 + $0x118] sm:$0xff] %v2800_v41 }
 0x11b   : > { %v1178_v45 = vadd.f32 %v1177_v42, %v1115_v44 }
 0x11c   : > { %v800_v46 = vpop.f32.mrb[8].mxu0  ;;  %v928_v47 = vpop.f32.mrb[8].mxu1 }
 0x11d   : > { %v801_v48 = vadd.f32 %v2770_v11, %v800_v46  ;;  %v802_v49 = vpop.f32.mrb[9].mxu0  ;;  %v2807_v50 = vadd.f32 %v2770_v11, %v928_v47  ;;  %v930_v51 = vpop.f32.mrb[9].mxu1 }
 0x11e   : > { %v803_v52 = vpop.f32.mrb[10].mxu0  ;;  %v931_v53 = vpop.f32.mrb[10].mxu1 }
 0x11f   : > { %v1043_v54 = vadd.f32 %v1042_v43, %v801_v48  ;;  %v1116_v55 = vmul.f32 %v801_v48, %v801_v48  ;;  %1253 = vst [vmem:[%s2775_s26 + $0x20] sm:$0xff] %v801_v48  ;;  %v804_v56 = vadd.f32 %v2770_v11, %v803_v52  ;;  %v805_v57 = vpop.f32.mrb[11].mxu0  ;;  %1285 = vst [vmem:[%s2775_s26 + $0x120] sm:$0xff] %v2807_v50  ;;  %v933_v58 = vpop.f32.mrb[11].mxu1 }
 0x120   : > { %v2814_v59 = vadd.f32 %v2770_v11, %v931_v53 }
 0x121   : > { %v1179_v60 = vadd.f32 %v1178_v45, %v1116_v55  ;;  %v1044_v61 = vadd.f32 %v1043_v54, %v804_v56  ;;  %v1117_v62 = vmul.f32 %v804_v56, %v804_v56  ;;  %1254 = vst [vmem:[%s2775_s26 + $0x28] sm:$0xff] %v804_v56 }
 0x122   : > { %1286 = vst [vmem:[%s2775_s26 + $0x128] sm:$0xff] %v2814_v59 }
 0x123   : > { %v1180_v63 = vadd.f32 %v1179_v60, %v1117_v62 }
 0x124   : > { %v808_v0 = vpop.f32.mrb[12].mxu0  ;;  %v936_v1 = vpop.f32.mrb[12].mxu1 }
 0x125   : > { %v809_v2 = vadd.f32 %v2770_v11, %v808_v0  ;;  %v810_v3 = vpop.f32.mrb[13].mxu0  ;;  %v2821_v4 = vadd.f32 %v2770_v11, %v936_v1  ;;  %v938_v5 = vpop.f32.mrb[13].mxu1 }
 0x126   : > { %v811_v6 = vpop.f32.mrb[14].mxu0  ;;  %v939_v7 = vpop.f32.mrb[14].mxu1 }
 0x127   : > { %v1045_v8 = vadd.f32 %v1044_v61, %v809_v2  ;;  %v1118_v9 = vmul.f32 %v809_v2, %v809_v2  ;;  %1255 = vst [vmem:[%s2775_s26 + $0x30] sm:$0xff] %v809_v2  ;;  %v812_v10 = vadd.f32 %v2770_v11, %v811_v6  ;;  %v813_v12 = vpop.f32.mrb[15].mxu0  ;;  %1287 = vst [vmem:[%s2775_s26 + $0x130] sm:$0xff] %v2821_v4  ;;  %v941_v13 = vpop.f32.mrb[15].mxu1 }
 0x128   : > { %v2828_v14 = vadd.f32 %v2770_v11, %v939_v7 }
 0x129   : > { %v1181_v15 = vadd.f32 %v1180_v63, %v1118_v9  ;;  %v1046_v17 = vadd.f32 %v1045_v8, %v812_v10  ;;  %v1119_v18 = vmul.f32 %v812_v10, %v812_v10  ;;  %1256 = vst [vmem:[%s2775_s26 + $0x38] sm:$0xff] %v812_v10 }
 0x12a   : > { %1288 = vst [vmem:[%s2775_s26 + $0x138] sm:$0xff] %v2828_v14 }
 0x12b   : > { %v1182_v19 = vadd.f32 %v1181_v15, %v1119_v18 }
 0x12c   : > { %v816_v20 = vpop.f32.mrb[16].mxu0  ;;  %v944_v21 = vpop.f32.mrb[16].mxu1 }
 0x12d   : > { %v817_v23 = vadd.f32 %v2770_v11, %v816_v20  ;;  %v818_v24 = vpop.f32.mrb[17].mxu0  ;;  %v2835_v25 = vadd.f32 %v2770_v11, %v944_v21  ;;  %v946_v26 = vpop.f32.mrb[17].mxu1 }
 0x12e   : > { %v819_v27 = vpop.f32.mrb[18].mxu0  ;;  %v947_v28 = vpop.f32.mrb[18].mxu1 }
 0x12f   : > { %v1047_v29 = vadd.f32 %v1046_v17, %v817_v23  ;;  %v1120_v30 = vmul.f32 %v817_v23, %v817_v23  ;;  %1257 = vst [vmem:[%s2775_s26 + $0x40] sm:$0xff] %v817_v23  ;;  %v820_v31 = vadd.f32 %v2770_v11, %v819_v27  ;;  %v821_v33 = vpop.f32.mrb[19].mxu0  ;;  %1289 = vst [vmem:[%s2775_s26 + $0x140] sm:$0xff] %v2835_v25  ;;  %v949_v34 = vpop.f32.mrb[19].mxu1 }
 0x130   : > { %v2842_v35 = vadd.f32 %v2770_v11, %v947_v28 }
 0x131   : > { %v1183_v36 = vadd.f32 %v1182_v19, %v1120_v30  ;;  %v1048_v37 = vadd.f32 %v1047_v29, %v820_v31  ;;  %v1121_v38 = vmul.f32 %v820_v31, %v820_v31  ;;  %1258 = vst [vmem:[%s2775_s26 + $0x48] sm:$0xff] %v820_v31 }
 0x132   : > { %1290 = vst [vmem:[%s2775_s26 + $0x148] sm:$0xff] %v2842_v35 }
 0x133   : > { %v1184_v39 = vadd.f32 %v1183_v36, %v1121_v38 }
 0x134   : > { %v824_v40 = vpop.f32.mrb[20].mxu0  ;;  %v952_v42 = vpop.f32.mrb[20].mxu1 }
 0x135   : > { %v825_v43 = vadd.f32 %v2770_v11, %v824_v40  ;;  %v826_v44 = vpop.f32.mrb[21].mxu0  ;;  %v2849_v45 = vadd.f32 %v2770_v11, %v952_v42  ;;  %v954_v46 = vpop.f32.mrb[21].mxu1 }
 0x136   : > { %v827_v47 = vpop.f32.mrb[22].mxu0  ;;  %v955_v48 = vpop.f32.mrb[22].mxu1 }
 0x137   : > { %v1049_v49 = vadd.f32 %v1048_v37, %v825_v43  ;;  %v1122_v51 = vmul.f32 %v825_v43, %v825_v43  ;;  %1259 = vst [vmem:[%s2775_s26 + $0x50] sm:$0xff] %v825_v43  ;;  %v828_v52 = vadd.f32 %v2770_v11, %v827_v47  ;;  %v829_v53 = vpop.f32.mrb[23].mxu0  ;;  %1291 = vst [vmem:[%s2775_s26 + $0x150] sm:$0xff] %v2849_v45  ;;  %v957_v54 = vpop.f32.mrb[23].mxu1 }
 0x138   : > { %v2856_v55 = vadd.f32 %v2770_v11, %v955_v48 }
 0x139   : > { %v1185_v56 = vadd.f32 %v1184_v39, %v1122_v51  ;;  %v1050_v57 = vadd.f32 %v1049_v49, %v828_v52  ;;  %v1123_v58 = vmul.f32 %v828_v52, %v828_v52  ;;  %1260 = vst [vmem:[%s2775_s26 + $0x58] sm:$0xff] %v828_v52 }
 0x13a   : > { %1292 = vst [vmem:[%s2775_s26 + $0x158] sm:$0xff] %v2856_v55 }
 0x13b   : > { %v1186_v60 = vadd.f32 %v1185_v56, %v1123_v58 }
 0x13c   : > { %v832_v61 = vpop.f32.mrb[24].mxu0  ;;  %v960_v62 = vpop.f32.mrb[24].mxu1 }
 0x13d   : > { %v833_v63 = vadd.f32 %v2770_v11, %v832_v61  ;;  %v834_v0 = vpop.f32.mrb[25].mxu0  ;;  %v2863_v1 = vadd.f32 %v2770_v11, %v960_v62  ;;  %v962_v2 = vpop.f32.mrb[25].mxu1 }
 0x13e   : > { %v835_v3 = vpop.f32.mrb[26].mxu0  ;;  %v963_v5 = vpop.f32.mrb[26].mxu1 }
 0x13f   : > { %v1051_v6 = vadd.f32 %v1050_v57, %v833_v63  ;;  %v1124_v7 = vmul.f32 %v833_v63, %v833_v63  ;;  %1261 = vst [vmem:[%s2775_s26 + $0x60] sm:$0xff] %v833_v63  ;;  %v836_v8 = vadd.f32 %v2770_v11, %v835_v3  ;;  %v837_v9 = vpop.f32.mrb[27].mxu0  ;;  %1293 = vst [vmem:[%s2775_s26 + $0x160] sm:$0xff] %v2863_v1  ;;  %v965_v10 = vpop.f32.mrb[27].mxu1 }
 0x140   : > { %v2870_v12 = vadd.f32 %v2770_v11, %v963_v5 }
 0x141   : > { %v1187_v13 = vadd.f32 %v1186_v60, %v1124_v7  ;;  %v1052_v15 = vadd.f32 %v1051_v6, %v836_v8  ;;  %v1125_v17 = vmul.f32 %v836_v8, %v836_v8  ;;  %1262 = vst [vmem:[%s2775_s26 + $0x68] sm:$0xff] %v836_v8 }
 0x142   : > { %1294 = vst [vmem:[%s2775_s26 + $0x168] sm:$0xff] %v2870_v12 }
 0x143   : > { %v1188_v18 = vadd.f32 %v1187_v13, %v1125_v17 }
 0x144   : > { %v840_v19 = vpop.f32.mrb[28].mxu0  ;;  %v968_v20 = vpop.f32.mrb[28].mxu1 }
 0x145   : > { %v841_v21 = vadd.f32 %v2770_v11, %v840_v19  ;;  %v842_v23 = vpop.f32.mrb[29].mxu0  ;;  %v2877_v24 = vadd.f32 %v2770_v11, %v968_v20  ;;  %v970_v26 = vpop.f32.mrb[29].mxu1 }
 0x146   : > { %v843_v27 = vpop.f32.mrb[30].mxu0  ;;  %v971_v28 = vpop.f32.mrb[30].mxu1 }
 0x147   : > { %v1053_v29 = vadd.f32 %v1052_v15, %v841_v21  ;;  %v1126_v30 = vmul.f32 %v841_v21, %v841_v21  ;;  %1263 = vst [vmem:[%s2775_s26 + $0x70] sm:$0xff] %v841_v21  ;;  %v844_v31 = vadd.f32 %v2770_v11, %v843_v27  ;;  %v845_v33 = vpop.f32.mrb[31].mxu0  ;;  %1295 = vst [vmem:[%s2775_s26 + $0x170] sm:$0xff] %v2877_v24  ;;  %v973_v34 = vpop.f32.mrb[31].mxu1 }
 0x148   : > { %v2884_v36 = vadd.f32 %v2770_v11, %v971_v28 }
 0x149   : > { %v1189_v37 = vadd.f32 %v1188_v18, %v1126_v30  ;;  %v1054_v38 = vadd.f32 %v1053_v29, %v844_v31  ;;  %v1127_v39 = vmul.f32 %v844_v31, %v844_v31  ;;  %1264 = vst [vmem:[%s2775_s26 + $0x78] sm:$0xff] %v844_v31 }
 0x14a   : > { %1296 = vst [vmem:[%s2775_s26 + $0x178] sm:$0xff] %v2884_v36 }
 0x14b   : > { %v1190_v40 = vadd.f32 %v1189_v37, %v1127_v39 }
 0x14c   : > { %v848_v42 = vpop.f32.mrb[32].mxu0  ;;  %v976_v43 = vpop.f32.mrb[32].mxu1 }
 0x14d   : > { %v849_v44 = vadd.f32 %v2770_v11, %v848_v42  ;;  %v850_v46 = vpop.f32.mrb[33].mxu0  ;;  %v2891_v47 = vadd.f32 %v2770_v11, %v976_v43  ;;  %v978_v48 = vpop.f32.mrb[33].mxu1 }
 0x14e   : > { %v851_v49 = vpop.f32.mrb[34].mxu0  ;;  %v979_v51 = vpop.f32.mrb[34].mxu1 }
 0x14f   : > { %v1055_v52 = vadd.f32 %v1054_v38, %v849_v44  ;;  %v1128_v53 = vmul.f32 %v849_v44, %v849_v44  ;;  %1265 = vst [vmem:[%s2775_s26 + $0x80] sm:$0xff] %v849_v44  ;;  %v852_v54 = vadd.f32 %v2770_v11, %v851_v49  ;;  %v853_v56 = vpop.f32.mrb[35].mxu0  ;;  %1297 = vst [vmem:[%s2775_s26 + $0x180] sm:$0xff] %v2891_v47  ;;  %v981_v57 = vpop.f32.mrb[35].mxu1 }
 0x150   : > { %v2898_v58 = vadd.f32 %v2770_v11, %v979_v51 }
 0x151   : > { %v1191_v60 = vadd.f32 %v1190_v40, %v1128_v53  ;;  %v1056_v61 = vadd.f32 %v1055_v52, %v852_v54  ;;  %v1129_v62 = vmul.f32 %v852_v54, %v852_v54  ;;  %1266 = vst [vmem:[%s2775_s26 + $0x88] sm:$0xff] %v852_v54 }
 0x152   : > { %1298 = vst [vmem:[%s2775_s26 + $0x188] sm:$0xff] %v2898_v58 }
 0x153   : > { %v1192_v63 = vadd.f32 %v1191_v60, %v1129_v62 }
 0x154   : > { %v856_v0 = vpop.f32.mrb[36].mxu0  ;;  %v984_v2 = vpop.f32.mrb[36].mxu1 }
 0x155   : > { %v857_v3 = vadd.f32 %v2770_v11, %v856_v0  ;;  %v858_v5 = vpop.f32.mrb[37].mxu0  ;;  %v2905_v6 = vadd.f32 %v2770_v11, %v984_v2  ;;  %v986_v7 = vpop.f32.mrb[37].mxu1 }
 0x156   : > { %v859_v8 = vpop.f32.mrb[38].mxu0  ;;  %v987_v9 = vpop.f32.mrb[38].mxu1 }
 0x157   : > { %v1057_v10 = vadd.f32 %v1056_v61, %v857_v3  ;;  %v1130_v13 = vmul.f32 %v857_v3, %v857_v3  ;;  %1267 = vst [vmem:[%s2775_s26 + $0x90] sm:$0xff] %v857_v3  ;;  %v860_v15 = vadd.f32 %v2770_v11, %v859_v8  ;;  %v861_v17 = vpop.f32.mrb[39].mxu0  ;;  %1299 = vst [vmem:[%s2775_s26 + $0x190] sm:$0xff] %v2905_v6  ;;  %v989_v18 = vpop.f32.mrb[39].mxu1 }
 0x158   : > { %v2912_v19 = vadd.f32 %v2770_v11, %v987_v9 }
 0x159   : > { %v1193_v20 = vadd.f32 %v1192_v63, %v1130_v13  ;;  %v1058_v21 = vadd.f32 %v1057_v10, %v860_v15  ;;  %v1131_v23 = vmul.f32 %v860_v15, %v860_v15  ;;  %1268 = vst [vmem:[%s2775_s26 + $0x98] sm:$0xff] %v860_v15 }
 0x15a   : > { %1300 = vst [vmem:[%s2775_s26 + $0x198] sm:$0xff] %v2912_v19 }
 0x15b   : > { %v1194_v26 = vadd.f32 %v1193_v20, %v1131_v23 }
 0x15c   : > { %v864_v27 = vpop.f32.mrb[40].mxu0  ;;  %v992_v28 = vpop.f32.mrb[40].mxu1 }
 0x15d   : > { %v865_v29 = vadd.f32 %v2770_v11, %v864_v27  ;;  %v866_v30 = vpop.f32.mrb[41].mxu0  ;;  %v2919_v31 = vadd.f32 %v2770_v11, %v992_v28  ;;  %v994_v33 = vpop.f32.mrb[41].mxu1 }
 0x15e   : > { %v867_v34 = vpop.f32.mrb[42].mxu0  ;;  %v995_v37 = vpop.f32.mrb[42].mxu1 }
 0x15f   : > { %v1059_v38 = vadd.f32 %v1058_v21, %v865_v29  ;;  %v1132_v39 = vmul.f32 %v865_v29, %v865_v29  ;;  %1269 = vst [vmem:[%s2775_s26 + $0xa0] sm:$0xff] %v865_v29  ;;  %v868_v40 = vadd.f32 %v2770_v11, %v867_v34  ;;  %v869_v42 = vpop.f32.mrb[43].mxu0  ;;  %1301 = vst [vmem:[%s2775_s26 + $0x1a0] sm:$0xff] %v2919_v31  ;;  %v997_v43 = vpop.f32.mrb[43].mxu1 }
 0x160   : > { %v2926_v44 = vadd.f32 %v2770_v11, %v995_v37 }
 0x161   : > { %v1195_v46 = vadd.f32 %v1194_v26, %v1132_v39  ;;  %v1060_v48 = vadd.f32 %v1059_v38, %v868_v40  ;;  %v1133_v49 = vmul.f32 %v868_v40, %v868_v40  ;;  %1270 = vst [vmem:[%s2775_s26 + $0xa8] sm:$0xff] %v868_v40 }
 0x162   : > { %1302 = vst [vmem:[%s2775_s26 + $0x1a8] sm:$0xff] %v2926_v44 }
 0x163   : > { %v1196_v51 = vadd.f32 %v1195_v46, %v1133_v49 }
 0x164   : > { %v872_v52 = vpop.f32.mrb[44].mxu0  ;;  %v1000_v53 = vpop.f32.mrb[44].mxu1 }
 0x165   : > { %v873_v54 = vadd.f32 %v2770_v11, %v872_v52  ;;  %v874_v56 = vpop.f32.mrb[45].mxu0  ;;  %v2933_v57 = vadd.f32 %v2770_v11, %v1000_v53  ;;  %v1002_v60 = vpop.f32.mrb[45].mxu1 }
 0x166   : > { %v875_v61 = vpop.f32.mrb[46].mxu0  ;;  %v1003_v62 = vpop.f32.mrb[46].mxu1 }
 0x167   : > { %v1061_v63 = vadd.f32 %v1060_v48, %v873_v54  ;;  %v1134_v0 = vmul.f32 %v873_v54, %v873_v54  ;;  %1271 = vst [vmem:[%s2775_s26 + $0xb0] sm:$0xff] %v873_v54  ;;  %v876_v2 = vadd.f32 %v2770_v11, %v875_v61  ;;  %v877_v3 = vpop.f32.mrb[47].mxu0  ;;  %1303 = vst [vmem:[%s2775_s26 + $0x1b0] sm:$0xff] %v2933_v57  ;;  %v1005_v5 = vpop.f32.mrb[47].mxu1 }
 0x168   : > { %v2940_v7 = vadd.f32 %v2770_v11, %v1003_v62 }
 0x169   : > { %v1197_v8 = vadd.f32 %v1196_v51, %v1134_v0  ;;  %v1062_v9 = vadd.f32 %v1061_v63, %v876_v2  ;;  %v1135_v10 = vmul.f32 %v876_v2, %v876_v2  ;;  %1272 = vst [vmem:[%s2775_s26 + $0xb8] sm:$0xff] %v876_v2 }
 0x16a   : > { %1304 = vst [vmem:[%s2775_s26 + $0x1b8] sm:$0xff] %v2940_v7 }
 0x16b   : > { %v1198_v13 = vadd.f32 %v1197_v8, %v1135_v10 }
 0x16c   : > { %v880_v15 = vpop.f32.mrb[48].mxu0  ;;  %v1008_v17 = vpop.f32.mrb[48].mxu1 }
 0x16d   : > { %v881_v18 = vadd.f32 %v2770_v11, %v880_v15  ;;  %v882_v20 = vpop.f32.mrb[49].mxu0  ;;  %v2947_v21 = vadd.f32 %v2770_v11, %v1008_v17  ;;  %v1010_v23 = vpop.f32.mrb[49].mxu1 }
 0x16e   : > { %v883_v26 = vpop.f32.mrb[50].mxu0  ;;  %v1011_v27 = vpop.f32.mrb[50].mxu1 }
 0x16f   : > { %v1063_v28 = vadd.f32 %v1062_v9, %v881_v18  ;;  %v1136_v29 = vmul.f32 %v881_v18, %v881_v18  ;;  %1273 = vst [vmem:[%s2775_s26 + $0xc0] sm:$0xff] %v881_v18  ;;  %v884_v30 = vadd.f32 %v2770_v11, %v883_v26  ;;  %v885_v33 = vpop.f32.mrb[51].mxu0  ;;  %1305 = vst [vmem:[%s2775_s26 + $0x1c0] sm:$0xff] %v2947_v21  ;;  %v1013_v34 = vpop.f32.mrb[51].mxu1 }
 0x170   : > { %v2954_v37 = vadd.f32 %v2770_v11, %v1011_v27 }
 0x171   : > { %v1199_v38 = vadd.f32 %v1198_v13, %v1136_v29  ;;  %v1064_v39 = vadd.f32 %v1063_v28, %v884_v30  ;;  %v1137_v40 = vmul.f32 %v884_v30, %v884_v30  ;;  %1274 = vst [vmem:[%s2775_s26 + $0xc8] sm:$0xff] %v884_v30 }
 0x172   : > { %1306 = vst [vmem:[%s2775_s26 + $0x1c8] sm:$0xff] %v2954_v37 }
 0x173   : > { %v1200_v42 = vadd.f32 %v1199_v38, %v1137_v40 }
 0x174   : > { %v888_v43 = vpop.f32.mrb[52].mxu0  ;;  %v1016_v46 = vpop.f32.mrb[52].mxu1 }
 0x175   : > { %v889_v48 = vadd.f32 %v2770_v11, %v888_v43  ;;  %v890_v49 = vpop.f32.mrb[53].mxu0  ;;  %v2961_v51 = vadd.f32 %v2770_v11, %v1016_v46  ;;  %v1018_v52 = vpop.f32.mrb[53].mxu1 }
 0x176   : > { %v891_v53 = vpop.f32.mrb[54].mxu0  ;;  %v1019_v54 = vpop.f32.mrb[54].mxu1 }
 0x177   : > { %v1065_v56 = vadd.f32 %v1064_v39, %v889_v48  ;;  %v1138_v60 = vmul.f32 %v889_v48, %v889_v48  ;;  %1275 = vst [vmem:[%s2775_s26 + $0xd0] sm:$0xff] %v889_v48  ;;  %v892_v61 = vadd.f32 %v2770_v11, %v891_v53  ;;  %v893_v62 = vpop.f32.mrb[55].mxu0  ;;  %1307 = vst [vmem:[%s2775_s26 + $0x1d0] sm:$0xff] %v2961_v51  ;;  %v1021_v63 = vpop.f32.mrb[55].mxu1 }
 0x178   : > { %v2968_v0 = vadd.f32 %v2770_v11, %v1019_v54 }
 0x179   : > { %v1201_v2 = vadd.f32 %v1200_v42, %v1138_v60  ;;  %v1066_v3 = vadd.f32 %v1065_v56, %v892_v61  ;;  %v1139_v5 = vmul.f32 %v892_v61, %v892_v61  ;;  %1276 = vst [vmem:[%s2775_s26 + $0xd8] sm:$0xff] %v892_v61 }
 0x17a   : > { %1308 = vst [vmem:[%s2775_s26 + $0x1d8] sm:$0xff] %v2968_v0 }
 0x17b   : > { %v1202_v8 = vadd.f32 %v1201_v2, %v1139_v5 }
 0x17c   : > { %v896_v9 = vpop.f32.mrb[56].mxu0  ;;  %v1024_v10 = vpop.f32.mrb[56].mxu1 }
 0x17d   : > { %v897_v13 = vadd.f32 %v2770_v11, %v896_v9  ;;  %v898_v15 = vpop.f32.mrb[57].mxu0  ;;  %v2975_v17 = vadd.f32 %v2770_v11, %v1024_v10  ;;  %v1026_v18 = vpop.f32.mrb[57].mxu1  ;;  %v1144_v9 = vmul.f32 %v2779_v16, %v2779_v16 }
 0x17e   : > { %v899_v20 = vpop.f32.mrb[58].mxu0  ;;  %v1027_v23 = vpop.f32.mrb[58].mxu1  ;;  %v1145_v15 = vmul.f32 %v2786_v22, %v2786_v22 }
 0x17f   : > { %v1067_v26 = vadd.f32 %v1066_v3, %v897_v13  ;;  %v1140_v27 = vmul.f32 %v897_v13, %v897_v13  ;;  %1277 = vst [vmem:[%s2775_s26 + $0xe0] sm:$0xff] %v897_v13  ;;  %v900_v28 = vadd.f32 %v2770_v11, %v899_v20  ;;  %v901_v29 = vpop.f32.mrb[59].mxu0  ;;  %1309 = vst [vmem:[%s2775_s26 + $0x1e0] sm:$0xff] %v2975_v17  ;;  %v1029_v30 = vpop.f32.mrb[59].mxu1 }
 0x180   : > { %v2982_v33 = vadd.f32 %v2770_v11, %v1027_v23 }
 0x181   : > { %v1203_v34 = vadd.f32 %v1202_v8, %v1140_v27  ;;  %v1068_v38 = vadd.f32 %v1067_v26, %v900_v28  ;;  %v1141_v39 = vmul.f32 %v900_v28, %v900_v28  ;;  %1278 = vst [vmem:[%s2775_s26 + $0xe8] sm:$0xff] %v900_v28  ;;  %v1147_v27 = vmul.f32 %v2800_v41, %v2800_v41 }
 0x182   : > { %1310 = vst [vmem:[%s2775_s26 + $0x1e8] sm:$0xff] %v2982_v33 }
 0x183   : > { %v1204_v40 = vadd.f32 %v1203_v34, %v1141_v39 }
 0x184   : > { %v904_v42 = vpop.f32.mrb[60].mxu0  ;;  %v1032_v43 = vpop.f32.mrb[60].mxu1 }
 0x185   : > { %v905_v46 = vadd.f32 %v2770_v11, %v904_v42  ;;  %v906_v48 = vpop.f32.mrb[61].mxu0  ;;  %v2989_v49 = vadd.f32 %v2770_v11, %v1032_v43  ;;  %v1034_v52 = vpop.f32.mrb[61].mxu1 }
 0x186   : > { %v907_v53 = vpop.f32.mrb[62].mxu0  ;;  %v1035_v54 = vpop.f32.mrb[62].mxu1 }
 0x187   : > { %v1069_v56 = vadd.f32 %v1068_v38, %v905_v46  ;;  %v1142_v60 = vmul.f32 %v905_v46, %v905_v46  ;;  %1279 = vst [vmem:[%s2775_s26 + $0xf0] sm:$0xff] %v905_v46  ;;  %v908_v61 = vadd.f32 %v2770_v11, %v907_v53  ;;  %v909_v62 = vpop.f32.mrb[63].mxu0  ;;  %1311 = vst [vmem:[%s2775_s26 + $0x1f0] sm:$0xff] %v2989_v49  ;;  %v1037_v63 = vpop.f32.mrb[63].mxu1 }
 0x188   : > { %v2996_v2 = vadd.f32 %v2770_v11, %v1035_v54  ;;  %v1146_v11 = vmul.f32 %v2793_v32, %v2793_v32 }
 0x189   : > { %v1205_v3 = vadd.f32 %v1204_v40, %v1142_v60  ;;  %v1070_v5 = vadd.f32 %v1069_v56, %v908_v61  ;;  %v1143_v8 = vmul.f32 %v908_v61, %v908_v61  ;;  %1280 = vst [vmem:[%s2775_s26 + $0xf8] sm:$0xff] %v908_v61 }
 0x18a   : > { %1312 = vst [vmem:[%s2775_s26 + $0x1f8] sm:$0xff] %v2996_v2 }
 0x18b   : > { %v1071_v10 = vadd.f32 %v1070_v5, %v2779_v16  ;;  %v1206_v13 = vadd.f32 %v1205_v3, %v1143_v8  ;;  %v1148_v16 = vmul.f32 %v2807_v50, %v2807_v50 }
 0x18d   : > { %v1072_v18 = vadd.f32 %v1071_v10, %v2786_v22  ;;  %v1207_v20 = vadd.f32 %v1206_v13, %v1144_v9  ;;  %v1149_v22 = vmul.f32 %v2814_v59, %v2814_v59 }
 0x18f   : > { %v1073_v23 = vadd.f32 %v1072_v18, %v2793_v32  ;;  %v1208_v26 = vadd.f32 %v1207_v20, %v1145_v15  ;;  %v1150_v32 = vmul.f32 %v2821_v4, %v2821_v4  ;;  %v1160_v18 = vmul.f32 %v2891_v47, %v2891_v47 }
 0x191   : > { %v1074_v28 = vadd.f32 %v1073_v23, %v2800_v41  ;;  %v1209_v29 = vadd.f32 %v1208_v26, %v1146_v11  ;;  %v1151_v41 = vmul.f32 %v2828_v14, %v2828_v14  ;;  %v1161_v23 = vmul.f32 %v2898_v58, %v2898_v58 }
 0x193   : > { %v1075_v30 = vadd.f32 %v1074_v28, %v2807_v50  ;;  %v1210_v34 = vadd.f32 %v1209_v29, %v1147_v27  ;;  %v1152_v50 = vmul.f32 %v2835_v25, %v2835_v25  ;;  %v1162_v27 = vmul.f32 %v2905_v6, %v2905_v6 }
 0x194   : > { %v1163_v29 = vmul.f32 %v2912_v19, %v2912_v19 }
 0x195   : > { %v1076_v38 = vadd.f32 %v1075_v30, %v2814_v59  ;;  %v1211_v39 = vadd.f32 %v1210_v34, %v1148_v16  ;;  %v1153_v59 = vmul.f32 %v2842_v35, %v2842_v35  ;;  %v1164_v30 = vmul.f32 %v2919_v31, %v2919_v31 }
 0x197   : > { %v1077_v40 = vadd.f32 %v1076_v38, %v2821_v4  ;;  %v1212_v42 = vadd.f32 %v1211_v39, %v1149_v22  ;;  %v1154_v4 = vmul.f32 %v2849_v45, %v2849_v45  ;;  %v1165_v22 = vmul.f32 %v2926_v44, %v2926_v44 }
 0x198   : > { %v1166_v39 = vmul.f32 %v2933_v57, %v2933_v57 }
 0x199   : > { %v1078_v43 = vadd.f32 %v1077_v40, %v2828_v14  ;;  %v1213_v46 = vadd.f32 %v1212_v42, %v1150_v32  ;;  %v1155_v14 = vmul.f32 %v2856_v55, %v2856_v55  ;;  %v1167_v40 = vmul.f32 %v2940_v7, %v2940_v7 }
 0x19b   : > { %v1214_v48 = vadd.f32 %v1213_v46, %v1151_v41  ;;  %v1079_v52 = vadd.f32 %v1078_v43, %v2835_v25  ;;  %v1156_v25 = vmul.f32 %v2863_v1, %v2863_v1  ;;  %v1168_v41 = vmul.f32 %v2947_v21, %v2947_v21 }
 0x19c   : > { %v1169_v46 = vmul.f32 %v2954_v37, %v2954_v37 }
 0x19d   : > { %v1080_v53 = vadd.f32 %v1079_v52, %v2842_v35  ;;  %v1215_v54 = vadd.f32 %v1214_v48, %v1152_v50  ;;  %v1157_v35 = vmul.f32 %v2870_v12, %v2870_v12  ;;  %v1170_v48 = vmul.f32 %v2961_v51, %v2961_v51 }
 0x19f   : > { %v1081_v56 = vadd.f32 %v1080_v53, %v2849_v45  ;;  %v1216_v60 = vadd.f32 %v1215_v54, %v1153_v59  ;;  %v1158_v45 = vmul.f32 %v2877_v24, %v2877_v24  ;;  %v1171_v59 = vmul.f32 %v2968_v0, %v2968_v0 }
 0x1a0   : > { %v1172_v54 = vmul.f32 %v2975_v17, %v2975_v17 }
 0x1a1   : > { %v1082_v61 = vadd.f32 %v1081_v56, %v2856_v55  ;;  %v1217_v62 = vadd.f32 %v1216_v60, %v1154_v4  ;;  %v1159_v55 = vmul.f32 %v2884_v36, %v2884_v36  ;;  %v1173_v56 = vmul.f32 %v2982_v33, %v2982_v33 }
 0x1a3   : > { %v1083_v63 = vadd.f32 %v1082_v61, %v2863_v1  ;;  %v1218_v3 = vadd.f32 %v1217_v62, %v1155_v14  ;;  %v1175_v62 = vmul.f32 %v2996_v2, %v2996_v2 }
 0x1a5   : > { %v1084_v5 = vadd.f32 %v1083_v63, %v2870_v12  ;;  %v1219_v8 = vadd.f32 %v1218_v3, %v1156_v25 }
 0x1a7   : > { %v1085_v9 = vadd.f32 %v1084_v5, %v2877_v24  ;;  %v1220_v10 = vadd.f32 %v1219_v8, %v1157_v35 }
 0x1a9   : > { %v1086_v13 = vadd.f32 %v1085_v9, %v2884_v36  ;;  %v1221_v15 = vadd.f32 %v1220_v10, %v1158_v45  ;;  %v1039_v10 = vld [vmem:[#allocation2] sm:$0x1] }
 0x1ab   : > { %v1087_v1 = vadd.f32 %v1086_v13, %v2891_v47  ;;  %v1222_v20 = vadd.f32 %v1221_v15, %v1159_v55 }
 0x1ad   : > { %v1223_v12 = vadd.f32 %v1222_v20, %v1160_v18  ;;  %v1088_v11 = vadd.f32 %v1087_v1, %v2898_v58 }
 0x1af   : > { %v1224_v24 = vadd.f32 %v1223_v12, %v1161_v23  ;;  %v1089_v26 = vadd.f32 %v1088_v11, %v2905_v6 }
 0x1b1   : > { %v1225_v36 = vadd.f32 %v1224_v24, %v1162_v27  ;;  %v1090_v28 = vadd.f32 %v1089_v26, %v2912_v19  ;;  %v1395_v27 = vlaneseq (!%p2447_p5) }
 0x1b3   : > { %v1226_v47 = vadd.f32 %v1225_v36, %v1163_v29  ;;  %v1091_v16 = vadd.f32 %v1090_v28, %v2919_v31  ;;  %v1396_v36 = vshrl.u32 (!%p2447_p5), %v1395_v27, 7  ;;  %v1323_v28 = vld [vmem:[%s4650_s3] sm:$0x1] (!%p2447_p5) }
 0x1b5   : > { %v1227_v34 = vadd.f32 %v1226_v47, %v1164_v30  ;;  %v1092_v58 = vadd.f32 %v1091_v16, %v2926_v44  ;;  %v1397_v29 = vsub.s32 (!%p2447_p5), 0, %v1396_v36  ;;  %v1327_v30 = vld [vmem:[%s4651_s4] sm:$0x1] (!%p2447_p5) }
 0x1b7   : > { %v1228_v38 = vadd.f32 %v1227_v34, %v1165_v22  ;;  %v1093_v6 = vadd.f32 %v1092_v58, %v2933_v57  ;;  %v1330_v34 = vld [vmem:[%s4652_s5] sm:$0xff] (!%p2447_p5)  ;;  %v1331_v58 = vld [vmem:[%s4652_s5 + $0x8] sm:$0xff] (!%p2447_p5)  ;;  %v1332_v22 = vld [vmem:[%s4652_s5 + $0x10] sm:$0xff] (!%p2447_p5) }
 0x1b9   : > { %v1229_v32 = vadd.f32 %v1228_v38, %v1166_v39  ;;  %v1094_v19 = vadd.f32 %v1093_v6, %v2940_v7  ;;  %v1333_v38 = vld [vmem:[%s4652_s5 + $0x18] sm:$0xff] (!%p2447_p5)  ;;  %v1334_v6 = vld [vmem:[%s4652_s5 + $0x20] sm:$0xff] (!%p2447_p5) }
 0x1bb   : > { %v1230_v42 = vadd.f32 %v1229_v32, %v1167_v40  ;;  %v1095_v31 = vadd.f32 %v1094_v19, %v2947_v21  ;;  %v1335_v19 = vld [vmem:[%s4652_s5 + $0x28] sm:$0xff] (!%p2447_p5)  ;;  %v1336_v40 = vld [vmem:[%s4652_s5 + $0x30] sm:$0xff] (!%p2447_p5) }
 0x1bd   : > { %v1231_v43 = vadd.f32 %v1230_v42, %v1168_v41  ;;  %v1096_v44 = vadd.f32 %v1095_v31, %v2954_v37  ;;  %v1337_v42 = vld [vmem:[%s4652_s5 + $0x38] sm:$0xff] (!%p2447_p5)  ;;  %v1338_v31 = vld [vmem:[%s4652_s5 + $0x40] sm:$0xff] (!%p2447_p5)  ;;  %v1339_v41 = vld [vmem:[%s4652_s5 + $0x48] sm:$0xff] (!%p2447_p5) }
 0x1bf   : > { %v1232_v50 = vadd.f32 %v1231_v43, %v1169_v46  ;;  %v1097_v57 = vadd.f32 %v1096_v44, %v2961_v51  ;;  %v1174_v51 = vmul.f32 %v2989_v49, %v2989_v49  ;;  %v1340_v43 = vld [vmem:[%s4652_s5 + $0x50] sm:$0xff] (!%p2447_p5) }
 0x1c1   : > { %v1233_v52 = vadd.f32 %v1232_v50, %v1170_v48  ;;  %v1098_v7 = vadd.f32 %v1097_v57, %v2968_v0  ;;  %v1341_v48 = vld [vmem:[%s4652_s5 + $0x58] sm:$0xff] (!%p2447_p5) }
 0x1c3   : > { %v1234_v53 = vadd.f32 %v1233_v52, %v1171_v59  ;;  %v1099_v21 = vadd.f32 %v1098_v7, %v2975_v17  ;;  %v1342_v52 = vld [vmem:[%s4652_s5 + $0x60] sm:$0xff] (!%p2447_p5)  ;;  %v1343_v7 = vld [vmem:[%s4652_s5 + $0x68] sm:$0xff] (!%p2447_p5) }
 0x1c5   : > { %v1235_v4 = vadd.f32 %v1234_v53, %v1172_v54  ;;  %v1100_v37 = vadd.f32 %v1099_v21, %v2982_v33 }
 0x1c7   : > { %v1236_v60 = vadd.f32 %v1235_v4, %v1173_v56  ;;  %v1101_v14 = vadd.f32 %v1100_v37, %v2989_v49  ;;  %v1111_v49 = vld [vmem:[#allocation3] sm:$0x1] }
 0x1c9   : > { %v1237_v61 = vadd.f32 %v1236_v60, %v1174_v51  ;;  %v1102_v0 = vadd.f32 %v1101_v14, %v2996_v2 }
 0x1cb   : > { %v1103_v25 = vrot.slane %v1102_v0, 4  ;;  %v1238_v17 = vadd.f32 %v1237_v61, %v1175_v62 }
 0x1cd   : > { %v1104_v63 = vadd.f32 %v1103_v25, %v1102_v0  ;;  %v1239_v3 = vrot.slane %v1238_v17, 4 }
 0x1cf   : > { %v1105_v35 = vrot.slane %v1104_v63, 2  ;;  %v1240_v5 = vadd.f32 %v1239_v3, %v1238_v17 }
 0x1d1   : > { %v1106_v8 = vadd.f32 %v1105_v35, %v1104_v63  ;;  %v1241_v33 = vrot.slane %v1240_v5, 2 }
 0x1d3   : > { %v1107_v45 = vrot.slane %v1106_v8, 1  ;;  %v1242_v9 = vadd.f32 %v1241_v33, %v1240_v5 }
 0x1d5   : > { %v1108_v55 = vadd.f32 %v1107_v45, %v1106_v8  ;;  %v1243_v13 = vrot.slane %v1242_v9, 1  ;;  %1316 = sbr.rel (%p2447_p5) target bundleno = 654 (0x28e), region = 48 }
 0x1d7   : > { %v1109_v15 = vadd.f32 %v1108_v55, %v1039_v10  ;;  %v1244_v1 = vadd.f32 %v1243_v13, %v1242_v9  ;;  %v1344_v55 = vld [vmem:[%s4652_s5 + $0x70] sm:$0xff] (!%p2447_p5)  ;;  %v1345_v13 = vld [vmem:[%s4652_s5 + $0x78] sm:$0xff] (!%p2447_p5) }
 0x1d9   : > { %1110 = vst [vmem:[#allocation2] sm:$0x1] %v1109_v15  ;;  %v1245_v18 = vadd.f32 %v1244_v1, %v1111_v49 }
 0x1db   : > { %1246 = vst [vmem:[#allocation3] sm:$0x1] %v1245_v18 }
 0x1e0   : > { %v1317_v2 = vld [vmem:[#allocation2] sm:$0x1] }
 0x1e1   : > { %v1318_v12 = vmul.f32 0.0006510417, %v1317_v2 }
 0x1e2   : > { %v1319_v20 = vld [vmem:[#allocation3] sm:$0x1] }
 0x1e3   : > { %v1320_v11 = vmul.f32 0.0006510417, %v1319_v20  ;;  %v1321_v23 = vmul.f32 %v1318_v12, %v1318_v12 }
 0x1e5   : > { %v1322_v24 = vsub.f32 %v1320_v11, %v1321_v23  ;;  %v1346_v23 = vld [vmem:[%s4652_s5 + $0x80] sm:$0xff] }
 0x1e7   : > { %v1324_v26 = vadd.f32 1e-05, %v1322_v24 }
 0x1e9   : > { %2584 = vrsqrt.f32 %v1324_v26 }
 0x1f3   : > { %v2585_v47 = vpop.eup %2584 }
 0x1f4   : > { %v1326_v16 = vmul.f32 %v2585_v47, %v1323_v28  ;;  %v1347_v28 = vld [vmem:[%s4652_s5 + $0x88] sm:$0xff]  ;;  %v1349_v47 = vld [vmem:[%s4652_s5 + $0x98] sm:$0xff] }
 0x1f6   : > { %v1328_v39 = vmul.f32 %v1326_v16, %v1318_v12  ;;  %v3119_v32 = vrot.slane %v1326_v16, %v1397_v29 }
 0x1f8   : > { %v1329_v44 = vsub.f32 %v1327_v30, %v1328_v39  ;;  %v1400_v46 = vmul.f32 %v3119_v32, %v1330_v34  ;;  %v1401_v50 = vmul.f32 %v3119_v32, %v1331_v58  ;;  %v1402_v57 = vmul.f32 %v3119_v32, %v1332_v22  ;;  %v1350_v22 = vld [vmem:[%s4652_s5 + $0xa0] sm:$0xff] }
 0x1f9   : > { %v1403_v59 = vmul.f32 %v3119_v32, %v1333_v38  ;;  %v1404_v53 = vmul.f32 %v3119_v32, %v1334_v6  ;;  %v1405_v21 = vmul.f32 %v3119_v32, %v1335_v19  ;;  %v1406_v54 = vmul.f32 %v3119_v32, %v1336_v40  ;;  %v1351_v38 = vld [vmem:[%s4652_s5 + $0xa8] sm:$0xff] }
 0x1fa   : > { %v3155_v4 = vrot.slane %v1329_v44, %v1397_v29  ;;  %v1407_v37 = vmul.f32 %v3119_v32, %v1337_v42  ;;  %v1408_v56 = vmul.f32 %v3119_v32, %v1338_v31  ;;  %v1409_v51 = vmul.f32 %v3119_v32, %v1339_v41  ;;  %v1348_v29 = vld [vmem:[%s4652_s5 + $0x90] sm:$0xff] }
 0x1fb   : > { %v1410_v60 = vmul.f32 %v3119_v32, %v1340_v43  ;;  %v1411_v14 = vmul.f32 %v3119_v32, %v1341_v48  ;;  %v1412_v61 = vmul.f32 %v3119_v32, %v1342_v52  ;;  %v1413_v0 = vmul.f32 %v3119_v32, %v1343_v7  ;;  %v1352_v44 = vld [vmem:[%s4652_s5 + $0xb0] sm:$0xff] }
 0x1fc   : > { %v1470_v62 = vadd.f32 %v3155_v4, %v1400_v46  ;;  %v1471_v25 = vadd.f32 %v3155_v4, %v1401_v50  ;;  %v1472_v17 = vadd.f32 %v3155_v4, %v1402_v57  ;;  %v1473_v63 = vadd.f32 %v3155_v4, %v1403_v59  ;;  %v1353_v46 = vld [vmem:[%s4652_s5 + $0xb8] sm:$0xff] }
 0x1fd   : > { %v1474_v3 = vadd.f32 %v3155_v4, %v1404_v53  ;;  %v1475_v35 = vadd.f32 %v3155_v4, %v1405_v21  ;;  %v1476_v5 = vadd.f32 %v3155_v4, %v1406_v54  ;;  %v1477_v8 = vadd.f32 %v3155_v4, %v1407_v37  ;;  %v1354_v54 = vld [vmem:[%s4652_s5 + $0xc0] sm:$0xff] }
 0x1fe   : > { %v1534_v33 = vmax.f32 %v1470_v62, 0.0  ;;  %v1535_v45 = vmax.f32 %v1471_v25, 0.0  ;;  %v1536_v9 = vmax.f32 %v1472_v17, 0.0  ;;  %v1537_v10 = vmax.f32 %v1473_v63, 0.0 }
 0x1ff   : > { %v1538_v49 = vmax.f32 %v1474_v3, 0.0  ;;  %v1539_v15 = vmax.f32 %v1475_v35, 0.0  ;;  %v1540_v1 = vmax.f32 %v1476_v5, 0.0  ;;  %v1541_v18 = vmax.f32 %v1477_v8, 0.0  ;;  %v1358_v3 = vld [vmem:[%s4652_s5 + $0xe0] sm:$0xff]  ;;  %v1359_v35 = vld [vmem:[%s4652_s5 + $0xe8] sm:$0xff] }
 0x200   : > { %1598 = vst [vmem:[%s4652_s5] sm:$0xff] %v1534_v33  ;;  %1599 = vst [vmem:[%s4652_s5 + $0x8] sm:$0xff] %v1535_v45  ;;  %v1478_v2 = vadd.f32 %v3155_v4, %v1408_v56  ;;  %v1479_v20 = vadd.f32 %v3155_v4, %v1409_v51  ;;  %v1480_v12 = vadd.f32 %v3155_v4, %v1410_v60 }
 0x201   : > { %1600 = vst [vmem:[%s4652_s5 + $0x10] sm:$0xff] %v1536_v9  ;;  %1601 = vst [vmem:[%s4652_s5 + $0x18] sm:$0xff] %v1537_v10  ;;  %v1481_v11 = vadd.f32 %v3155_v4, %v1411_v14  ;;  %v1482_v24 = vadd.f32 %v3155_v4, %v1412_v61  ;;  %v1483_v26 = vadd.f32 %v3155_v4, %v1413_v0  ;;  %v1355_v14 = vld [vmem:[%s4652_s5 + $0xc8] sm:$0xff]  ;;  %v1356_v61 = vld [vmem:[%s4652_s5 + $0xd0] sm:$0xff] }
 0x202   : > { %1602 = vst [vmem:[%s4652_s5 + $0x20] sm:$0xff] %v1538_v49  ;;  %1603 = vst [vmem:[%s4652_s5 + $0x28] sm:$0xff] %v1539_v15  ;;  %v1414_v27 = vmul.f32 %v3119_v32, %v1344_v55  ;;  %v1415_v36 = vmul.f32 %v3119_v32, %v1345_v13  ;;  %v1542_v16 = vmax.f32 %v1478_v2, 0.0  ;;  %v1543_v30 = vmax.f32 %v1479_v20, 0.0  ;;  %v1357_v0 = vld [vmem:[%s4652_s5 + $0xd8] sm:$0xff]  ;;  %v1360_v49 = vld [vmem:[%s4652_s5 + $0xf0] sm:$0xff] }
 0x203   : > { %1604 = vst [vmem:[%s4652_s5 + $0x30] sm:$0xff] %v1540_v1  ;;  %1605 = vst [vmem:[%s4652_s5 + $0x38] sm:$0xff] %v1541_v18  ;;  %v1544_v34 = vmax.f32 %v1480_v12, 0.0  ;;  %v1545_v58 = vmax.f32 %v1481_v11, 0.0  ;;  %v1546_v6 = vmax.f32 %v1482_v24, 0.0  ;;  %v1547_v39 = vmax.f32 %v1483_v26, 0.0 }
 0x204   : > { %v1484_v19 = vadd.f32 %v3155_v4, %v1414_v27  ;;  %v1485_v40 = vadd.f32 %v3155_v4, %v1415_v36  ;;  %1606 = vst [vmem:[%s4652_s5 + $0x40] sm:$0xff] %v1542_v16  ;;  %1607 = vst [vmem:[%s4652_s5 + $0x48] sm:$0xff] %v1543_v30  ;;  %v1416_v42 = vmul.f32 %v3119_v32, %v1346_v23  ;;  %v1361_v15 = vld [vmem:[%s4652_s5 + $0xf8] sm:$0xff]  ;;  %v1362_v26 = vld [vmem:[%s4652_s5 + $0x100] sm:$0xff] }
 0x205   : > { %1608 = vst [vmem:[%s4652_s5 + $0x50] sm:$0xff] %v1544_v34  ;;  %1609 = vst [vmem:[%s4652_s5 + $0x58] sm:$0xff] %v1545_v58  ;;  %v1417_v31 = vmul.f32 %v3119_v32, %v1347_v28  ;;  %v1418_v41 = vmul.f32 %v3119_v32, %v1348_v29  ;;  %v1419_v43 = vmul.f32 %v3119_v32, %v1349_v47  ;;  %v1363_v47 = vld [vmem:[%s4652_s5 + $0x108] sm:$0xff]  ;;  %v1364_v16 = vld [vmem:[%s4652_s5 + $0x110] sm:$0xff] }
 0x206   : > { %1610 = vst [vmem:[%s4652_s5 + $0x60] sm:$0xff] %v1546_v6  ;;  %1611 = vst [vmem:[%s4652_s5 + $0x68] sm:$0xff] %v1547_v39  ;;  %v1548_v50 = vmax.f32 %v1484_v19, 0.0  ;;  %v1549_v57 = vmax.f32 %v1485_v40, 0.0  ;;  %v1420_v48 = vmul.f32 %v3119_v32, %v1350_v22  ;;  %v1421_v52 = vmul.f32 %v3119_v32, %v1351_v38  ;;  %v1365_v30 = vld [vmem:[%s4652_s5 + $0x118] sm:$0xff]  ;;  %v1366_v6 = vld [vmem:[%s4652_s5 + $0x120] sm:$0xff] }
 0x207   : > { %v1486_v7 = vadd.f32 %v3155_v4, %v1416_v42  ;;  %v1487_v59 = vadd.f32 %v3155_v4, %v1417_v31  ;;  %v1488_v53 = vadd.f32 %v3155_v4, %v1418_v41  ;;  %v1489_v21 = vadd.f32 %v3155_v4, %v1419_v43  ;;  %v1367_v39 = vld [vmem:[%s4652_s5 + $0x128] sm:$0xff] }
 0x208   : > { %1612 = vst [vmem:[%s4652_s5 + $0x70] sm:$0xff] %v1548_v50  ;;  %1613 = vst [vmem:[%s4652_s5 + $0x78] sm:$0xff] %v1549_v57  ;;  %v1490_v37 = vadd.f32 %v3155_v4, %v1420_v48  ;;  %v1491_v56 = vadd.f32 %v3155_v4, %v1421_v52  ;;  %v1422_v51 = vmul.f32 %v3119_v32, %v1352_v44  ;;  %v1368_v50 = vld [vmem:[%s4652_s5 + $0x130] sm:$0xff]  ;;  %v1369_v57 = vld [vmem:[%s4652_s5 + $0x138] sm:$0xff] }
 0x209   : > { %v1423_v60 = vmul.f32 %v3119_v32, %v1353_v46  ;;  %v1550_v62 = vmax.f32 %v1486_v7, 0.0  ;;  %v1551_v25 = vmax.f32 %v1487_v59, 0.0  ;;  %v1552_v17 = vmax.f32 %v1488_v53, 0.0 }
 0x20a   : > { %v1553_v63 = vmax.f32 %v1489_v21, 0.0  ;;  %v1554_v5 = vmax.f32 %v1490_v37, 0.0  ;;  %v1555_v8 = vmax.f32 %v1491_v56, 0.0  ;;  %v1492_v33 = vadd.f32 %v3155_v4, %v1422_v51  ;;  %v1370_v56 = vld [vmem:[%s4652_s5 + $0x140] sm:$0xff] }
 0x20b   : > { %v1493_v45 = vadd.f32 %v3155_v4, %v1423_v60  ;;  %1614 = vst [vmem:[%s4652_s5 + $0x80] sm:$0xff] %v1550_v62  ;;  %1615 = vst [vmem:[%s4652_s5 + $0x88] sm:$0xff] %v1551_v25  ;;  %v1424_v9 = vmul.f32 %v3119_v32, %v1354_v54  ;;  %v1425_v10 = vmul.f32 %v3119_v32, %v1355_v14  ;;  %v1372_v62 = vld [vmem:[%s4652_s5 + $0x150] sm:$0xff]  ;;  %v1373_v25 = vld [vmem:[%s4652_s5 + $0x158] sm:$0xff] }
 0x20c   : > { %1616 = vst [vmem:[%s4652_s5 + $0x90] sm:$0xff] %v1552_v17  ;;  %1617 = vst [vmem:[%s4652_s5 + $0x98] sm:$0xff] %v1553_v63  ;;  %v1426_v55 = vmul.f32 %v3119_v32, %v1356_v61  ;;  %v1427_v13 = vmul.f32 %v3119_v32, %v1357_v0  ;;  %v1556_v1 = vmax.f32 %v1492_v33, 0.0  ;;  %v1428_v2 = vmul.f32 %v3119_v32, %v1358_v3  ;;  %v1371_v0 = vld [vmem:[%s4652_s5 + $0x148] sm:$0xff] }
 0x20d   : > { %1618 = vst [vmem:[%s4652_s5 + $0xa0] sm:$0xff] %v1554_v5  ;;  %1619 = vst [vmem:[%s4652_s5 + $0xa8] sm:$0xff] %v1555_v8  ;;  %v1557_v18 = vmax.f32 %v1493_v45, 0.0  ;;  %v1429_v20 = vmul.f32 %v3119_v32, %v1359_v35  ;;  %v1494_v12 = vadd.f32 %v3155_v4, %v1424_v9  ;;  %v1495_v11 = vadd.f32 %v3155_v4, %v1425_v10  ;;  %v1374_v5 = vld [vmem:[%s4652_s5 + $0x160] sm:$0xff]  ;;  %v1375_v8 = vld [vmem:[%s4652_s5 + $0x168] sm:$0xff] }
 0x20e   : > { %v1496_v23 = vadd.f32 %v3155_v4, %v1426_v55  ;;  %v1497_v24 = vadd.f32 %v3155_v4, %v1427_v13  ;;  %1620 = vst [vmem:[%s4652_s5 + $0xb0] sm:$0xff] %v1556_v1  ;;  %v1498_v27 = vadd.f32 %v3155_v4, %v1428_v2  ;;  %v1430_v28 = vmul.f32 %v3119_v32, %v1360_v49  ;;  %v1376_v1 = vld [vmem:[%s4652_s5 + $0x170] sm:$0xff] }
 0x20f   : > { %1621 = vst [vmem:[%s4652_s5 + $0xb8] sm:$0xff] %v1557_v18  ;;  %v1499_v36 = vadd.f32 %v3155_v4, %v1429_v20  ;;  %v1431_v29 = vmul.f32 %v3119_v32, %v1361_v15  ;;  %v1558_v34 = vmax.f32 %v1494_v12, 0.0  ;;  %v1559_v58 = vmax.f32 %v1495_v11, 0.0  ;;  %v1377_v18 = vld [vmem:[%s4652_s5 + $0x178] sm:$0xff] }
 0x210   : > { %v1560_v22 = vmax.f32 %v1496_v23, 0.0  ;;  %v1561_v38 = vmax.f32 %v1497_v24, 0.0  ;;  %v1562_v19 = vmax.f32 %v1498_v27, 0.0  ;;  %v1500_v42 = vadd.f32 %v3155_v4, %v1430_v28 }
 0x211   : > { %v1563_v40 = vmax.f32 %v1499_v36, 0.0  ;;  %v1501_v31 = vadd.f32 %v3155_v4, %v1431_v29  ;;  %1622 = vst [vmem:[%s4652_s5 + $0xc0] sm:$0xff] %v1558_v34  ;;  %1623 = vst [vmem:[%s4652_s5 + $0xc8] sm:$0xff] %v1559_v58  ;;  %v1432_v41 = vmul.f32 %v3119_v32, %v1362_v26  ;;  %v1433_v43 = vmul.f32 %v3119_v32, %v1363_v47  ;;  %v1378_v36 = vld [vmem:[%s4652_s5 + $0x180] sm:$0xff]  ;;  %v1380_v34 = vld [vmem:[%s4652_s5 + $0x190] sm:$0xff] }
 0x212   : > { %1624 = vst [vmem:[%s4652_s5 + $0xd0] sm:$0xff] %v1560_v22  ;;  %1625 = vst [vmem:[%s4652_s5 + $0xd8] sm:$0xff] %v1561_v38  ;;  %v1434_v44 = vmul.f32 %v3119_v32, %v1364_v16  ;;  %v1435_v46 = vmul.f32 %v3119_v32, %v1365_v30  ;;  %v1564_v48 = vmax.f32 %v1500_v42, 0.0  ;;  %v1436_v7 = vmul.f32 %v3119_v32, %v1366_v6  ;;  %v1379_v30 = vld [vmem:[%s4652_s5 + $0x188] sm:$0xff]  ;;  %v1381_v58 = vld [vmem:[%s4652_s5 + $0x198] sm:$0xff] }
 0x213   : > { %1626 = vst [vmem:[%s4652_s5 + $0xe0] sm:$0xff] %v1562_v19  ;;  %1627 = vst [vmem:[%s4652_s5 + $0xe8] sm:$0xff] %v1563_v40  ;;  %v1565_v52 = vmax.f32 %v1501_v31, 0.0  ;;  %v1437_v59 = vmul.f32 %v3119_v32, %v1367_v39  ;;  %v1502_v53 = vadd.f32 %v3155_v4, %v1432_v41  ;;  %v1503_v21 = vadd.f32 %v3155_v4, %v1433_v43  ;;  %v1382_v19 = vld [vmem:[%s4652_s5 + $0x1a0] sm:$0xff]  ;;  %v1383_v40 = vld [vmem:[%s4652_s5 + $0x1a8] sm:$0xff] }
 0x214   : > { %v1504_v54 = vadd.f32 %v3155_v4, %v1434_v44  ;;  %v1505_v37 = vadd.f32 %v3155_v4, %v1435_v46  ;;  %1628 = vst [vmem:[%s4652_s5 + $0xf0] sm:$0xff] %v1564_v48  ;;  %v1506_v51 = vadd.f32 %v3155_v4, %v1436_v7  ;;  %v1438_v14 = vmul.f32 %v3119_v32, %v1368_v50  ;;  %v1384_v48 = vld [vmem:[%s4652_s5 + $0x1b0] sm:$0xff] }
 0x215   : > { %1629 = vst [vmem:[%s4652_s5 + $0xf8] sm:$0xff] %v1565_v52  ;;  %v1507_v60 = vadd.f32 %v3155_v4, %v1437_v59  ;;  %v1439_v61 = vmul.f32 %v3119_v32, %v1369_v57  ;;  %v1566_v17 = vmax.f32 %v1502_v53, 0.0  ;;  %v1567_v63 = vmax.f32 %v1503_v21, 0.0  ;;  %v1385_v52 = vld [vmem:[%s4652_s5 + $0x1b8] sm:$0xff] }
 0x216   : > { %v1568_v3 = vmax.f32 %v1504_v54, 0.0  ;;  %v1569_v35 = vmax.f32 %v1505_v37, 0.0  ;;  %v1570_v33 = vmax.f32 %v1506_v51, 0.0  ;;  %v1508_v9 = vadd.f32 %v3155_v4, %v1438_v14 }
 0x217   : > { %v1571_v45 = vmax.f32 %v1507_v60, 0.0  ;;  %v1509_v10 = vadd.f32 %v3155_v4, %v1439_v61  ;;  %1630 = vst [vmem:[%s4652_s5 + $0x100] sm:$0xff] %v1566_v17  ;;  %1631 = vst [vmem:[%s4652_s5 + $0x108] sm:$0xff] %v1567_v63  ;;  %v1440_v55 = vmul.f32 %v3119_v32, %v1370_v56  ;;  %v1441_v13 = vmul.f32 %v3119_v32, %v1371_v0  ;;  %v1386_v60 = vld [vmem:[%s4652_s5 + $0x1c0] sm:$0xff]  ;;  %v1388_v17 = vld [vmem:[%s4652_s5 + $0x1d0] sm:$0xff] }
 0x218   : > { %1632 = vst [vmem:[%s4652_s5 + $0x110] sm:$0xff] %v1568_v3  ;;  %1633 = vst [vmem:[%s4652_s5 + $0x118] sm:$0xff] %v1569_v35  ;;  %v1442_v49 = vmul.f32 %v3119_v32, %v1372_v62  ;;  %v1443_v15 = vmul.f32 %v3119_v32, %v1373_v25  ;;  %v1572_v2 = vmax.f32 %v1508_v9, 0.0  ;;  %v1444_v12 = vmul.f32 %v3119_v32, %v1374_v5  ;;  %v1387_v25 = vld [vmem:[%s4652_s5 + $0x1c8] sm:$0xff]  ;;  %v1389_v63 = vld [vmem:[%s4652_s5 + $0x1d8] sm:$0xff] }
 0x219   : > { %1634 = vst [vmem:[%s4652_s5 + $0x120] sm:$0xff] %v1570_v33  ;;  %1635 = vst [vmem:[%s4652_s5 + $0x128] sm:$0xff] %v1571_v45  ;;  %v1573_v20 = vmax.f32 %v1509_v10, 0.0  ;;  %v1445_v11 = vmul.f32 %v3119_v32, %v1375_v8  ;;  %v1510_v23 = vadd.f32 %v3155_v4, %v1440_v55  ;;  %v1511_v24 = vadd.f32 %v3155_v4, %v1441_v13  ;;  %v1390_v33 = vld [vmem:[%s4652_s5 + $0x1e0] sm:$0xff]  ;;  %v1391_v45 = vld [vmem:[%s4652_s5 + $0x1e8] sm:$0xff] }
 0x21a   : > { %v1512_v26 = vadd.f32 %v3155_v4, %v1442_v49  ;;  %v1513_v27 = vadd.f32 %v3155_v4, %v1443_v15  ;;  %1636 = vst [vmem:[%s4652_s5 + $0x130] sm:$0xff] %v1572_v2  ;;  %v1514_v28 = vadd.f32 %v3155_v4, %v1444_v12  ;;  %v1446_v47 = vmul.f32 %v3119_v32, %v1376_v1  ;;  %v1392_v2 = vld [vmem:[%s4652_s5 + $0x1f0] sm:$0xff] }
 0x21b   : > { %1637 = vst [vmem:[%s4652_s5 + $0x138] sm:$0xff] %v1573_v20  ;;  %v1515_v29 = vadd.f32 %v3155_v4, %v1445_v11  ;;  %v1447_v16 = vmul.f32 %v3119_v32, %v1377_v18  ;;  %v1574_v22 = vmax.f32 %v1510_v23, 0.0  ;;  %v1575_v38 = vmax.f32 %v1511_v24, 0.0  ;;  %v1393_v20 = vld [vmem:[%s4652_s5 + $0x1f8] sm:$0xff] }
 0x21c   : > { %v1576_v6 = vmax.f32 %v1512_v26, 0.0  ;;  %v1577_v39 = vmax.f32 %v1513_v27, 0.0  ;;  %v1578_v42 = vmax.f32 %v1514_v28, 0.0  ;;  %v1516_v41 = vadd.f32 %v3155_v4, %v1446_v47 }
 0x21d   : > { %v1579_v31 = vmax.f32 %v1515_v29, 0.0  ;;  %v1517_v43 = vadd.f32 %v3155_v4, %v1447_v16  ;;  %1638 = vst [vmem:[%s4652_s5 + $0x140] sm:$0xff] %v1574_v22  ;;  %1639 = vst [vmem:[%s4652_s5 + $0x148] sm:$0xff] %v1575_v38  ;;  %v1448_v44 = vmul.f32 %v3119_v32, %v1378_v36  ;;  %v1449_v46 = vmul.f32 %v3119_v32, %v1379_v30  ;;  %v1662_v29 = vld [vmem:[%s4652_s5 + $0x200] sm:$0xff]  ;;  %v1664_v22 = vld [vmem:[%s4652_s5 + $0x210] sm:$0xff] }
 0x21e   : > { %1640 = vst [vmem:[%s4652_s5 + $0x150] sm:$0xff] %v1576_v6  ;;  %1641 = vst [vmem:[%s4652_s5 + $0x158] sm:$0xff] %v1577_v39  ;;  %v1450_v50 = vmul.f32 %v3119_v32, %v1380_v34  ;;  %v1451_v57 = vmul.f32 %v3119_v32, %v1381_v58  ;;  %v1580_v7 = vmax.f32 %v1516_v41, 0.0  ;;  %v1452_v53 = vmul.f32 %v3119_v32, %v1382_v19  ;;  %v1663_v58 = vld [vmem:[%s4652_s5 + $0x208] sm:$0xff]  ;;  %v1665_v38 = vld [vmem:[%s4652_s5 + $0x218] sm:$0xff] }
 0x21f   : > { %1642 = vst [vmem:[%s4652_s5 + $0x160] sm:$0xff] %v1578_v42  ;;  %1643 = vst [vmem:[%s4652_s5 + $0x168] sm:$0xff] %v1579_v31  ;;  %v1581_v59 = vmax.f32 %v1517_v43, 0.0  ;;  %v1453_v21 = vmul.f32 %v3119_v32, %v1383_v40  ;;  %v1518_v54 = vadd.f32 %v3155_v4, %v1448_v44  ;;  %v1519_v37 = vadd.f32 %v3155_v4, %v1449_v46  ;;  %v1666_v42 = vld [vmem:[%s4652_s5 + $0x220] sm:$0xff]  ;;  %v1667_v31 = vld [vmem:[%s4652_s5 + $0x228] sm:$0xff] }
 0x220   : > { %v1520_v56 = vadd.f32 %v3155_v4, %v1450_v50  ;;  %v1521_v51 = vadd.f32 %v3155_v4, %v1451_v57  ;;  %1644 = vst [vmem:[%s4652_s5 + $0x170] sm:$0xff] %v1580_v7  ;;  %v1522_v14 = vadd.f32 %v3155_v4, %v1452_v53  ;;  %v1454_v0 = vmul.f32 %v3119_v32, %v1384_v48  ;;  %v1668_v7 = vld [vmem:[%s4652_s5 + $0x230] sm:$0xff] }
 0x221   : > { %1645 = vst [vmem:[%s4652_s5 + $0x178] sm:$0xff] %v1581_v59  ;;  %v1523_v61 = vadd.f32 %v3155_v4, %v1453_v21  ;;  %v1455_v62 = vmul.f32 %v3119_v32, %v1385_v52  ;;  %v1582_v3 = vmax.f32 %v1518_v54, 0.0  ;;  %v1583_v35 = vmax.f32 %v1519_v37, 0.0  ;;  %v1669_v59 = vld [vmem:[%s4652_s5 + $0x238] sm:$0xff] }
 0x222   : > { %v1584_v5 = vmax.f32 %v1520_v56, 0.0  ;;  %v1585_v8 = vmax.f32 %v1521_v51, 0.0  ;;  %v1586_v9 = vmax.f32 %v1522_v14, 0.0  ;;  %v1524_v55 = vadd.f32 %v3155_v4, %v1454_v0 }
 0x223   : > { %v1587_v10 = vmax.f32 %v1523_v61, 0.0  ;;  %v1525_v13 = vadd.f32 %v3155_v4, %v1455_v62  ;;  %1646 = vst [vmem:[%s4652_s5 + $0x180] sm:$0xff] %v1582_v3  ;;  %1647 = vst [vmem:[%s4652_s5 + $0x188] sm:$0xff] %v1583_v35  ;;  %v1456_v49 = vmul.f32 %v3119_v32, %v1386_v60  ;;  %v1457_v15 = vmul.f32 %v3119_v32, %v1387_v25  ;;  %v1670_v61 = vld [vmem:[%s4652_s5 + $0x240] sm:$0xff]  ;;  %v1672_v3 = vld [vmem:[%s4652_s5 + $0x250] sm:$0xff] }
 0x224   : > { %1648 = vst [vmem:[%s4652_s5 + $0x190] sm:$0xff] %v1584_v5  ;;  %1649 = vst [vmem:[%s4652_s5 + $0x198] sm:$0xff] %v1585_v8  ;;  %v1458_v1 = vmul.f32 %v3119_v32, %v1388_v17  ;;  %v1459_v18 = vmul.f32 %v3119_v32, %v1389_v63  ;;  %v1588_v12 = vmax.f32 %v1524_v55, 0.0  ;;  %v1460_v23 = vmul.f32 %v3119_v32, %v1390_v33  ;;  %v1671_v63 = vld [vmem:[%s4652_s5 + $0x248] sm:$0xff]  ;;  %v1673_v35 = vld [vmem:[%s4652_s5 + $0x258] sm:$0xff] }
 0x225   : > { %1650 = vst [vmem:[%s4652_s5 + $0x1a0] sm:$0xff] %v1586_v9  ;;  %1651 = vst [vmem:[%s4652_s5 + $0x1a8] sm:$0xff] %v1587_v10  ;;  %v1589_v11 = vmax.f32 %v1525_v13, 0.0  ;;  %v1461_v24 = vmul.f32 %v3119_v32, %v1391_v45  ;;  %v1526_v26 = vadd.f32 %v3155_v4, %v1456_v49  ;;  %v1527_v27 = vadd.f32 %v3155_v4, %v1457_v15  ;;  %v1674_v9 = vld [vmem:[%s4652_s5 + $0x260] sm:$0xff]  ;;  %v1675_v10 = vld [vmem:[%s4652_s5 + $0x268] sm:$0xff] }
 0x226   : > { %v1528_v36 = vadd.f32 %v3155_v4, %v1458_v1  ;;  %v1529_v28 = vadd.f32 %v3155_v4, %v1459_v18  ;;  %1652 = vst [vmem:[%s4652_s5 + $0x1b0] sm:$0xff] %v1588_v12  ;;  %v1530_v47 = vadd.f32 %v3155_v4, %v1460_v23  ;;  %v1462_v30 = vmul.f32 %v3119_v32, %v1392_v2  ;;  %v1676_v12 = vld [vmem:[%s4652_s5 + $0x270] sm:$0xff] }
 0x227   : > { %1653 = vst [vmem:[%s4652_s5 + $0x1b8] sm:$0xff] %v1589_v11  ;;  %v1531_v16 = vadd.f32 %v3155_v4, %v1461_v24  ;;  %v1463_v34 = vmul.f32 %v3119_v32, %v1393_v20  ;;  %v1590_v6 = vmax.f32 %v1526_v26, 0.0  ;;  %v1591_v39 = vmax.f32 %v1527_v27, 0.0  ;;  %v1677_v11 = vld [vmem:[%s4652_s5 + $0x278] sm:$0xff] }
 0x228   : > { %v1592_v19 = vmax.f32 %v1528_v36, 0.0  ;;  %v1593_v40 = vmax.f32 %v1529_v28, 0.0  ;;  %v1594_v41 = vmax.f32 %v1530_v47, 0.0  ;;  %v1532_v44 = vadd.f32 %v3155_v4, %v1462_v30 }
 0x229   : > { %v1595_v43 = vmax.f32 %v1531_v16, 0.0  ;;  %v1533_v46 = vadd.f32 %v3155_v4, %v1463_v34  ;;  %1654 = vst [vmem:[%s4652_s5 + $0x1c0] sm:$0xff] %v1590_v6  ;;  %1655 = vst [vmem:[%s4652_s5 + $0x1c8] sm:$0xff] %v1591_v39  ;;  %v1726_v50 = vmul.f32 %v1662_v29, %v3119_v32  ;;  %v1727_v57 = vmul.f32 %v1663_v58, %v3119_v32  ;;  %v1678_v16 = vld [vmem:[%s4652_s5 + $0x280] sm:$0xff]  ;;  %v1680_v6 = vld [vmem:[%s4652_s5 + $0x290] sm:$0xff] }
 0x22a   : > { %1656 = vst [vmem:[%s4652_s5 + $0x1d0] sm:$0xff] %v1592_v19  ;;  %1657 = vst [vmem:[%s4652_s5 + $0x1d8] sm:$0xff] %v1593_v40  ;;  %v1728_v48 = vmul.f32 %v1664_v22, %v3119_v32  ;;  %v1729_v52 = vmul.f32 %v1665_v38, %v3119_v32  ;;  %v1596_v53 = vmax.f32 %v1532_v44, 0.0  ;;  %v1730_v54 = vmul.f32 %v1666_v42, %v3119_v32  ;;  %v1679_v38 = vld [vmem:[%s4652_s5 + $0x288] sm:$0xff]  ;;  %v1681_v39 = vld [vmem:[%s4652_s5 + $0x298] sm:$0xff] }
 0x22b   : > { %1658 = vst [vmem:[%s4652_s5 + $0x1e0] sm:$0xff] %v1594_v41  ;;  %1659 = vst [vmem:[%s4652_s5 + $0x1e8] sm:$0xff] %v1595_v43  ;;  %v1597_v21 = vmax.f32 %v1533_v46, 0.0  ;;  %v1731_v37 = vmul.f32 %v1667_v31, %v3119_v32  ;;  %v1790_v56 = vadd.f32 %v1726_v50, %v3155_v4  ;;  %v1791_v51 = vadd.f32 %v1727_v57, %v3155_v4  ;;  %v1682_v41 = vld [vmem:[%s4652_s5 + $0x2a0] sm:$0xff]  ;;  %v1683_v43 = vld [vmem:[%s4652_s5 + $0x2a8] sm:$0xff] }
 0x22c   : > { %v1792_v60 = vadd.f32 %v1728_v48, %v3155_v4  ;;  %v1793_v14 = vadd.f32 %v1729_v52, %v3155_v4  ;;  %1660 = vst [vmem:[%s4652_s5 + $0x1f0] sm:$0xff] %v1596_v53  ;;  %v1794_v0 = vadd.f32 %v1730_v54, %v3155_v4  ;;  %v1732_v25 = vmul.f32 %v1668_v7, %v3119_v32  ;;  %v1684_v53 = vld [vmem:[%s4652_s5 + $0x2b0] sm:$0xff] }
 0x22d   : > { %1661 = vst [vmem:[%s4652_s5 + $0x1f8] sm:$0xff] %v1597_v21  ;;  %v1795_v62 = vadd.f32 %v1731_v37, %v3155_v4  ;;  %v1733_v17 = vmul.f32 %v1669_v59, %v3119_v32  ;;  %v1854_v5 = vmax.f32 %v1790_v56, 0.0  ;;  %v1855_v8 = vmax.f32 %v1791_v51, 0.0  ;;  %v1685_v21 = vld [vmem:[%s4652_s5 + $0x2b8] sm:$0xff] }
 0x22e   : > { %v1856_v33 = vmax.f32 %v1792_v60, 0.0  ;;  %v1857_v45 = vmax.f32 %v1793_v14, 0.0  ;;  %v1858_v55 = vmax.f32 %v1794_v0, 0.0  ;;  %v1796_v49 = vadd.f32 %v1732_v25, %v3155_v4 }
 0x22f   : > { %v1859_v13 = vmax.f32 %v1795_v62, 0.0  ;;  %v1797_v15 = vadd.f32 %v1733_v17, %v3155_v4  ;;  %1918 = vst [vmem:[%s4652_s5 + $0x200] sm:$0xff] %v1854_v5  ;;  %1919 = vst [vmem:[%s4652_s5 + $0x208] sm:$0xff] %v1855_v8  ;;  %v1734_v1 = vmul.f32 %v1670_v61, %v3119_v32  ;;  %v1735_v18 = vmul.f32 %v1671_v63, %v3119_v32  ;;  %v1686_v62 = vld [vmem:[%s4652_s5 + $0x2c0] sm:$0xff]  ;;  %v1688_v5 = vld [vmem:[%s4652_s5 + $0x2d0] sm:$0xff] }
 0x230   : > { %1920 = vst [vmem:[%s4652_s5 + $0x210] sm:$0xff] %v1856_v33  ;;  %1921 = vst [vmem:[%s4652_s5 + $0x218] sm:$0xff] %v1857_v45  ;;  %v1736_v2 = vmul.f32 %v1672_v3, %v3119_v32  ;;  %v1737_v20 = vmul.f32 %v1673_v35, %v3119_v32  ;;  %v1860_v23 = vmax.f32 %v1796_v49, 0.0  ;;  %v1738_v26 = vmul.f32 %v1674_v9, %v3119_v32  ;;  %v1687_v35 = vld [vmem:[%s4652_s5 + $0x2c8] sm:$0xff]  ;;  %v1689_v8 = vld [vmem:[%s4652_s5 + $0x2d8] sm:$0xff] }
 0x231   : > { %1922 = vst [vmem:[%s4652_s5 + $0x220] sm:$0xff] %v1858_v55  ;;  %1923 = vst [vmem:[%s4652_s5 + $0x228] sm:$0xff] %v1859_v13  ;;  %v1861_v24 = vmax.f32 %v1797_v15, 0.0  ;;  %v1739_v27 = vmul.f32 %v1675_v10, %v3119_v32  ;;  %v1798_v36 = vadd.f32 %v1734_v1, %v3155_v4  ;;  %v1799_v28 = vadd.f32 %v1735_v18, %v3155_v4  ;;  %v1690_v55 = vld [vmem:[%s4652_s5 + $0x2e0] sm:$0xff]  ;;  %v1691_v13 = vld [vmem:[%s4652_s5 + $0x2e8] sm:$0xff] }
 0x232   : > { %v1800_v29 = vadd.f32 %v1736_v2, %v3155_v4  ;;  %v1801_v47 = vadd.f32 %v1737_v20, %v3155_v4  ;;  %1924 = vst [vmem:[%s4652_s5 + $0x230] sm:$0xff] %v1860_v23  ;;  %v1802_v30 = vadd.f32 %v1738_v26, %v3155_v4  ;;  %v1740_v58 = vmul.f32 %v1676_v12, %v3119_v32  ;;  %v1692_v23 = vld [vmem:[%s4652_s5 + $0x2f0] sm:$0xff] }
 0x233   : > { %1925 = vst [vmem:[%s4652_s5 + $0x238] sm:$0xff] %v1861_v24  ;;  %v1803_v34 = vadd.f32 %v1739_v27, %v3155_v4  ;;  %v1741_v22 = vmul.f32 %v1677_v11, %v3119_v32  ;;  %v1862_v19 = vmax.f32 %v1798_v36, 0.0  ;;  %v1863_v40 = vmax.f32 %v1799_v28, 0.0  ;;  %v1693_v24 = vld [vmem:[%s4652_s5 + $0x2f8] sm:$0xff] }
 0x234   : > { %v1864_v42 = vmax.f32 %v1800_v29, 0.0  ;;  %v1865_v31 = vmax.f32 %v1801_v47, 0.0  ;;  %v1866_v44 = vmax.f32 %v1802_v30, 0.0  ;;  %v1804_v50 = vadd.f32 %v1740_v58, %v3155_v4 }
 0x235   : > { %v1867_v46 = vmax.f32 %v1803_v34, 0.0  ;;  %v1805_v57 = vadd.f32 %v1741_v22, %v3155_v4  ;;  %1926 = vst [vmem:[%s4652_s5 + $0x240] sm:$0xff] %v1862_v19  ;;  %1927 = vst [vmem:[%s4652_s5 + $0x248] sm:$0xff] %v1863_v40  ;;  %v1742_v48 = vmul.f32 %v1678_v16, %v3119_v32  ;;  %v1743_v52 = vmul.f32 %v1679_v38, %v3119_v32  ;;  %v1694_v34 = vld [vmem:[%s4652_s5 + $0x300] sm:$0xff]  ;;  %v1696_v19 = vld [vmem:[%s4652_s5 + $0x310] sm:$0xff] }
 0x236   : > { %1928 = vst [vmem:[%s4652_s5 + $0x250] sm:$0xff] %v1864_v42  ;;  %1929 = vst [vmem:[%s4652_s5 + $0x258] sm:$0xff] %v1865_v31  ;;  %v1744_v7 = vmul.f32 %v1680_v6, %v3119_v32  ;;  %v1745_v59 = vmul.f32 %v1681_v39, %v3119_v32  ;;  %v1868_v54 = vmax.f32 %v1804_v50, 0.0  ;;  %v1746_v56 = vmul.f32 %v1682_v41, %v3119_v32  ;;  %v1695_v39 = vld [vmem:[%s4652_s5 + $0x308] sm:$0xff]  ;;  %v1697_v40 = vld [vmem:[%s4652_s5 + $0x318] sm:$0xff] }
 0x237   : > { %1930 = vst [vmem:[%s4652_s5 + $0x260] sm:$0xff] %v1866_v44  ;;  %1931 = vst [vmem:[%s4652_s5 + $0x268] sm:$0xff] %v1867_v46  ;;  %v1869_v37 = vmax.f32 %v1805_v57, 0.0  ;;  %v1747_v51 = vmul.f32 %v1683_v43, %v3119_v32  ;;  %v1806_v60 = vadd.f32 %v1742_v48, %v3155_v4  ;;  %v1807_v14 = vadd.f32 %v1743_v52, %v3155_v4  ;;  %v1698_v44 = vld [vmem:[%s4652_s5 + $0x320] sm:$0xff]  ;;  %v1699_v46 = vld [vmem:[%s4652_s5 + $0x328] sm:$0xff] }
 0x238   : > { %v1808_v61 = vadd.f32 %v1744_v7, %v3155_v4  ;;  %v1809_v0 = vadd.f32 %v1745_v59, %v3155_v4  ;;  %1932 = vst [vmem:[%s4652_s5 + $0x270] sm:$0xff] %v1868_v54  ;;  %v1810_v25 = vadd.f32 %v1746_v56, %v3155_v4  ;;  %v1748_v63 = vmul.f32 %v1684_v53, %v3119_v32  ;;  %v1700_v54 = vld [vmem:[%s4652_s5 + $0x330] sm:$0xff] }
 0x239   : > { %1933 = vst [vmem:[%s4652_s5 + $0x278] sm:$0xff] %v1869_v37  ;;  %v1811_v17 = vadd.f32 %v1747_v51, %v3155_v4  ;;  %v1749_v3 = vmul.f32 %v1685_v21, %v3119_v32  ;;  %v1870_v33 = vmax.f32 %v1806_v60, 0.0  ;;  %v1871_v45 = vmax.f32 %v1807_v14, 0.0  ;;  %v1701_v37 = vld [vmem:[%s4652_s5 + $0x338] sm:$0xff] }
 0x23a   : > { %v1872_v9 = vmax.f32 %v1808_v61, 0.0  ;;  %v1873_v10 = vmax.f32 %v1809_v0, 0.0  ;;  %v1874_v49 = vmax.f32 %v1810_v25, 0.0  ;;  %v1812_v1 = vadd.f32 %v1748_v63, %v3155_v4 }
 0x23b   : > { %v1875_v15 = vmax.f32 %v1811_v17, 0.0  ;;  %v1813_v18 = vadd.f32 %v1749_v3, %v3155_v4  ;;  %1934 = vst [vmem:[%s4652_s5 + $0x280] sm:$0xff] %v1870_v33  ;;  %1935 = vst [vmem:[%s4652_s5 + $0x288] sm:$0xff] %v1871_v45  ;;  %v1750_v2 = vmul.f32 %v1686_v62, %v3119_v32  ;;  %v1751_v20 = vmul.f32 %v1687_v35, %v3119_v32  ;;  %v1702_v17 = vld [vmem:[%s4652_s5 + $0x340] sm:$0xff]  ;;  %v1704_v33 = vld [vmem:[%s4652_s5 + $0x350] sm:$0xff] }
 0x23c   : > { %1936 = vst [vmem:[%s4652_s5 + $0x290] sm:$0xff] %v1872_v9  ;;  %1937 = vst [vmem:[%s4652_s5 + $0x298] sm:$0xff] %v1873_v10  ;;  %v1752_v12 = vmul.f32 %v1688_v5, %v3119_v32  ;;  %v1753_v11 = vmul.f32 %v1689_v8, %v3119_v32  ;;  %v1876_v26 = vmax.f32 %v1812_v1, 0.0  ;;  %v1754_v36 = vmul.f32 %v1690_v55, %v3119_v32  ;;  %v1703_v8 = vld [vmem:[%s4652_s5 + $0x348] sm:$0xff]  ;;  %v1705_v45 = vld [vmem:[%s4652_s5 + $0x358] sm:$0xff] }
 0x23d   : > { %1938 = vst [vmem:[%s4652_s5 + $0x2a0] sm:$0xff] %v1874_v49  ;;  %1939 = vst [vmem:[%s4652_s5 + $0x2a8] sm:$0xff] %v1875_v15  ;;  %v1877_v27 = vmax.f32 %v1813_v18, 0.0  ;;  %v1755_v28 = vmul.f32 %v1691_v13, %v3119_v32  ;;  %v1814_v29 = vadd.f32 %v1750_v2, %v3155_v4  ;;  %v1815_v47 = vadd.f32 %v1751_v20, %v3155_v4  ;;  %v1706_v49 = vld [vmem:[%s4652_s5 + $0x360] sm:$0xff]  ;;  %v1707_v15 = vld [vmem:[%s4652_s5 + $0x368] sm:$0xff] }
 0x23e   : > { %v1816_v16 = vadd.f32 %v1752_v12, %v3155_v4  ;;  %v1817_v30 = vadd.f32 %v1753_v11, %v3155_v4  ;;  %1940 = vst [vmem:[%s4652_s5 + $0x2b0] sm:$0xff] %v1876_v26  ;;  %v1818_v58 = vadd.f32 %v1754_v36, %v3155_v4  ;;  %v1756_v38 = vmul.f32 %v1692_v23, %v3119_v32  ;;  %v1708_v26 = vld [vmem:[%s4652_s5 + $0x370] sm:$0xff] }
 0x23f   : > { %1941 = vst [vmem:[%s4652_s5 + $0x2b8] sm:$0xff] %v1877_v27  ;;  %v1819_v22 = vadd.f32 %v1755_v28, %v3155_v4  ;;  %v1757_v6 = vmul.f32 %v1693_v24, %v3119_v32  ;;  %v1878_v42 = vmax.f32 %v1814_v29, 0.0  ;;  %v1879_v31 = vmax.f32 %v1815_v47, 0.0  ;;  %v1709_v27 = vld [vmem:[%s4652_s5 + $0x378] sm:$0xff] }
 0x240   : > { %v1880_v41 = vmax.f32 %v1816_v16, 0.0  ;;  %v1881_v43 = vmax.f32 %v1817_v30, 0.0  ;;  %v1882_v50 = vmax.f32 %v1818_v58, 0.0  ;;  %v1820_v48 = vadd.f32 %v1756_v38, %v3155_v4 }
 0x241   : > { %v1883_v57 = vmax.f32 %v1819_v22, 0.0  ;;  %v1821_v52 = vadd.f32 %v1757_v6, %v3155_v4  ;;  %1942 = vst [vmem:[%s4652_s5 + $0x2c0] sm:$0xff] %v1878_v42  ;;  %1943 = vst [vmem:[%s4652_s5 + $0x2c8] sm:$0xff] %v1879_v31  ;;  %v1758_v7 = vmul.f32 %v1694_v34, %v3119_v32  ;;  %v1759_v59 = vmul.f32 %v1695_v39, %v3119_v32  ;;  %v1710_v22 = vld [vmem:[%s4652_s5 + $0x380] sm:$0xff]  ;;  %v1712_v42 = vld [vmem:[%s4652_s5 + $0x390] sm:$0xff] }
 0x242   : > { %1944 = vst [vmem:[%s4652_s5 + $0x2d0] sm:$0xff] %v1880_v41  ;;  %1945 = vst [vmem:[%s4652_s5 + $0x2d8] sm:$0xff] %v1881_v43  ;;  %v1760_v53 = vmul.f32 %v1696_v19, %v3119_v32  ;;  %v1761_v21 = vmul.f32 %v1697_v40, %v3119_v32  ;;  %v1884_v56 = vmax.f32 %v1820_v48, 0.0  ;;  %v1762_v60 = vmul.f32 %v1698_v44, %v3119_v32  ;;  %v1711_v40 = vld [vmem:[%s4652_s5 + $0x388] sm:$0xff]  ;;  %v1713_v31 = vld [vmem:[%s4652_s5 + $0x398] sm:$0xff] }
 0x243   : > { %1946 = vst [vmem:[%s4652_s5 + $0x2e0] sm:$0xff] %v1882_v50  ;;  %1947 = vst [vmem:[%s4652_s5 + $0x2e8] sm:$0xff] %v1883_v57  ;;  %v1885_v51 = vmax.f32 %v1821_v52, 0.0  ;;  %v1763_v14 = vmul.f32 %v1699_v46, %v3119_v32  ;;  %v1822_v61 = vadd.f32 %v1758_v7, %v3155_v4  ;;  %v1823_v0 = vadd.f32 %v1759_v59, %v3155_v4  ;;  %v1714_v50 = vld [vmem:[%s4652_s5 + $0x3a0] sm:$0xff]  ;;  %v1715_v57 = vld [vmem:[%s4652_s5 + $0x3a8] sm:$0xff] }
 0x244   : > { %v1824_v62 = vadd.f32 %v1760_v53, %v3155_v4  ;;  %v1825_v25 = vadd.f32 %v1761_v21, %v3155_v4  ;;  %1948 = vst [vmem:[%s4652_s5 + $0x2f0] sm:$0xff] %v1884_v56  ;;  %v1826_v63 = vadd.f32 %v1762_v60, %v3155_v4  ;;  %v1764_v35 = vmul.f32 %v1700_v54, %v3119_v32  ;;  %v1716_v56 = vld [vmem:[%s4652_s5 + $0x3b0] sm:$0xff] }
 0x245   : > { %1949 = vst [vmem:[%s4652_s5 + $0x2f8] sm:$0xff] %v1885_v51  ;;  %v1827_v3 = vadd.f32 %v1763_v14, %v3155_v4  ;;  %v1765_v5 = vmul.f32 %v1701_v37, %v3119_v32  ;;  %v1886_v9 = vmax.f32 %v1822_v61, 0.0  ;;  %v1887_v10 = vmax.f32 %v1823_v0, 0.0  ;;  %v1717_v51 = vld [vmem:[%s4652_s5 + $0x3b8] sm:$0xff] }
 0x246   : > { %v1888_v55 = vmax.f32 %v1824_v62, 0.0  ;;  %v1889_v13 = vmax.f32 %v1825_v25, 0.0  ;;  %v1890_v1 = vmax.f32 %v1826_v63, 0.0  ;;  %v1828_v2 = vadd.f32 %v1764_v35, %v3155_v4 }
 0x247   : > { %v1891_v18 = vmax.f32 %v1827_v3, 0.0  ;;  %v1829_v20 = vadd.f32 %v1765_v5, %v3155_v4  ;;  %1950 = vst [vmem:[%s4652_s5 + $0x300] sm:$0xff] %v1886_v9  ;;  %1951 = vst [vmem:[%s4652_s5 + $0x308] sm:$0xff] %v1887_v10  ;;  %v1766_v12 = vmul.f32 %v1702_v17, %v3119_v32  ;;  %v1767_v11 = vmul.f32 %v1703_v8, %v3119_v32  ;;  %v1718_v3 = vld [vmem:[%s4652_s5 + $0x3c0] sm:$0xff]  ;;  %v1720_v9 = vld [vmem:[%s4652_s5 + $0x3d0] sm:$0xff] }
 0x248   : > { %1952 = vst [vmem:[%s4652_s5 + $0x310] sm:$0xff] %v1888_v55  ;;  %1953 = vst [vmem:[%s4652_s5 + $0x318] sm:$0xff] %v1889_v13  ;;  %v1768_v23 = vmul.f32 %v1704_v33, %v3119_v32  ;;  %v1769_v24 = vmul.f32 %v1705_v45, %v3119_v32  ;;  %v1892_v36 = vmax.f32 %v1828_v2, 0.0  ;;  %v1770_v29 = vmul.f32 %v1706_v49, %v3119_v32  ;;  %v1719_v45 = vld [vmem:[%s4652_s5 + $0x3c8] sm:$0xff]  ;;  %v1721_v10 = vld [vmem:[%s4652_s5 + $0x3d8] sm:$0xff] }
 0x249   : > { %1954 = vst [vmem:[%s4652_s5 + $0x320] sm:$0xff] %v1890_v1  ;;  %1955 = vst [vmem:[%s4652_s5 + $0x328] sm:$0xff] %v1891_v18  ;;  %v1893_v28 = vmax.f32 %v1829_v20, 0.0  ;;  %v1771_v47 = vmul.f32 %v1707_v15, %v3119_v32  ;;  %v1830_v16 = vadd.f32 %v1766_v12, %v3155_v4  ;;  %v1831_v30 = vadd.f32 %v1767_v11, %v3155_v4  ;;  %v1722_v1 = vld [vmem:[%s4652_s5 + $0x3e0] sm:$0xff]  ;;  %v1723_v18 = vld [vmem:[%s4652_s5 + $0x3e8] sm:$0xff] }
 0x24a   : > { %v1832_v34 = vadd.f32 %v1768_v23, %v3155_v4  ;;  %v1833_v58 = vadd.f32 %v1769_v24, %v3155_v4  ;;  %1956 = vst [vmem:[%s4652_s5 + $0x330] sm:$0xff] %v1892_v36  ;;  %v1834_v38 = vadd.f32 %v1770_v29, %v3155_v4  ;;  %v1772_v39 = vmul.f32 %v1708_v26, %v3119_v32  ;;  %v1724_v36 = vld [vmem:[%s4652_s5 + $0x3f0] sm:$0xff] }
 0x24b   : > { %1957 = vst [vmem:[%s4652_s5 + $0x338] sm:$0xff] %v1893_v28  ;;  %v1835_v6 = vadd.f32 %v1771_v47, %v3155_v4  ;;  %v1773_v19 = vmul.f32 %v1709_v27, %v3119_v32  ;;  %v1894_v41 = vmax.f32 %v1830_v16, 0.0  ;;  %v1895_v43 = vmax.f32 %v1831_v30, 0.0  ;;  %v1725_v28 = vld [vmem:[%s4652_s5 + $0x3f8] sm:$0xff] }
 0x24c   : > { %v1896_v44 = vmax.f32 %v1832_v34, 0.0  ;;  %v1897_v46 = vmax.f32 %v1833_v58, 0.0  ;;  %v1898_v48 = vmax.f32 %v1834_v38, 0.0  ;;  %v1836_v7 = vadd.f32 %v1772_v39, %v3155_v4 }
 0x24d   : > { %v1899_v52 = vmax.f32 %v1835_v6, 0.0  ;;  %v1837_v59 = vadd.f32 %v1773_v19, %v3155_v4  ;;  %1958 = vst [vmem:[%s4652_s5 + $0x340] sm:$0xff] %v1894_v41  ;;  %1959 = vst [vmem:[%s4652_s5 + $0x348] sm:$0xff] %v1895_v43  ;;  %v1774_v53 = vmul.f32 %v1710_v22, %v3119_v32  ;;  %v1775_v21 = vmul.f32 %v1711_v40, %v3119_v32  ;;  %v1982_v6 = vld [vmem:[%s4652_s5 + $0x400] sm:$0xff]  ;;  %v1984_v41 = vld [vmem:[%s4652_s5 + $0x410] sm:$0xff] }
 0x24e   : > { %1960 = vst [vmem:[%s4652_s5 + $0x350] sm:$0xff] %v1896_v44  ;;  %1961 = vst [vmem:[%s4652_s5 + $0x358] sm:$0xff] %v1897_v46  ;;  %v1776_v54 = vmul.f32 %v1712_v42, %v3119_v32  ;;  %v1777_v37 = vmul.f32 %v1713_v31, %v3119_v32  ;;  %v1900_v60 = vmax.f32 %v1836_v7, 0.0  ;;  %v1778_v61 = vmul.f32 %v1714_v50, %v3119_v32  ;;  %v1983_v31 = vld [vmem:[%s4652_s5 + $0x408] sm:$0xff]  ;;  %v1985_v43 = vld [vmem:[%s4652_s5 + $0x418] sm:$0xff] }
 0x24f   : > { %1962 = vst [vmem:[%s4652_s5 + $0x360] sm:$0xff] %v1898_v48  ;;  %1963 = vst [vmem:[%s4652_s5 + $0x368] sm:$0xff] %v1899_v52  ;;  %v1901_v14 = vmax.f32 %v1837_v59, 0.0  ;;  %v1779_v0 = vmul.f32 %v1715_v57, %v3119_v32  ;;  %v1838_v62 = vadd.f32 %v1774_v53, %v3155_v4  ;;  %v1839_v25 = vadd.f32 %v1775_v21, %v3155_v4  ;;  %v1986_v48 = vld [vmem:[%s4652_s5 + $0x420] sm:$0xff]  ;;  %v1987_v52 = vld [vmem:[%s4652_s5 + $0x428] sm:$0xff] }
 0x250   : > { %v1840_v17 = vadd.f32 %v1776_v54, %v3155_v4  ;;  %v1841_v63 = vadd.f32 %v1777_v37, %v3155_v4  ;;  %1964 = vst [vmem:[%s4652_s5 + $0x370] sm:$0xff] %v1900_v60  ;;  %v1842_v35 = vadd.f32 %v1778_v61, %v3155_v4  ;;  %v1780_v8 = vmul.f32 %v1716_v56, %v3119_v32  ;;  %v1988_v60 = vld [vmem:[%s4652_s5 + $0x430] sm:$0xff] }
 0x251   : > { %1965 = vst [vmem:[%s4652_s5 + $0x378] sm:$0xff] %v1901_v14  ;;  %v1843_v5 = vadd.f32 %v1779_v0, %v3155_v4  ;;  %v1781_v33 = vmul.f32 %v1717_v51, %v3119_v32  ;;  %v1902_v55 = vmax.f32 %v1838_v62, 0.0  ;;  %v1903_v13 = vmax.f32 %v1839_v25, 0.0  ;;  %v1989_v14 = vld [vmem:[%s4652_s5 + $0x438] sm:$0xff] }
 0x252   : > { %v1904_v49 = vmax.f32 %v1840_v17, 0.0  ;;  %v1905_v15 = vmax.f32 %v1841_v63, 0.0  ;;  %v1906_v2 = vmax.f32 %v1842_v35, 0.0  ;;  %v1844_v12 = vadd.f32 %v1780_v8, %v3155_v4 }
 0x253   : > { %v1907_v20 = vmax.f32 %v1843_v5, 0.0  ;;  %v1845_v11 = vadd.f32 %v1781_v33, %v3155_v4  ;;  %1966 = vst [vmem:[%s4652_s5 + $0x380] sm:$0xff] %v1902_v55  ;;  %1967 = vst [vmem:[%s4652_s5 + $0x388] sm:$0xff] %v1903_v13  ;;  %v1782_v23 = vmul.f32 %v1718_v3, %v3119_v32  ;;  %v1783_v24 = vmul.f32 %v1719_v45, %v3119_v32  ;;  %v1990_v5 = vld [vmem:[%s4652_s5 + $0x440] sm:$0xff]  ;;  %v1992_v55 = vld [vmem:[%s4652_s5 + $0x450] sm:$0xff] }
 0x254   : > { %1968 = vst [vmem:[%s4652_s5 + $0x390] sm:$0xff] %v1904_v49  ;;  %1969 = vst [vmem:[%s4652_s5 + $0x398] sm:$0xff] %v1905_v15  ;;  %v1784_v26 = vmul.f32 %v1720_v9, %v3119_v32  ;;  %v1785_v27 = vmul.f32 %v1721_v10, %v3119_v32  ;;  %v1908_v29 = vmax.f32 %v1844_v12, 0.0  ;;  %v1786_v16 = vmul.f32 %v1722_v1, %v3119_v32  ;;  %v1991_v10 = vld [vmem:[%s4652_s5 + $0x448] sm:$0xff]  ;;  %v1993_v13 = vld [vmem:[%s4652_s5 + $0x458] sm:$0xff] }
 0x255   : > { %1970 = vst [vmem:[%s4652_s5 + $0x3a0] sm:$0xff] %v1906_v2  ;;  %1971 = vst [vmem:[%s4652_s5 + $0x3a8] sm:$0xff] %v1907_v20  ;;  %v1909_v47 = vmax.f32 %v1845_v11, 0.0  ;;  %v1787_v30 = vmul.f32 %v1723_v18, %v3119_v32  ;;  %v1846_v34 = vadd.f32 %v1782_v23, %v3155_v4  ;;  %v1847_v58 = vadd.f32 %v1783_v24, %v3155_v4  ;;  %v1994_v2 = vld [vmem:[%s4652_s5 + $0x460] sm:$0xff]  ;;  %v1995_v20 = vld [vmem:[%s4652_s5 + $0x468] sm:$0xff] }
 0x256   : > { %v1848_v22 = vadd.f32 %v1784_v26, %v3155_v4  ;;  %v1849_v38 = vadd.f32 %v1785_v27, %v3155_v4  ;;  %1972 = vst [vmem:[%s4652_s5 + $0x3b0] sm:$0xff] %v1908_v29  ;;  %v1850_v39 = vadd.f32 %v1786_v16, %v3155_v4  ;;  %v1788_v40 = vmul.f32 %v1724_v36, %v3119_v32  ;;  %v1996_v29 = vld [vmem:[%s4652_s5 + $0x470] sm:$0xff] }
 0x257   : > { %1973 = vst [vmem:[%s4652_s5 + $0x3b8] sm:$0xff] %v1909_v47  ;;  %v1851_v19 = vadd.f32 %v1787_v30, %v3155_v4  ;;  %v1789_v42 = vmul.f32 %v1725_v28, %v3119_v32  ;;  %v1910_v44 = vmax.f32 %v1846_v34, 0.0  ;;  %v1911_v46 = vmax.f32 %v1847_v58, 0.0  ;;  %v1997_v47 = vld [vmem:[%s4652_s5 + $0x478] sm:$0xff] }
 0x258   : > { %v1912_v50 = vmax.f32 %v1848_v22, 0.0  ;;  %v1913_v57 = vmax.f32 %v1849_v38, 0.0  ;;  %v1914_v7 = vmax.f32 %v1850_v39, 0.0  ;;  %v1852_v53 = vadd.f32 %v1788_v40, %v3155_v4 }
 0x259   : > { %v1915_v59 = vmax.f32 %v1851_v19, 0.0  ;;  %v1853_v21 = vadd.f32 %v1789_v42, %v3155_v4  ;;  %1974 = vst [vmem:[%s4652_s5 + $0x3c0] sm:$0xff] %v1910_v44  ;;  %1975 = vst [vmem:[%s4652_s5 + $0x3c8] sm:$0xff] %v1911_v46  ;;  %v2046_v54 = vmul.f32 %v1982_v6, %v3119_v32  ;;  %v2047_v37 = vmul.f32 %v1983_v31, %v3119_v32  ;;  %v1998_v19 = vld [vmem:[%s4652_s5 + $0x480] sm:$0xff]  ;;  %v2000_v44 = vld [vmem:[%s4652_s5 + $0x490] sm:$0xff] }
 0x25a   : > { %1976 = vst [vmem:[%s4652_s5 + $0x3d0] sm:$0xff] %v1912_v50  ;;  %1977 = vst [vmem:[%s4652_s5 + $0x3d8] sm:$0xff] %v1913_v57  ;;  %v2048_v56 = vmul.f32 %v1984_v41, %v3119_v32  ;;  %v2049_v51 = vmul.f32 %v1985_v43, %v3119_v32  ;;  %v1916_v61 = vmax.f32 %v1852_v53, 0.0  ;;  %v2050_v62 = vmul.f32 %v1986_v48, %v3119_v32  ;;  %v1999_v43 = vld [vmem:[%s4652_s5 + $0x488] sm:$0xff]  ;;  %v2001_v46 = vld [vmem:[%s4652_s5 + $0x498] sm:$0xff] }
 0x25b   : > { %1978 = vst [vmem:[%s4652_s5 + $0x3e0] sm:$0xff] %v1914_v7  ;;  %1979 = vst [vmem:[%s4652_s5 + $0x3e8] sm:$0xff] %v1915_v59  ;;  %v1917_v0 = vmax.f32 %v1853_v21, 0.0  ;;  %v2051_v25 = vmul.f32 %v1987_v52, %v3119_v32  ;;  %v2110_v17 = vadd.f32 %v2046_v54, %v3155_v4  ;;  %v2111_v63 = vadd.f32 %v2047_v37, %v3155_v4  ;;  %v2002_v7 = vld [vmem:[%s4652_s5 + $0x4a0] sm:$0xff]  ;;  %v2003_v59 = vld [vmem:[%s4652_s5 + $0x4a8] sm:$0xff] }
 0x25c   : > { %v2112_v3 = vadd.f32 %v2048_v56, %v3155_v4  ;;  %v2113_v35 = vadd.f32 %v2049_v51, %v3155_v4  ;;  %1980 = vst [vmem:[%s4652_s5 + $0x3f0] sm:$0xff] %v1916_v61  ;;  %v2114_v8 = vadd.f32 %v2050_v62, %v3155_v4  ;;  %v2052_v45 = vmul.f32 %v1988_v60, %v3119_v32  ;;  %v2004_v61 = vld [vmem:[%s4652_s5 + $0x4b0] sm:$0xff] }
 0x25d   : > { %1981 = vst [vmem:[%s4652_s5 + $0x3f8] sm:$0xff] %v1917_v0  ;;  %v2115_v33 = vadd.f32 %v2051_v25, %v3155_v4  ;;  %v2053_v9 = vmul.f32 %v1989_v14, %v3119_v32  ;;  %v2174_v49 = vmax.f32 %v2110_v17, 0.0  ;;  %v2175_v15 = vmax.f32 %v2111_v63, 0.0  ;;  %v2005_v0 = vld [vmem:[%s4652_s5 + $0x4b8] sm:$0xff] }
 0x25e   : > { %v2176_v1 = vmax.f32 %v2112_v3, 0.0  ;;  %v2177_v18 = vmax.f32 %v2113_v35, 0.0  ;;  %v2178_v12 = vmax.f32 %v2114_v8, 0.0  ;;  %v2116_v23 = vadd.f32 %v2052_v45, %v3155_v4 }
 0x25f   : > { %v2179_v11 = vmax.f32 %v2115_v33, 0.0  ;;  %v2117_v24 = vadd.f32 %v2053_v9, %v3155_v4  ;;  %2238 = vst [vmem:[%s4652_s5 + $0x400] sm:$0xff] %v2174_v49  ;;  %2239 = vst [vmem:[%s4652_s5 + $0x408] sm:$0xff] %v2175_v15  ;;  %v2054_v26 = vmul.f32 %v1990_v5, %v3119_v32  ;;  %v2055_v27 = vmul.f32 %v1991_v10, %v3119_v32  ;;  %v2006_v33 = vld [vmem:[%s4652_s5 + $0x4c0] sm:$0xff]  ;;  %v2008_v49 = vld [vmem:[%s4652_s5 + $0x4d0] sm:$0xff] }
 0x260   : > { %2240 = vst [vmem:[%s4652_s5 + $0x410] sm:$0xff] %v2176_v1  ;;  %2241 = vst [vmem:[%s4652_s5 + $0x418] sm:$0xff] %v2177_v18  ;;  %v2056_v36 = vmul.f32 %v1992_v55, %v3119_v32  ;;  %v2057_v28 = vmul.f32 %v1993_v13, %v3119_v32  ;;  %v2180_v16 = vmax.f32 %v2116_v23, 0.0  ;;  %v2058_v34 = vmul.f32 %v1994_v2, %v3119_v32  ;;  %v2007_v13 = vld [vmem:[%s4652_s5 + $0x4c8] sm:$0xff]  ;;  %v2009_v15 = vld [vmem:[%s4652_s5 + $0x4d8] sm:$0xff] }
 0x261   : > { %2242 = vst [vmem:[%s4652_s5 + $0x420] sm:$0xff] %v2178_v12  ;;  %2243 = vst [vmem:[%s4652_s5 + $0x428] sm:$0xff] %v2179_v11  ;;  %v2181_v30 = vmax.f32 %v2117_v24, 0.0  ;;  %v2059_v58 = vmul.f32 %v1995_v20, %v3119_v32  ;;  %v2118_v22 = vadd.f32 %v2054_v26, %v3155_v4  ;;  %v2119_v38 = vadd.f32 %v2055_v27, %v3155_v4  ;;  %v2010_v12 = vld [vmem:[%s4652_s5 + $0x4e0] sm:$0xff]  ;;  %v2011_v11 = vld [vmem:[%s4652_s5 + $0x4e8] sm:$0xff] }
 0x262   : > { %v2120_v6 = vadd.f32 %v2056_v36, %v3155_v4  ;;  %v2121_v39 = vadd.f32 %v2057_v28, %v3155_v4  ;;  %2244 = vst [vmem:[%s4652_s5 + $0x430] sm:$0xff] %v2180_v16  ;;  %v2122_v40 = vadd.f32 %v2058_v34, %v3155_v4  ;;  %v2060_v31 = vmul.f32 %v1996_v29, %v3119_v32  ;;  %v2012_v16 = vld [vmem:[%s4652_s5 + $0x4f0] sm:$0xff] }
 0x263   : > { %2245 = vst [vmem:[%s4652_s5 + $0x438] sm:$0xff] %v2181_v30  ;;  %v2123_v42 = vadd.f32 %v2059_v58, %v3155_v4  ;;  %v2061_v41 = vmul.f32 %v1997_v47, %v3119_v32  ;;  %v2182_v50 = vmax.f32 %v2118_v22, 0.0  ;;  %v2183_v57 = vmax.f32 %v2119_v38, 0.0  ;;  %v2013_v30 = vld [vmem:[%s4652_s5 + $0x4f8] sm:$0xff] }
 0x264   : > { %v2184_v48 = vmax.f32 %v2120_v6, 0.0  ;;  %v2185_v52 = vmax.f32 %v2121_v39, 0.0  ;;  %v2186_v53 = vmax.f32 %v2122_v40, 0.0  ;;  %v2124_v54 = vadd.f32 %v2060_v31, %v3155_v4 }
 0x265   : > { %v2187_v21 = vmax.f32 %v2123_v42, 0.0  ;;  %v2125_v37 = vadd.f32 %v2061_v41, %v3155_v4  ;;  %2246 = vst [vmem:[%s4652_s5 + $0x440] sm:$0xff] %v2182_v50  ;;  %2247 = vst [vmem:[%s4652_s5 + $0x448] sm:$0xff] %v2183_v57  ;;  %v2062_v56 = vmul.f32 %v1998_v19, %v3119_v32  ;;  %v2063_v51 = vmul.f32 %v1999_v43, %v3119_v32  ;;  %v2014_v42 = vld [vmem:[%s4652_s5 + $0x500] sm:$0xff]  ;;  %v2016_v50 = vld [vmem:[%s4652_s5 + $0x510] sm:$0xff] }
 0x266   : > { %2248 = vst [vmem:[%s4652_s5 + $0x450] sm:$0xff] %v2184_v48  ;;  %2249 = vst [vmem:[%s4652_s5 + $0x458] sm:$0xff] %v2185_v52  ;;  %v2064_v60 = vmul.f32 %v2000_v44, %v3119_v32  ;;  %v2065_v14 = vmul.f32 %v2001_v46, %v3119_v32  ;;  %v2188_v62 = vmax.f32 %v2124_v54, 0.0  ;;  %v2066_v17 = vmul.f32 %v2002_v7, %v3119_v32  ;;  %v2015_v46 = vld [vmem:[%s4652_s5 + $0x508] sm:$0xff]  ;;  %v2017_v57 = vld [vmem:[%s4652_s5 + $0x518] sm:$0xff] }
 0x267   : > { %2250 = vst [vmem:[%s4652_s5 + $0x460] sm:$0xff] %v2186_v53  ;;  %2251 = vst [vmem:[%s4652_s5 + $0x468] sm:$0xff] %v2187_v21  ;;  %v2189_v25 = vmax.f32 %v2125_v37, 0.0  ;;  %v2067_v63 = vmul.f32 %v2003_v59, %v3119_v32  ;;  %v2126_v3 = vadd.f32 %v2062_v56, %v3155_v4  ;;  %v2127_v35 = vadd.f32 %v2063_v51, %v3155_v4  ;;  %v2018_v53 = vld [vmem:[%s4652_s5 + $0x520] sm:$0xff]  ;;  %v2019_v21 = vld [vmem:[%s4652_s5 + $0x528] sm:$0xff] }
 0x268   : > { %v2128_v5 = vadd.f32 %v2064_v60, %v3155_v4  ;;  %v2129_v8 = vadd.f32 %v2065_v14, %v3155_v4  ;;  %2252 = vst [vmem:[%s4652_s5 + $0x470] sm:$0xff] %v2188_v62  ;;  %v2130_v45 = vadd.f32 %v2066_v17, %v3155_v4  ;;  %v2068_v10 = vmul.f32 %v2004_v61, %v3119_v32  ;;  %v2020_v62 = vld [vmem:[%s4652_s5 + $0x530] sm:$0xff] }
 0x269   : > { %2253 = vst [vmem:[%s4652_s5 + $0x478] sm:$0xff] %v2189_v25  ;;  %v2131_v9 = vadd.f32 %v2067_v63, %v3155_v4  ;;  %v2069_v55 = vmul.f32 %v2005_v0, %v3119_v32  ;;  %v2190_v1 = vmax.f32 %v2126_v3, 0.0  ;;  %v2191_v18 = vmax.f32 %v2127_v35, 0.0  ;;  %v2021_v25 = vld [vmem:[%s4652_s5 + $0x538] sm:$0xff] }
 0x26a   : > { %v2192_v2 = vmax.f32 %v2128_v5, 0.0  ;;  %v2193_v20 = vmax.f32 %v2129_v8, 0.0  ;;  %v2194_v23 = vmax.f32 %v2130_v45, 0.0  ;;  %v2132_v26 = vadd.f32 %v2068_v10, %v3155_v4 }
 0x26b   : > { %v2195_v24 = vmax.f32 %v2131_v9, 0.0  ;;  %v2133_v27 = vadd.f32 %v2069_v55, %v3155_v4  ;;  %2254 = vst [vmem:[%s4652_s5 + $0x480] sm:$0xff] %v2190_v1  ;;  %2255 = vst [vmem:[%s4652_s5 + $0x488] sm:$0xff] %v2191_v18  ;;  %v2070_v36 = vmul.f32 %v2006_v33, %v3119_v32  ;;  %v2071_v28 = vmul.f32 %v2007_v13, %v3119_v32  ;;  %v2022_v9 = vld [vmem:[%s4652_s5 + $0x540] sm:$0xff]  ;;  %v2024_v1 = vld [vmem:[%s4652_s5 + $0x550] sm:$0xff] }
 0x26c   : > { %2256 = vst [vmem:[%s4652_s5 + $0x490] sm:$0xff] %v2192_v2  ;;  %2257 = vst [vmem:[%s4652_s5 + $0x498] sm:$0xff] %v2193_v20  ;;  %v2072_v29 = vmul.f32 %v2008_v49, %v3119_v32  ;;  %v2073_v47 = vmul.f32 %v2009_v15, %v3119_v32  ;;  %v2196_v34 = vmax.f32 %v2132_v26, 0.0  ;;  %v2074_v22 = vmul.f32 %v2010_v12, %v3119_v32  ;;  %v2023_v15 = vld [vmem:[%s4652_s5 + $0x548] sm:$0xff]  ;;  %v2025_v18 = vld [vmem:[%s4652_s5 + $0x558] sm:$0xff] }
 0x26d   : > { %2258 = vst [vmem:[%s4652_s5 + $0x4a0] sm:$0xff] %v2194_v23  ;;  %2259 = vst [vmem:[%s4652_s5 + $0x4a8] sm:$0xff] %v2195_v24  ;;  %v2197_v58 = vmax.f32 %v2133_v27, 0.0  ;;  %v2075_v38 = vmul.f32 %v2011_v11, %v3119_v32  ;;  %v2134_v6 = vadd.f32 %v2070_v36, %v3155_v4  ;;  %v2135_v39 = vadd.f32 %v2071_v28, %v3155_v4  ;;  %v2026_v23 = vld [vmem:[%s4652_s5 + $0x560] sm:$0xff]  ;;  %v2027_v24 = vld [vmem:[%s4652_s5 + $0x568] sm:$0xff] }
 0x26e   : > { %v2136_v19 = vadd.f32 %v2072_v29, %v3155_v4  ;;  %v2137_v40 = vadd.f32 %v2073_v47, %v3155_v4  ;;  %2260 = vst [vmem:[%s4652_s5 + $0x4b0] sm:$0xff] %v2196_v34  ;;  %v2138_v31 = vadd.f32 %v2074_v22, %v3155_v4  ;;  %v2076_v43 = vmul.f32 %v2012_v16, %v3119_v32  ;;  %v2028_v34 = vld [vmem:[%s4652_s5 + $0x570] sm:$0xff] }
 0x26f   : > { %2261 = vst [vmem:[%s4652_s5 + $0x4b8] sm:$0xff] %v2197_v58  ;;  %v2139_v41 = vadd.f32 %v2075_v38, %v3155_v4  ;;  %v2077_v44 = vmul.f32 %v2013_v30, %v3119_v32  ;;  %v2198_v48 = vmax.f32 %v2134_v6, 0.0  ;;  %v2199_v52 = vmax.f32 %v2135_v39, 0.0  ;;  %v2029_v58 = vld [vmem:[%s4652_s5 + $0x578] sm:$0xff] }
 0x270   : > { %v2200_v7 = vmax.f32 %v2136_v19, 0.0  ;;  %v2201_v59 = vmax.f32 %v2137_v40, 0.0  ;;  %v2202_v54 = vmax.f32 %v2138_v31, 0.0  ;;  %v2140_v56 = vadd.f32 %v2076_v43, %v3155_v4 }
 0x271   : > { %v2203_v37 = vmax.f32 %v2139_v41, 0.0  ;;  %v2141_v51 = vadd.f32 %v2077_v44, %v3155_v4  ;;  %2262 = vst [vmem:[%s4652_s5 + $0x4c0] sm:$0xff] %v2198_v48  ;;  %2263 = vst [vmem:[%s4652_s5 + $0x4c8] sm:$0xff] %v2199_v52  ;;  %v2078_v60 = vmul.f32 %v2014_v42, %v3119_v32  ;;  %v2079_v14 = vmul.f32 %v2015_v46, %v3119_v32  ;;  %v2030_v41 = vld [vmem:[%s4652_s5 + $0x580] sm:$0xff]  ;;  %v2032_v48 = vld [vmem:[%s4652_s5 + $0x590] sm:$0xff] }
 0x272   : > { %2264 = vst [vmem:[%s4652_s5 + $0x4d0] sm:$0xff] %v2200_v7  ;;  %2265 = vst [vmem:[%s4652_s5 + $0x4d8] sm:$0xff] %v2201_v59  ;;  %v2080_v61 = vmul.f32 %v2016_v50, %v3119_v32  ;;  %v2081_v0 = vmul.f32 %v2017_v57, %v3119_v32  ;;  %v2204_v17 = vmax.f32 %v2140_v56, 0.0  ;;  %v2082_v3 = vmul.f32 %v2018_v53, %v3119_v32  ;;  %v2031_v57 = vld [vmem:[%s4652_s5 + $0x588] sm:$0xff]  ;;  %v2033_v52 = vld [vmem:[%s4652_s5 + $0x598] sm:$0xff] }
 0x273   : > { %2266 = vst [vmem:[%s4652_s5 + $0x4e0] sm:$0xff] %v2202_v54  ;;  %2267 = vst [vmem:[%s4652_s5 + $0x4e8] sm:$0xff] %v2203_v37  ;;  %v2205_v63 = vmax.f32 %v2141_v51, 0.0  ;;  %v2083_v35 = vmul.f32 %v2019_v21, %v3119_v32  ;;  %v2142_v5 = vadd.f32 %v2078_v60, %v3155_v4  ;;  %v2143_v8 = vadd.f32 %v2079_v14, %v3155_v4  ;;  %v2034_v54 = vld [vmem:[%s4652_s5 + $0x5a0] sm:$0xff]  ;;  %v2035_v37 = vld [vmem:[%s4652_s5 + $0x5a8] sm:$0xff] }
 0x274   : > { %v2144_v33 = vadd.f32 %v2080_v61, %v3155_v4  ;;  %v2145_v45 = vadd.f32 %v2081_v0, %v3155_v4  ;;  %2268 = vst [vmem:[%s4652_s5 + $0x4f0] sm:$0xff] %v2204_v17  ;;  %v2146_v10 = vadd.f32 %v2082_v3, %v3155_v4  ;;  %v2084_v13 = vmul.f32 %v2020_v62, %v3119_v32  ;;  %v2036_v17 = vld [vmem:[%s4652_s5 + $0x5b0] sm:$0xff] }
 0x275   : > { %2269 = vst [vmem:[%s4652_s5 + $0x4f8] sm:$0xff] %v2205_v63  ;;  %v2147_v55 = vadd.f32 %v2083_v35, %v3155_v4  ;;  %v2085_v49 = vmul.f32 %v2021_v25, %v3119_v32  ;;  %v2206_v2 = vmax.f32 %v2142_v5, 0.0  ;;  %v2207_v20 = vmax.f32 %v2143_v8, 0.0  ;;  %v2037_v63 = vld [vmem:[%s4652_s5 + $0x5b8] sm:$0xff] }
 0x276   : > { %v2208_v12 = vmax.f32 %v2144_v33, 0.0  ;;  %v2209_v11 = vmax.f32 %v2145_v45, 0.0  ;;  %v2210_v26 = vmax.f32 %v2146_v10, 0.0  ;;  %v2148_v36 = vadd.f32 %v2084_v13, %v3155_v4 }
 0x277   : > { %v2211_v27 = vmax.f32 %v2147_v55, 0.0  ;;  %v2149_v28 = vadd.f32 %v2085_v49, %v3155_v4  ;;  %2270 = vst [vmem:[%s4652_s5 + $0x500] sm:$0xff] %v2206_v2  ;;  %2271 = vst [vmem:[%s4652_s5 + $0x508] sm:$0xff] %v2207_v20  ;;  %v2086_v29 = vmul.f32 %v2022_v9, %v3119_v32  ;;  %v2087_v47 = vmul.f32 %v2023_v15, %v3119_v32  ;;  %v2038_v55 = vld [vmem:[%s4652_s5 + $0x5c0] sm:$0xff]  ;;  %v2040_v2 = vld [vmem:[%s4652_s5 + $0x5d0] sm:$0xff] }
 0x278   : > { %2272 = vst [vmem:[%s4652_s5 + $0x510] sm:$0xff] %v2208_v12  ;;  %2273 = vst [vmem:[%s4652_s5 + $0x518] sm:$0xff] %v2209_v11  ;;  %v2088_v16 = vmul.f32 %v2024_v1, %v3119_v32  ;;  %v2089_v30 = vmul.f32 %v2025_v18, %v3119_v32  ;;  %v2212_v22 = vmax.f32 %v2148_v36, 0.0  ;;  %v2090_v6 = vmul.f32 %v2026_v23, %v3119_v32  ;;  %v2039_v18 = vld [vmem:[%s4652_s5 + $0x5c8] sm:$0xff]  ;;  %v2041_v20 = vld [vmem:[%s4652_s5 + $0x5d8] sm:$0xff] }
 0x279   : > { %2274 = vst [vmem:[%s4652_s5 + $0x520] sm:$0xff] %v2210_v26  ;;  %2275 = vst [vmem:[%s4652_s5 + $0x528] sm:$0xff] %v2211_v27  ;;  %v2213_v38 = vmax.f32 %v2149_v28, 0.0  ;;  %v2091_v39 = vmul.f32 %v2027_v24, %v3119_v32  ;;  %v2150_v19 = vadd.f32 %v2086_v29, %v3155_v4  ;;  %v2151_v40 = vadd.f32 %v2087_v47, %v3155_v4  ;;  %v2042_v26 = vld [vmem:[%s4652_s5 + $0x5e0] sm:$0xff]  ;;  %v2043_v27 = vld [vmem:[%s4652_s5 + $0x5e8] sm:$0xff] }
 0x27a   : > { %v2152_v42 = vadd.f32 %v2088_v16, %v3155_v4  ;;  %v2153_v31 = vadd.f32 %v2089_v30, %v3155_v4  ;;  %2276 = vst [vmem:[%s4652_s5 + $0x530] sm:$0xff] %v2212_v22  ;;  %v2154_v43 = vadd.f32 %v2090_v6, %v3155_v4  ;;  %v2092_v46 = vmul.f32 %v2028_v34, %v3119_v32  ;;  %v2044_v22 = vld [vmem:[%s4652_s5 + $0x5f0] sm:$0xff] }
 0x27b   : > { %2277 = vst [vmem:[%s4652_s5 + $0x538] sm:$0xff] %v2213_v38  ;;  %v2155_v44 = vadd.f32 %v2091_v39, %v3155_v4  ;;  %v2093_v50 = vmul.f32 %v2029_v58, %v3119_v32  ;;  %v2214_v7 = vmax.f32 %v2150_v19, 0.0  ;;  %v2215_v59 = vmax.f32 %v2151_v40, 0.0  ;;  %v2045_v38 = vld [vmem:[%s4652_s5 + $0x5f8] sm:$0xff] }
 0x27c   : > { %v2216_v53 = vmax.f32 %v2152_v42, 0.0  ;;  %v2217_v21 = vmax.f32 %v2153_v31, 0.0  ;;  %v2218_v56 = vmax.f32 %v2154_v43, 0.0  ;;  %v2156_v60 = vadd.f32 %v2092_v46, %v3155_v4 }
 0x27d   : > { %v2219_v51 = vmax.f32 %v2155_v44, 0.0  ;;  %v2157_v14 = vadd.f32 %v2093_v50, %v3155_v4  ;;  %2278 = vst [vmem:[%s4652_s5 + $0x540] sm:$0xff] %v2214_v7  ;;  %2279 = vst [vmem:[%s4652_s5 + $0x548] sm:$0xff] %v2215_v59  ;;  %v2094_v61 = vmul.f32 %v2030_v41, %v3119_v32  ;;  %v2095_v0 = vmul.f32 %v2031_v57, %v3119_v32 }
 0x27e   : > { %2280 = vst [vmem:[%s4652_s5 + $0x550] sm:$0xff] %v2216_v53  ;;  %2281 = vst [vmem:[%s4652_s5 + $0x558] sm:$0xff] %v2217_v21  ;;  %v2096_v62 = vmul.f32 %v2032_v48, %v3119_v32  ;;  %v2097_v25 = vmul.f32 %v2033_v52, %v3119_v32  ;;  %v2220_v3 = vmax.f32 %v2156_v60, 0.0  ;;  %v2098_v5 = vmul.f32 %v2034_v54, %v3119_v32 }
 0x27f   : > { %2282 = vst [vmem:[%s4652_s5 + $0x560] sm:$0xff] %v2218_v56  ;;  %2283 = vst [vmem:[%s4652_s5 + $0x568] sm:$0xff] %v2219_v51  ;;  %v2221_v35 = vmax.f32 %v2157_v14, 0.0  ;;  %v2099_v8 = vmul.f32 %v2035_v37, %v3119_v32  ;;  %v2158_v33 = vadd.f32 %v2094_v61, %v3155_v4  ;;  %v2159_v45 = vadd.f32 %v2095_v0, %v3155_v4 }
 0x280   : > { %v2160_v9 = vadd.f32 %v2096_v62, %v3155_v4  ;;  %v2161_v10 = vadd.f32 %v2097_v25, %v3155_v4  ;;  %2284 = vst [vmem:[%s4652_s5 + $0x570] sm:$0xff] %v2220_v3  ;;  %v2162_v13 = vadd.f32 %v2098_v5, %v3155_v4  ;;  %v2100_v15 = vmul.f32 %v2036_v17, %v3119_v32 }
 0x281   : > { %2285 = vst [vmem:[%s4652_s5 + $0x578] sm:$0xff] %v2221_v35  ;;  %v2163_v49 = vadd.f32 %v2099_v8, %v3155_v4  ;;  %v2101_v1 = vmul.f32 %v2037_v63, %v3119_v32  ;;  %v2222_v12 = vmax.f32 %v2158_v33, 0.0  ;;  %v2223_v11 = vmax.f32 %v2159_v45, 0.0 }
 0x282   : > { %v2224_v23 = vmax.f32 %v2160_v9, 0.0  ;;  %v2225_v24 = vmax.f32 %v2161_v10, 0.0  ;;  %v2226_v36 = vmax.f32 %v2162_v13, 0.0  ;;  %v2164_v29 = vadd.f32 %v2100_v15, %v3155_v4 }
 0x283   : > { %v2227_v28 = vmax.f32 %v2163_v49, 0.0  ;;  %v2165_v47 = vadd.f32 %v2101_v1, %v3155_v4  ;;  %2286 = vst [vmem:[%s4652_s5 + $0x580] sm:$0xff] %v2222_v12  ;;  %2287 = vst [vmem:[%s4652_s5 + $0x588] sm:$0xff] %v2223_v11  ;;  %v2102_v16 = vmul.f32 %v2038_v55, %v3119_v32  ;;  %v2103_v30 = vmul.f32 %v2039_v18, %v3119_v32 }
 0x284   : > { %2288 = vst [vmem:[%s4652_s5 + $0x590] sm:$0xff] %v2224_v23  ;;  %2289 = vst [vmem:[%s4652_s5 + $0x598] sm:$0xff] %v2225_v24  ;;  %v2104_v34 = vmul.f32 %v2040_v2, %v3119_v32  ;;  %v2105_v58 = vmul.f32 %v2041_v20, %v3119_v32  ;;  %v2228_v6 = vmax.f32 %v2164_v29, 0.0  ;;  %v2106_v19 = vmul.f32 %v2042_v26, %v3119_v32 }
 0x285   : > { %2290 = vst [vmem:[%s4652_s5 + $0x5a0] sm:$0xff] %v2226_v36  ;;  %2291 = vst [vmem:[%s4652_s5 + $0x5a8] sm:$0xff] %v2227_v28  ;;  %v2229_v39 = vmax.f32 %v2165_v47, 0.0  ;;  %v2107_v40 = vmul.f32 %v2043_v27, %v3119_v32  ;;  %v2166_v42 = vadd.f32 %v2102_v16, %v3155_v4  ;;  %v2167_v31 = vadd.f32 %v2103_v30, %v3155_v4 }
 0x286   : > { %v2168_v41 = vadd.f32 %v2104_v34, %v3155_v4  ;;  %v2169_v43 = vadd.f32 %v2105_v58, %v3155_v4  ;;  %2292 = vst [vmem:[%s4652_s5 + $0x5b0] sm:$0xff] %v2228_v6  ;;  %v2170_v44 = vadd.f32 %v2106_v19, %v3155_v4  ;;  %v2108_v50 = vmul.f32 %v2044_v22, %v3119_v32 }
 0x287   : > { %2293 = vst [vmem:[%s4652_s5 + $0x5b8] sm:$0xff] %v2229_v39  ;;  %v2171_v46 = vadd.f32 %v2107_v40, %v3155_v4  ;;  %v2109_v57 = vmul.f32 %v2045_v38, %v3119_v32  ;;  %v2230_v48 = vmax.f32 %v2166_v42, 0.0  ;;  %v2231_v52 = vmax.f32 %v2167_v31, 0.0 }
 0x288   : > { %v2232_v7 = vmax.f32 %v2168_v41, 0.0  ;;  %v2233_v59 = vmax.f32 %v2169_v43, 0.0  ;;  %v2234_v53 = vmax.f32 %v2170_v44, 0.0  ;;  %v2172_v54 = vadd.f32 %v2108_v50, %v3155_v4 }
 0x289   : > { %v2235_v21 = vmax.f32 %v2171_v46, 0.0  ;;  %v2173_v37 = vadd.f32 %v2109_v57, %v3155_v4  ;;  %2294 = vst [vmem:[%s4652_s5 + $0x5c0] sm:$0xff] %v2230_v48  ;;  %2295 = vst [vmem:[%s4652_s5 + $0x5c8] sm:$0xff] %v2231_v52 }
 0x28a   : > { %2296 = vst [vmem:[%s4652_s5 + $0x5d0] sm:$0xff] %v2232_v7  ;;  %2297 = vst [vmem:[%s4652_s5 + $0x5d8] sm:$0xff] %v2233_v59  ;;  %v2236_v32 = vmax.f32 %v2172_v54, 0.0 }
 0x28b   : > { %2298 = vst [vmem:[%s4652_s5 + $0x5e0] sm:$0xff] %v2234_v53  ;;  %2299 = vst [vmem:[%s4652_s5 + $0x5e8] sm:$0xff] %v2235_v21  ;;  %v2237_v4 = vmax.f32 %v2173_v37, 0.0 }
 0x28c   : > { %2300 = vst [vmem:[%s4652_s5 + $0x5f0] sm:$0xff] %v2236_v32 }
 0x28d   : > { %2301 = vst [vmem:[%s4652_s5 + $0x5f8] sm:$0xff] %v2237_v4 }
 0x28e PF: > { %s15_s18 = sadd.s32 1, %s2592_s18  }
 0x28f   : > { %p12_p6 = scmp.ge.s32.totalorder %s15_s18, 5  }
 0x291   :  { %14 = sbr.rel (!%p12_p6) target bundleno = 1 (0x1), region = 75 }

// kernel: unet_up3_forward.5
= control target key start
LH: loop header
LB: loop body
LE: loop exit
PB: predicated region body
PF: predicated region fallthrough
CT: control target
= control target key end

     0   :  { %s2460_s18 = smov 0   ;;  %s4437_s0 = inlined_call_operand.vmem [shape: bf16[1536,72], index: 0, kind: input, shape index: {}]   ;;  %s4438_s1 = inlined_call_operand.vmem [shape: bf16[72,128], index: 1, kind: input, shape index: {}]   ;;  %s4439_s2 = inlined_call_operand.vmem [shape: f32[1,128], index: 2, kind: input, shape index: {}]   ;;  %s4440_s3 = inlined_call_operand.vmem [shape: f32[1,128], index: 3, kind: input, shape index: {}]   ;;  %s4441_s4 = inlined_call_operand.vmem [shape: f32[1,128], index: 4, kind: input, shape index: {}]   ;;  %s4442_s5 = inlined_call_operand.vmem [shape: f32[1536,128], index: 5, kind: output, shape index: {}]  }
   0x1 LB: > { %s2466_s19 = sadd.s32 4294967295, %s2427_s18   ;;  %p2172_p0 = scmp.ge.s32.totalorder %s2427_s18, 1  ;;  %s2427_s18 = sphi %s2460_s18, %s15_s18  }
   0x2   : > { %p183_p1 = scmp.lt.s32.totalorder %s2427_s18, 4 }
   0x4   : > { %p184_p2 = pnand %p2172_p0, %p183_p1 }
   0x5   : > { %s2173_s20 = sshll.u32 (!%p184_p2), %s2466_s19, 6  ;;  %p2175_p4 = scmp.ne.s32.totalorder (!%p184_p2), %s2466_s19, 0 }
   0x6   : > { %187 = sbr.rel (%p184_p2) target bundleno = 579 (0x243), region = 40  ;;  %p207_p3 = scmp.lt.s32.totalorder (!%p184_p2), %s2173_s20, 191 }
   0xd   : > { %s4444_s20 = smov (!%p207_p3, %s2173_s20), 191  ;;  %216 = sbr.rel (%p2175_p4) target bundleno = 20 (0x14), region = 44 }
   0xe   : > { %s2174_s21 = sshll.u32 %s4444_s20, 2  ;;  %v2429_v0 = vmov (!%p2175_p4), 0.0  }
   0xf   : > { %s2474_s24 = scalar_lea.vmem %s4437_s0, %s2174_s21  ;;  %217 = vst [vmem:[#allocation2] sm:$0x1] (!%p2175_p4), %v2429_v0  ;;  %218 = vst [vmem:[#allocation3] sm:$0x1] (!%p2175_p4), %v2429_v0 }
  0x14 PF: > { %v2382_v1 = vld [vmem:[%s4438_s1] sm:$0xff]   ;;  %v2383_v2 = vld [vmem:[%s4438_s1 + $0x8] sm:$0xff]   ;;  %v2384_v3 = vld [vmem:[%s4438_s1 + $0x10] sm:$0xff]   ;;  %vm486_vm0 = vcmask 588800   ;;  %vm583_vm1 = vcmask 1043456   ;;  %s2246_s10 = sshll.u32 %s2466_s19, 9 }
  0x15   : > { %2287 = vmatprep.subr.bf16.mxu0 %v2382_v1  ;;  %2361 = vmatprep.subr.bf16.mxu1 %v2382_v1  ;;  %v2387_v4 = vld [vmem:[%s2474_s24] sm:$0xff]   ;;  %v2385_v5 = vld [vmem:[%s4438_s1 + $0x18] sm:$0xff]   ;;  %v2388_v8 = vld [vmem:[%s2474_s24 + $0x8] sm:$0xff]   ;;  %s2565_s15 = scalar_lea.vmem %s4442_s5, %s2246_s10  ;;  %p2247_p5 = scmp.ne.s32.totalorder %s2466_s19, 2 }
  0x16   : > { %2288 = vmatpush3.bf16.msra.mxu0 %v2382_v1  ;;  %2366 = vmatpush3.bf16.msra.mxu1 %v2382_v1  ;;  %v2386_v6 = vld [vmem:[%s4438_s1 + $0x20] ss:$0 sps:$4 sm:$0xff]   ;;  %v2389_v9 = vld [vmem:[%s2474_s24 + $0x10] sm:$0xff]   ;;  %v2404_v11 = vld [vmem:[%s2474_s24 + $0x88] sm:$0xff]  }
  0x17   : > { %2289 = vmatprep.subr.bf16.mxu0 %v2383_v2  ;;  %2362 = vmatprep.subr.bf16.mxu1 %v2383_v2  ;;  %v585_v7 = vsel %vm583_vm1, %v2386_v6, 0  ;;  %v2403_v10 = vld [vmem:[%s2474_s24 + $0x80] sm:$0xff]   ;;  %v2405_v12 = vld [vmem:[%s2474_s24 + $0x90] sm:$0xff]   ;;  %v2390_v13 = vld [vmem:[%s2474_s24 + $0x18] sm:$0xff]  }
  0x18   : > { %2297 = vmatprep.mubr.msk.bf16.mxu0 %vm486_vm0, %v2387_v4  ;;  %2329 = vmatprep.mubr.msk.bf16.mxu1 %vm486_vm0, %v2403_v10  ;;  %v2391_v14 = vld [vmem:[%s2474_s24 + $0x20] sm:$0xff]   ;;  %v2406_v15 = vld [vmem:[%s2474_s24 + $0x98] sm:$0xff]   ;;  %v2392_v17 = vld [vmem:[%s2474_s24 + $0x28] sm:$0xff]  }
  0x19   : > { %v2407_v16 = vld [vmem:[%s2474_s24 + $0xa0] sm:$0xff]   ;;  %v2393_v18 = vld [vmem:[%s2474_s24 + $0x30] sm:$0xff]   ;;  %v2408_v19 = vld [vmem:[%s2474_s24 + $0xa8] sm:$0xff]  }
  0x1a   : > { %2290 = vmatpush3.bf16.msra.mxu0 %v2383_v2  ;;  %2367 = vmatpush3.bf16.msra.mxu1 %v2383_v2  ;;  %v2409_v20 = vld [vmem:[%s2474_s24 + $0xb0] sm:$0xff]   ;;  %v2394_v21 = vld [vmem:[%s2474_s24 + $0x38] sm:$0xff]   ;;  %v2395_v22 = vld [vmem:[%s2474_s24 + $0x40] sm:$0xff]  }
  0x1b   : > { %2291 = vmatprep.subr.bf16.mxu0 %v2384_v3  ;;  %2363 = vmatprep.subr.bf16.mxu1 %v2384_v3  ;;  %v2410_v23 = vld [vmem:[%s2474_s24 + $0xb8] sm:$0xff]   ;;  %v2411_v24 = vld [vmem:[%s2474_s24 + $0xc0] sm:$0xff]   ;;  %v2396_v25 = vld [vmem:[%s2474_s24 + $0x48] sm:$0xff]  }
  0x1c   : > { %v2397_v26 = vld [vmem:[%s2474_s24 + $0x50] sm:$0xff]   ;;  %v2412_v27 = vld [vmem:[%s2474_s24 + $0xc8] sm:$0xff]   ;;  %v2398_v29 = vld [vmem:[%s2474_s24 + $0x58] sm:$0xff]  }
  0x1d   : > { %v2413_v28 = vld [vmem:[%s2474_s24 + $0xd0] sm:$0xff]   ;;  %v2399_v30 = vld [vmem:[%s2474_s24 + $0x60] sm:$0xff]   ;;  %v2414_v31 = vld [vmem:[%s2474_s24 + $0xd8] sm:$0xff]  }
  0x1e   : > { %2292 = vmatpush3.bf16.msra.mxu0 %v2384_v3  ;;  %2368 = vmatpush3.bf16.msra.mxu1 %v2384_v3  ;;  %v2415_v32 = vld [vmem:[%s2474_s24 + $0xe0] sm:$0xff]   ;;  %v2400_v33 = vld [vmem:[%s2474_s24 + $0x68] sm:$0xff]   ;;  %v2401_v34 = vld [vmem:[%s2474_s24 + $0x70] sm:$0xff]  }
  0x1f   : > { %2293 = vmatprep.subr.bf16.mxu0 %v2385_v5  ;;  %2364 = vmatprep.subr.bf16.mxu1 %v2385_v5  ;;  %v2416_v35 = vld [vmem:[%s2474_s24 + $0xe8] sm:$0xff]   ;;  %v2417_v36 = vld [vmem:[%s2474_s24 + $0xf0] sm:$0xff]   ;;  %v2402_v37 = vld [vmem:[%s2474_s24 + $0x78] sm:$0xff]  }
  0x20   : > { %v2418_v38 = vld [vmem:[%s2474_s24 + $0xf8] sm:$0xff]   ;;  %v2560_v39 = vld [vmem:[%s4439_s2] ss:$0 sm:$0xff] }
  0x22   : > { %2294 = vmatpush3.bf16.msra.mxu0 %v2385_v5  ;;  %2369 = vmatpush3.bf16.msra.mxu1 %v2385_v5 }
  0x23   : > { %2371 = vmatprep.subr.msk.bf16.mxu0 %vm583_vm1, %v2386_v6  ;;  %2372 = vmatprep.subr.msk.bf16.mxu1 %vm583_vm1, %v2386_v6 }
  0x26   : > { %2296 = vmatpush3.bf16.msra.mxu0 %v585_v7  ;;  %2370 = vmatpush3.bf16.msra.mxu1 %v585_v7 }
  0x29   : > { %2298 = vmatmul.mubr.msk.bf16.vlgmr.msra.gmra.mrb[0].mxu0 %vm486_vm0, %v2388_v8  ;;  %2330 = vmatmul.mubr.msk.bf16.vlgmr.msra.gmra.mrb[0].mxu1 %vm486_vm0, %v2404_v11 }
  0x2a   : > { %2301 = vmatprep.mubr.msk.bf16.mxu0 %vm486_vm0, %v2389_v9  ;;  %2333 = vmatprep.mubr.msk.bf16.mxu1 %vm486_vm0, %v2405_v12 }
  0x31   : > { %2302 = vmatmul.mubr.msk.bf16.gmra.mrb[4].mxu0 %vm486_vm0, %v2390_v13  ;;  %2334 = vmatmul.mubr.msk.bf16.gmra.mrb[4].mxu1 %vm486_vm0, %v2406_v15 }
  0x32   : > { %2305 = vmatprep.mubr.msk.bf16.mxu0 %vm486_vm0, %v2391_v14  ;;  %2337 = vmatprep.mubr.msk.bf16.mxu1 %vm486_vm0, %v2407_v16 }
  0x39   : > { %2306 = vmatmul.mubr.msk.bf16.gmra.mrb[8].mxu0 %vm486_vm0, %v2392_v17  ;;  %2338 = vmatmul.mubr.msk.bf16.gmra.mrb[8].mxu1 %vm486_vm0, %v2408_v19 }
  0x3a   : > { %2309 = vmatprep.mubr.msk.bf16.mxu0 %vm486_vm0, %v2393_v18  ;;  %2341 = vmatprep.mubr.msk.bf16.mxu1 %vm486_vm0, %v2409_v20 }
  0x41   : > { %2310 = vmatmul.mubr.msk.bf16.gmra.mrb[12].mxu0 %vm486_vm0, %v2394_v21  ;;  %2342 = vmatmul.mubr.msk.bf16.gmra.mrb[12].mxu1 %vm486_vm0, %v2410_v23 }
  0x42   : > { %2313 = vmatprep.mubr.msk.bf16.mxu0 %vm486_vm0, %v2395_v22  ;;  %2345 = vmatprep.mubr.msk.bf16.mxu1 %vm486_vm0, %v2411_v24 }
  0x49   : > { %2314 = vmatmul.mubr.msk.bf16.gmra.mrb[16].mxu0 %vm486_vm0, %v2396_v25  ;;  %2346 = vmatmul.mubr.msk.bf16.gmra.mrb[16].mxu1 %vm486_vm0, %v2412_v27 }
  0x4a   : > { %2317 = vmatprep.mubr.msk.bf16.mxu0 %vm486_vm0, %v2397_v26  ;;  %2349 = vmatprep.mubr.msk.bf16.mxu1 %vm486_vm0, %v2413_v28 }
  0x51   : > { %2318 = vmatmul.mubr.msk.bf16.gmra.mrb[20].mxu0 %vm486_vm0, %v2398_v29  ;;  %2350 = vmatmul.mubr.msk.bf16.gmra.mrb[20].mxu1 %vm486_vm0, %v2414_v31 }
  0x52   : > { %2321 = vmatprep.mubr.msk.bf16.mxu0 %vm486_vm0, %v2399_v30  ;;  %2353 = vmatprep.mubr.msk.bf16.mxu1 %vm486_vm0, %v2415_v32 }
  0x59   : > { %2322 = vmatmul.mubr.msk.bf16.gmra.mrb[24].mxu0 %vm486_vm0, %v2400_v33  ;;  %2354 = vmatmul.mubr.msk.bf16.gmra.mrb[24].mxu1 %vm486_vm0, %v2416_v35 }
  0x5a   : > { %2325 = vmatprep.mubr.msk.bf16.mxu0 %vm486_vm0, %v2401_v34  ;;  %2357 = vmatprep.mubr.msk.bf16.mxu1 %vm486_vm0, %v2417_v36 }
  0x61   : > { %2326 = vmatmul.mubr.msk.bf16.gmra.mrb[28].mxu0 %vm486_vm0, %v2402_v37  ;;  %2358 = vmatmul.mubr.msk.bf16.gmra.mrb[28].mxu1 %vm486_vm0, %v2418_v38 }
  0xfc   : > { %v2299_v40 = vpop.f32.mrb[0].mxu0  ;;  %v2331_v45 = vpop.f32.mrb[0].mxu1 }
  0xfd   : > { %v630_v41 = vadd.f32 %v2299_v40, %v2560_v39  ;;  %v621_v42 = vpop.f32.mrb[1].mxu0  ;;  %v2572_v48 = vadd.f32 %v2331_v45, %v2560_v39  ;;  %v749_v49 = vpop.f32.mrb[1].mxu1 }
  0xfe   : > { %v622_v43 = vadd.f32 %v2560_v39, %v621_v42  ;;  %v2300_v44 = vpop.f32.mrb[2].mxu0  ;;  %v2577_v51 = vadd.f32 %v2560_v39, %v749_v49  ;;  %v2332_v52 = vpop.f32.mrb[2].mxu1 }
  0xff   : > { %1088 = vst [vmem:[%s2565_s15 + $0x10] sm:$0xff] %v630_v41  ;;  %v633_v46 = vadd.f32 %v2300_v44, %v2560_v39  ;;  %v624_v47 = vpop.f32.mrb[3].mxu0  ;;  %1120 = vst [vmem:[%s2565_s15 + $0x110] sm:$0xff] %v2572_v48  ;;  %v2583_v53 = vadd.f32 %v2332_v52, %v2560_v39  ;;  %v752_v54 = vpop.f32.mrb[3].mxu1  ;;  %v951_v59 = vmul.f32 %v630_v41, %v630_v41 }
 0x100   : > { %1086 = vst [vmem:[%s2565_s15] sm:$0xff] %v622_v43  ;;  %v625_v50 = vadd.f32 %v2560_v39, %v624_v47  ;;  %v949_v55 = vmul.f32 %v622_v43, %v622_v43  ;;  %1118 = vst [vmem:[%s2565_s15 + $0x100] sm:$0xff] %v2577_v51  ;;  %v2589_v58 = vadd.f32 %v2560_v39, %v752_v54 }
 0x101   : > { %1089 = vst [vmem:[%s2565_s15 + $0x18] sm:$0xff] %v633_v46  ;;  %1121 = vst [vmem:[%s2565_s15 + $0x118] sm:$0xff] %v2583_v53  ;;  %v952_v1 = vmul.f32 %v633_v46, %v633_v46 }
 0x102   : > { %v877_v56 = vadd.f32 %v625_v50, %v622_v43  ;;  %v950_v57 = vmul.f32 %v625_v50, %v625_v50  ;;  %1087 = vst [vmem:[%s2565_s15 + $0x8] sm:$0xff] %v625_v50  ;;  %1119 = vst [vmem:[%s2565_s15 + $0x108] sm:$0xff] %v2589_v58 }
 0x104   : > { %v878_v60 = vadd.f32 %v877_v56, %v630_v41  ;;  %v1013_v61 = vadd.f32 %v950_v57, %v949_v55  ;;  %v2303_v62 = vpop.f32.mrb[4].mxu0  ;;  %v2335_v6 = vpop.f32.mrb[4].mxu1 }
 0x105   : > { %v646_v63 = vadd.f32 %v2303_v62, %v2560_v39  ;;  %v637_v0 = vpop.f32.mrb[5].mxu0  ;;  %v2600_v9 = vadd.f32 %v2335_v6, %v2560_v39  ;;  %v765_v10 = vpop.f32.mrb[5].mxu1 }
 0x106   : > { %v1014_v2 = vadd.f32 %v1013_v61, %v951_v59  ;;  %v638_v3 = vadd.f32 %v2560_v39, %v637_v0  ;;  %v879_v4 = vadd.f32 %v878_v60, %v633_v46  ;;  %v2304_v5 = vpop.f32.mrb[6].mxu0  ;;  %v2336_v15 = vpop.f32.mrb[6].mxu1  ;;  %v2608_v16 = vadd.f32 %v2560_v39, %v765_v10 }
 0x107   : > { %1092 = vst [vmem:[%s2565_s15 + $0x30] sm:$0xff] %v646_v63  ;;  %v649_v7 = vadd.f32 %v2304_v5, %v2560_v39  ;;  %v640_v8 = vpop.f32.mrb[7].mxu0  ;;  %1124 = vst [vmem:[%s2565_s15 + $0x130] sm:$0xff] %v2600_v9  ;;  %v2611_v17 = vadd.f32 %v2336_v15, %v2560_v39  ;;  %v768_v18 = vpop.f32.mrb[7].mxu1  ;;  %v955_v23 = vmul.f32 %v646_v63, %v646_v63 }
 0x108   : > { %v880_v11 = vadd.f32 %v879_v4, %v638_v3  ;;  %v953_v12 = vmul.f32 %v638_v3, %v638_v3  ;;  %v1015_v13 = vadd.f32 %v1014_v2, %v952_v1  ;;  %1090 = vst [vmem:[%s2565_s15 + $0x20] sm:$0xff] %v638_v3  ;;  %v641_v14 = vadd.f32 %v2560_v39, %v640_v8 }
 0x109   : > { %1093 = vst [vmem:[%s2565_s15 + $0x38] sm:$0xff] %v649_v7  ;;  %v2615_v22 = vadd.f32 %v2560_v39, %v768_v18  ;;  %1122 = vst [vmem:[%s2565_s15 + $0x120] sm:$0xff] %v2608_v16  ;;  %v956_v29 = vmul.f32 %v649_v7, %v649_v7 }
 0x10a   : > { %v1016_v19 = vadd.f32 %v1015_v13, %v953_v12  ;;  %v881_v20 = vadd.f32 %v880_v11, %v641_v14  ;;  %v954_v21 = vmul.f32 %v641_v14, %v641_v14  ;;  %1091 = vst [vmem:[%s2565_s15 + $0x28] sm:$0xff] %v641_v14  ;;  %1125 = vst [vmem:[%s2565_s15 + $0x138] sm:$0xff] %v2611_v17 }
 0x10b   : > { %1123 = vst [vmem:[%s2565_s15 + $0x128] sm:$0xff] %v2615_v22 }
 0x10c   : > { %v882_v24 = vadd.f32 %v881_v20, %v646_v63  ;;  %v1017_v25 = vadd.f32 %v1016_v19, %v954_v21  ;;  %v2307_v26 = vpop.f32.mrb[8].mxu0  ;;  %v2339_v34 = vpop.f32.mrb[8].mxu1 }
 0x10d   : > { %v662_v27 = vadd.f32 %v2307_v26, %v2560_v39  ;;  %v653_v28 = vpop.f32.mrb[9].mxu0  ;;  %v2628_v37 = vadd.f32 %v2339_v34, %v2560_v39  ;;  %v781_v38 = vpop.f32.mrb[9].mxu1 }
 0x10e   : > { %v1018_v30 = vadd.f32 %v1017_v25, %v955_v23  ;;  %v654_v31 = vadd.f32 %v2560_v39, %v653_v28  ;;  %v883_v32 = vadd.f32 %v882_v24, %v649_v7  ;;  %v2308_v33 = vpop.f32.mrb[10].mxu0  ;;  %v2340_v44 = vpop.f32.mrb[10].mxu1  ;;  %v2636_v45 = vadd.f32 %v2560_v39, %v781_v38 }
 0x10f   : > { %1096 = vst [vmem:[%s2565_s15 + $0x50] sm:$0xff] %v662_v27  ;;  %v665_v35 = vadd.f32 %v2308_v33, %v2560_v39  ;;  %v656_v36 = vpop.f32.mrb[11].mxu0  ;;  %1128 = vst [vmem:[%s2565_s15 + $0x150] sm:$0xff] %v2628_v37  ;;  %v2639_v46 = vadd.f32 %v2340_v44, %v2560_v39  ;;  %v784_v47 = vpop.f32.mrb[11].mxu1  ;;  %v959_v55 = vmul.f32 %v662_v27, %v662_v27 }
 0x110   : > { %v884_v40 = vadd.f32 %v883_v32, %v654_v31  ;;  %v957_v41 = vmul.f32 %v654_v31, %v654_v31  ;;  %v1019_v42 = vadd.f32 %v1018_v30, %v956_v29  ;;  %1094 = vst [vmem:[%s2565_s15 + $0x40] sm:$0xff] %v654_v31  ;;  %v657_v43 = vadd.f32 %v2560_v39, %v656_v36 }
 0x111   : > { %1097 = vst [vmem:[%s2565_s15 + $0x58] sm:$0xff] %v665_v35  ;;  %v2643_v54 = vadd.f32 %v2560_v39, %v784_v47  ;;  %1126 = vst [vmem:[%s2565_s15 + $0x140] sm:$0xff] %v2636_v45  ;;  %v960_v62 = vmul.f32 %v665_v35, %v665_v35 }
 0x112   : > { %v1020_v49 = vadd.f32 %v1019_v42, %v957_v41  ;;  %v885_v50 = vadd.f32 %v884_v40, %v657_v43  ;;  %v958_v52 = vmul.f32 %v657_v43, %v657_v43  ;;  %1095 = vst [vmem:[%s2565_s15 + $0x48] sm:$0xff] %v657_v43  ;;  %1129 = vst [vmem:[%s2565_s15 + $0x158] sm:$0xff] %v2639_v46 }
 0x113   : > { %1127 = vst [vmem:[%s2565_s15 + $0x148] sm:$0xff] %v2643_v54 }
 0x114   : > { %v886_v56 = vadd.f32 %v885_v50, %v662_v27  ;;  %v1021_v57 = vadd.f32 %v1020_v49, %v958_v52  ;;  %v2311_v59 = vpop.f32.mrb[12].mxu0  ;;  %v2343_v3 = vpop.f32.mrb[12].mxu1 }
 0x115   : > { %v678_v60 = vadd.f32 %v2311_v59, %v2560_v39  ;;  %v669_v61 = vpop.f32.mrb[13].mxu0  ;;  %v2656_v6 = vadd.f32 %v2343_v3, %v2560_v39  ;;  %v797_v7 = vpop.f32.mrb[13].mxu1 }
 0x116   : > { %v1022_v63 = vadd.f32 %v1021_v57, %v959_v55  ;;  %v670_v0 = vadd.f32 %v2560_v39, %v669_v61  ;;  %v887_v1 = vadd.f32 %v886_v56, %v665_v35  ;;  %v2312_v2 = vpop.f32.mrb[14].mxu0  ;;  %v2344_v13 = vpop.f32.mrb[14].mxu1  ;;  %v2664_v14 = vadd.f32 %v2560_v39, %v797_v7 }
 0x117   : > { %1100 = vst [vmem:[%s2565_s15 + $0x70] sm:$0xff] %v678_v60  ;;  %v681_v4 = vadd.f32 %v2312_v2, %v2560_v39  ;;  %v672_v5 = vpop.f32.mrb[15].mxu0  ;;  %1132 = vst [vmem:[%s2565_s15 + $0x170] sm:$0xff] %v2656_v6  ;;  %v2667_v15 = vadd.f32 %v2344_v13, %v2560_v39  ;;  %v800_v18 = vpop.f32.mrb[15].mxu1  ;;  %v963_v24 = vmul.f32 %v678_v60, %v678_v60 }
 0x118   : > { %v888_v8 = vadd.f32 %v887_v1, %v670_v0  ;;  %v961_v10 = vmul.f32 %v670_v0, %v670_v0  ;;  %v1023_v11 = vadd.f32 %v1022_v63, %v960_v62  ;;  %1098 = vst [vmem:[%s2565_s15 + $0x60] sm:$0xff] %v670_v0  ;;  %v673_v12 = vadd.f32 %v2560_v39, %v672_v5 }
 0x119   : > { %1101 = vst [vmem:[%s2565_s15 + $0x78] sm:$0xff] %v681_v4  ;;  %v2671_v23 = vadd.f32 %v2560_v39, %v800_v18  ;;  %1130 = vst [vmem:[%s2565_s15 + $0x160] sm:$0xff] %v2664_v14  ;;  %v964_v30 = vmul.f32 %v681_v4, %v681_v4 }
 0x11a   : > { %v1024_v19 = vadd.f32 %v1023_v11, %v961_v10  ;;  %v889_v20 = vadd.f32 %v888_v8, %v673_v12  ;;  %v962_v21 = vmul.f32 %v673_v12, %v673_v12  ;;  %1099 = vst [vmem:[%s2565_s15 + $0x68] sm:$0xff] %v673_v12  ;;  %1133 = vst [vmem:[%s2565_s15 + $0x178] sm:$0xff] %v2667_v15 }
 0x11b   : > { %1131 = vst [vmem:[%s2565_s15 + $0x168] sm:$0xff] %v2671_v23 }
 0x11c   : > { %v890_v25 = vadd.f32 %v889_v20, %v678_v60  ;;  %v1025_v26 = vadd.f32 %v1024_v19, %v962_v21  ;;  %v2315_v27 = vpop.f32.mrb[16].mxu0  ;;  %v2347_v35 = vpop.f32.mrb[16].mxu1 }
 0x11d   : > { %v694_v28 = vadd.f32 %v2315_v27, %v2560_v39  ;;  %v685_v29 = vpop.f32.mrb[17].mxu0  ;;  %v2684_v40 = vadd.f32 %v2347_v35, %v2560_v39  ;;  %v813_v41 = vpop.f32.mrb[17].mxu1 }
 0x11e   : > { %v1026_v31 = vadd.f32 %v1025_v26, %v963_v24  ;;  %v686_v32 = vadd.f32 %v2560_v39, %v685_v29  ;;  %v891_v33 = vadd.f32 %v890_v25, %v681_v4  ;;  %v2316_v34 = vpop.f32.mrb[18].mxu0  ;;  %v2348_v49 = vpop.f32.mrb[18].mxu1  ;;  %v2692_v50 = vadd.f32 %v2560_v39, %v813_v41 }
 0x11f   : > { %1104 = vst [vmem:[%s2565_s15 + $0x90] sm:$0xff] %v694_v28  ;;  %v697_v36 = vadd.f32 %v2316_v34, %v2560_v39  ;;  %v688_v38 = vpop.f32.mrb[19].mxu0  ;;  %1136 = vst [vmem:[%s2565_s15 + $0x190] sm:$0xff] %v2684_v40  ;;  %v2695_v52 = vadd.f32 %v2348_v49, %v2560_v39  ;;  %v816_v55 = vpop.f32.mrb[19].mxu1  ;;  %v967_v61 = vmul.f32 %v694_v28, %v694_v28 }
 0x120   : > { %v892_v42 = vadd.f32 %v891_v33, %v686_v32  ;;  %v965_v43 = vmul.f32 %v686_v32, %v686_v32  ;;  %v1027_v44 = vadd.f32 %v1026_v31, %v964_v30  ;;  %1102 = vst [vmem:[%s2565_s15 + $0x80] sm:$0xff] %v686_v32  ;;  %v689_v47 = vadd.f32 %v2560_v39, %v688_v38 }
 0x121   : > { %1105 = vst [vmem:[%s2565_s15 + $0x98] sm:$0xff] %v697_v36  ;;  %v2699_v60 = vadd.f32 %v2560_v39, %v816_v55  ;;  %1134 = vst [vmem:[%s2565_s15 + $0x180] sm:$0xff] %v2692_v50  ;;  %v968_v3 = vmul.f32 %v697_v36, %v697_v36 }
 0x122   : > { %v1028_v56 = vadd.f32 %v1027_v44, %v965_v43  ;;  %v893_v57 = vadd.f32 %v892_v42, %v689_v47  ;;  %v966_v59 = vmul.f32 %v689_v47, %v689_v47  ;;  %1103 = vst [vmem:[%s2565_s15 + $0x88] sm:$0xff] %v689_v47  ;;  %1137 = vst [vmem:[%s2565_s15 + $0x198] sm:$0xff] %v2695_v52 }
 0x123   : > { %1135 = vst [vmem:[%s2565_s15 + $0x188] sm:$0xff] %v2699_v60 }
 0x124   : > { %v894_v62 = vadd.f32 %v893_v57, %v694_v28  ;;  %v1029_v63 = vadd.f32 %v1028_v56, %v966_v59  ;;  %v2319_v0 = vpop.f32.mrb[20].mxu0  ;;  %v2351_v10 = vpop.f32.mrb[20].mxu1 }
 0x125   : > { %v710_v1 = vadd.f32 %v2319_v0, %v2560_v39  ;;  %v701_v2 = vpop.f32.mrb[21].mxu0  ;;  %v2712_v13 = vadd.f32 %v2351_v10, %v2560_v39  ;;  %v829_v18 = vpop.f32.mrb[21].mxu1 }
 0x126   : > { %v1030_v4 = vadd.f32 %v1029_v63, %v967_v61  ;;  %v702_v5 = vadd.f32 %v2560_v39, %v701_v2  ;;  %v895_v7 = vadd.f32 %v894_v62, %v697_v36  ;;  %v2320_v8 = vpop.f32.mrb[22].mxu0  ;;  %v2352_v25 = vpop.f32.mrb[22].mxu1  ;;  %v2720_v26 = vadd.f32 %v2560_v39, %v829_v18 }
 0x127   : > { %1108 = vst [vmem:[%s2565_s15 + $0xb0] sm:$0xff] %v710_v1  ;;  %v713_v11 = vadd.f32 %v2320_v8, %v2560_v39  ;;  %v704_v12 = vpop.f32.mrb[23].mxu0  ;;  %1140 = vst [vmem:[%s2565_s15 + $0x1b0] sm:$0xff] %v2712_v13  ;;  %v2723_v27 = vadd.f32 %v2352_v25, %v2560_v39  ;;  %v832_v28 = vpop.f32.mrb[23].mxu1  ;;  %v971_v33 = vmul.f32 %v710_v1, %v710_v1 }
 0x128   : > { %v896_v19 = vadd.f32 %v895_v7, %v702_v5  ;;  %v969_v20 = vmul.f32 %v702_v5, %v702_v5  ;;  %v1031_v21 = vadd.f32 %v1030_v4, %v968_v3  ;;  %1106 = vst [vmem:[%s2565_s15 + $0xa0] sm:$0xff] %v702_v5  ;;  %v705_v24 = vadd.f32 %v2560_v39, %v704_v12 }
 0x129   : > { %1109 = vst [vmem:[%s2565_s15 + $0xb8] sm:$0xff] %v713_v11  ;;  %v2727_v32 = vadd.f32 %v2560_v39, %v832_v28  ;;  %1138 = vst [vmem:[%s2565_s15 + $0x1a0] sm:$0xff] %v2720_v26  ;;  %v972_v42 = vmul.f32 %v713_v11, %v713_v11 }
 0x12a   : > { %v1032_v29 = vadd.f32 %v1031_v21, %v969_v20  ;;  %v897_v30 = vadd.f32 %v896_v19, %v705_v24  ;;  %v970_v31 = vmul.f32 %v705_v24, %v705_v24  ;;  %1107 = vst [vmem:[%s2565_s15 + $0xa8] sm:$0xff] %v705_v24  ;;  %1141 = vst [vmem:[%s2565_s15 + $0x1b8] sm:$0xff] %v2723_v27 }
 0x12b   : > { %1139 = vst [vmem:[%s2565_s15 + $0x1a8] sm:$0xff] %v2727_v32 }
 0x12c   : > { %v898_v34 = vadd.f32 %v897_v30, %v710_v1  ;;  %v1033_v35 = vadd.f32 %v1032_v29, %v970_v31  ;;  %v2323_v36 = vpop.f32.mrb[24].mxu0  ;;  %v2355_v55 = vpop.f32.mrb[24].mxu1 }
 0x12d   : > { %v726_v38 = vadd.f32 %v2323_v36, %v2560_v39  ;;  %v717_v41 = vpop.f32.mrb[25].mxu0  ;;  %v2740_v59 = vadd.f32 %v2355_v55, %v2560_v39  ;;  %v845_v61 = vpop.f32.mrb[25].mxu1 }
 0x12e   : > { %v1034_v43 = vadd.f32 %v1033_v35, %v971_v33  ;;  %v718_v44 = vadd.f32 %v2560_v39, %v717_v41  ;;  %v899_v47 = vadd.f32 %v898_v34, %v713_v11  ;;  %v2324_v49 = vpop.f32.mrb[26].mxu0  ;;  %v2356_v2 = vpop.f32.mrb[26].mxu1  ;;  %v2748_v3 = vadd.f32 %v2560_v39, %v845_v61 }
 0x12f   : > { %1112 = vst [vmem:[%s2565_s15 + $0xd0] sm:$0xff] %v726_v38  ;;  %v729_v56 = vadd.f32 %v2324_v49, %v2560_v39  ;;  %v720_v57 = vpop.f32.mrb[27].mxu0  ;;  %1144 = vst [vmem:[%s2565_s15 + $0x1d0] sm:$0xff] %v2740_v59  ;;  %v2751_v4 = vadd.f32 %v2356_v2, %v2560_v39  ;;  %v848_v5 = vpop.f32.mrb[27].mxu1  ;;  %v975_v12 = vmul.f32 %v726_v38, %v726_v38 }
 0x130   : > { %v900_v62 = vadd.f32 %v899_v47, %v718_v44  ;;  %v973_v63 = vmul.f32 %v718_v44, %v718_v44  ;;  %v1035_v0 = vadd.f32 %v1034_v43, %v972_v42  ;;  %1110 = vst [vmem:[%s2565_s15 + $0xc0] sm:$0xff] %v718_v44  ;;  %v721_v1 = vadd.f32 %v2560_v39, %v720_v57 }
 0x131   : > { %1113 = vst [vmem:[%s2565_s15 + $0xd8] sm:$0xff] %v729_v56  ;;  %v2755_v11 = vadd.f32 %v2560_v39, %v848_v5  ;;  %1142 = vst [vmem:[%s2565_s15 + $0x1c0] sm:$0xff] %v2748_v3  ;;  %v976_v25 = vmul.f32 %v729_v56, %v729_v56 }
 0x132   : > { %v1036_v7 = vadd.f32 %v1035_v0, %v973_v63  ;;  %v901_v8 = vadd.f32 %v900_v62, %v721_v1  ;;  %v974_v10 = vmul.f32 %v721_v1, %v721_v1  ;;  %1111 = vst [vmem:[%s2565_s15 + $0xc8] sm:$0xff] %v721_v1  ;;  %1145 = vst [vmem:[%s2565_s15 + $0x1d8] sm:$0xff] %v2751_v4 }
 0x133   : > { %1143 = vst [vmem:[%s2565_s15 + $0x1c8] sm:$0xff] %v2755_v11 }
 0x134   : > { %v902_v18 = vadd.f32 %v901_v8, %v726_v38  ;;  %v1037_v19 = vadd.f32 %v1036_v7, %v974_v10  ;;  %v2327_v20 = vpop.f32.mrb[28].mxu0  ;;  %v2359_v33 = vpop.f32.mrb[28].mxu1  ;;  %v981_v10 = vmul.f32 %v2577_v51, %v2577_v51 }
 0x135   : > { %v742_v21 = vadd.f32 %v2327_v20, %v2560_v39  ;;  %v733_v24 = vpop.f32.mrb[29].mxu0  ;;  %v2768_v36 = vadd.f32 %v2359_v33, %v2560_v39  ;;  %v861_v38 = vpop.f32.mrb[29].mxu1  ;;  %v982_v20 = vmul.f32 %v2589_v58, %v2589_v58 }
 0x136   : > { %v1038_v28 = vadd.f32 %v1037_v19, %v975_v12  ;;  %v734_v29 = vadd.f32 %v2560_v39, %v733_v24  ;;  %v903_v30 = vadd.f32 %v902_v18, %v729_v56  ;;  %v2328_v31 = vpop.f32.mrb[30].mxu0  ;;  %v2360_v47 = vpop.f32.mrb[30].mxu1  ;;  %v2776_v49 = vadd.f32 %v2560_v39, %v861_v38 }
 0x137   : > { %1116 = vst [vmem:[%s2565_s15 + $0xf0] sm:$0xff] %v742_v21  ;;  %v745_v34 = vadd.f32 %v2328_v31, %v2560_v39  ;;  %v736_v35 = vpop.f32.mrb[31].mxu0  ;;  %1148 = vst [vmem:[%s2565_s15 + $0x1f0] sm:$0xff] %v2768_v36  ;;  %v2779_v55 = vadd.f32 %v2360_v47, %v2560_v39  ;;  %v864_v56 = vpop.f32.mrb[31].mxu1  ;;  %v979_v0 = vmul.f32 %v742_v21, %v742_v21 }
 0x138   : > { %v904_v41 = vadd.f32 %v903_v30, %v734_v29  ;;  %v977_v42 = vmul.f32 %v734_v29, %v734_v29  ;;  %v1039_v43 = vadd.f32 %v1038_v28, %v976_v25  ;;  %1114 = vst [vmem:[%s2565_s15 + $0xe0] sm:$0xff] %v734_v29  ;;  %v737_v44 = vadd.f32 %v2560_v39, %v736_v35 }
 0x139   : > { %1117 = vst [vmem:[%s2565_s15 + $0xf8] sm:$0xff] %v745_v34  ;;  %v2783_v63 = vadd.f32 %v2560_v39, %v864_v56  ;;  %1146 = vst [vmem:[%s2565_s15 + $0x1e0] sm:$0xff] %v2776_v49  ;;  %v980_v5 = vmul.f32 %v745_v34, %v745_v34  ;;  %v984_v28 = vmul.f32 %v2583_v53, %v2583_v53 }
 0x13a   : > { %v1040_v57 = vadd.f32 %v1039_v43, %v977_v42  ;;  %v905_v61 = vadd.f32 %v904_v41, %v737_v44  ;;  %v978_v62 = vmul.f32 %v737_v44, %v737_v44  ;;  %1115 = vst [vmem:[%s2565_s15 + $0xe8] sm:$0xff] %v737_v44  ;;  %1149 = vst [vmem:[%s2565_s15 + $0x1f8] sm:$0xff] %v2779_v55 }
 0x13b   : > { %1147 = vst [vmem:[%s2565_s15 + $0x1e8] sm:$0xff] %v2783_v63  ;;  %v986_v35 = vmul.f32 %v2615_v22, %v2615_v22 }
 0x13c   : > { %v906_v1 = vadd.f32 %v905_v61, %v742_v21  ;;  %v1041_v2 = vadd.f32 %v1040_v57, %v978_v62  ;;  %v983_v21 = vmul.f32 %v2572_v48, %v2572_v48  ;;  %v990_v57 = vmul.f32 %v2643_v54, %v2643_v54 }
 0x13e   : > { %v1042_v7 = vadd.f32 %v1041_v2, %v979_v0  ;;  %v907_v8 = vadd.f32 %v906_v1, %v745_v34 }
 0x140   : > { %v908_v12 = vadd.f32 %v907_v8, %v2577_v51  ;;  %v1043_v18 = vadd.f32 %v1042_v7, %v980_v5  ;;  %v985_v51 = vmul.f32 %v2608_v16, %v2608_v16  ;;  %v994_v8 = vmul.f32 %v2671_v23, %v2671_v23 }
 0x142   : > { %v1044_v39 = vadd.f32 %v1043_v18, %v981_v10  ;;  %v909_v19 = vadd.f32 %v908_v12, %v2589_v58 }
 0x144   : > { %v910_v24 = vadd.f32 %v909_v19, %v2572_v48  ;;  %v1045_v25 = vadd.f32 %v1044_v39, %v982_v20  ;;  %v987_v48 = vmul.f32 %v2600_v9, %v2600_v9 }
 0x146   : > { %v1046_v29 = vadd.f32 %v1045_v25, %v983_v21  ;;  %v911_v30 = vadd.f32 %v910_v24, %v2583_v53  ;;  %v988_v53 = vmul.f32 %v2611_v17, %v2611_v17  ;;  %v998_v24 = vmul.f32 %v2699_v60, %v2699_v60 }
 0x148   : > { %v912_v31 = vadd.f32 %v911_v30, %v2608_v16  ;;  %v1047_v33 = vadd.f32 %v1046_v29, %v984_v28  ;;  %v989_v16 = vmul.f32 %v2636_v45, %v2636_v45 }
 0x14a   : > { %v1048_v34 = vadd.f32 %v1047_v33, %v985_v51  ;;  %v913_v58 = vadd.f32 %v912_v31, %v2615_v22 }
 0x14c   : > { %v914_v38 = vadd.f32 %v913_v58, %v2600_v9  ;;  %v1049_v41 = vadd.f32 %v1048_v34, %v986_v35  ;;  %v991_v9 = vmul.f32 %v2628_v37, %v2628_v37  ;;  %v1002_v34 = vmul.f32 %v2727_v32, %v2727_v32 }
 0x14e   : > { %v1050_v42 = vadd.f32 %v1049_v41, %v987_v48  ;;  %v915_v43 = vadd.f32 %v914_v38, %v2611_v17  ;;  %v992_v17 = vmul.f32 %v2639_v46, %v2639_v46 }
 0x150   : > { %v916_v44 = vadd.f32 %v915_v43, %v2636_v45  ;;  %v1051_v47 = vadd.f32 %v1050_v42, %v988_v53  ;;  %v993_v45 = vmul.f32 %v2664_v14, %v2664_v14  ;;  %v1006_v43 = vmul.f32 %v2755_v11, %v2755_v11 }
 0x152   : > { %v1052_v56 = vadd.f32 %v1051_v47, %v989_v16  ;;  %v917_v22 = vadd.f32 %v916_v44, %v2643_v54 }
 0x154   : > { %v918_v61 = vadd.f32 %v917_v22, %v2628_v37  ;;  %v1053_v62 = vadd.f32 %v1052_v56, %v990_v57  ;;  %v995_v37 = vmul.f32 %v2656_v6, %v2656_v6 }
 0x156   : > { %v1054_v0 = vadd.f32 %v1053_v62, %v991_v9  ;;  %v919_v1 = vadd.f32 %v918_v61, %v2639_v46  ;;  %v996_v46 = vmul.f32 %v2667_v15, %v2667_v15  ;;  %v1010_v61 = vmul.f32 %v2783_v63, %v2783_v63 }
 0x158   : > { %v920_v2 = vadd.f32 %v919_v1, %v2664_v14  ;;  %v1055_v5 = vadd.f32 %v1054_v0, %v992_v17  ;;  %v997_v14 = vmul.f32 %v2692_v50, %v2692_v50 }
 0x15a   : > { %v1056_v7 = vadd.f32 %v1055_v5, %v993_v45  ;;  %v921_v54 = vadd.f32 %v920_v2, %v2671_v23 }
 0x15c   : > { %v922_v10 = vadd.f32 %v921_v54, %v2656_v6  ;;  %v1057_v12 = vadd.f32 %v1056_v7, %v994_v8  ;;  %v999_v6 = vmul.f32 %v2684_v40, %v2684_v40 }
 0x15e   : > { %v1058_v18 = vadd.f32 %v1057_v12, %v995_v37  ;;  %v923_v39 = vadd.f32 %v922_v10, %v2667_v15  ;;  %v1000_v15 = vmul.f32 %v2695_v52, %v2695_v52  ;;  %v876_v12 = vld [vmem:[#allocation2] sm:$0x1] }
 0x160   : > { %v924_v19 = vadd.f32 %v923_v39, %v2692_v50  ;;  %v1059_v20 = vadd.f32 %v1058_v18, %v996_v46  ;;  %v1001_v50 = vmul.f32 %v2720_v26, %v2720_v26  ;;  %v948_v18 = vld [vmem:[#allocation3] sm:$0x1] }
 0x162   : > { %v1060_v21 = vadd.f32 %v1059_v20, %v997_v14  ;;  %v925_v23 = vadd.f32 %v924_v19, %v2699_v60 }
 0x164   : > { %v926_v25 = vadd.f32 %v925_v23, %v2684_v40  ;;  %v1061_v28 = vadd.f32 %v1060_v21, %v998_v24  ;;  %v1003_v40 = vmul.f32 %v2712_v13, %v2712_v13 }
 0x166   : > { %v1062_v29 = vadd.f32 %v1061_v28, %v999_v6  ;;  %v927_v30 = vadd.f32 %v926_v25, %v2695_v52  ;;  %v1004_v52 = vmul.f32 %v2723_v27, %v2723_v27  ;;  %v1232_v28 = vlaneseq (!%p2247_p5) }
 0x168   : > { %v928_v51 = vadd.f32 %v927_v30, %v2720_v26  ;;  %v1063_v31 = vadd.f32 %v1062_v29, %v1000_v15  ;;  %v1005_v26 = vmul.f32 %v2748_v3, %v2748_v3  ;;  %v1233_v15 = vshrl.u32 (!%p2247_p5), %v1232_v28, 7  ;;  %v1160_v29 = vld [vmem:[%s4440_s3] sm:$0x1] (!%p2247_p5) }
 0x16a   : > { %v1064_v33 = vadd.f32 %v1063_v31, %v1001_v50  ;;  %v929_v60 = vadd.f32 %v928_v51, %v2727_v32  ;;  %v1234_v30 = vsub.s32 (!%p2247_p5), 0, %v1233_v15  ;;  %v1164_v31 = vld [vmem:[%s4441_s4] sm:$0x1] (!%p2247_p5) }
 0x16c   : > { %v930_v58 = vadd.f32 %v929_v60, %v2712_v13  ;;  %v1065_v35 = vadd.f32 %v1064_v33, %v1002_v34  ;;  %v1007_v13 = vmul.f32 %v2740_v59, %v2740_v59  ;;  %v1167_v33 = vld [vmem:[%s4442_s5] sm:$0xff] (!%p2247_p5)  ;;  %v1168_v60 = vld [vmem:[%s4442_s5 + $0x8] sm:$0xff] (!%p2247_p5)  ;;  %v1169_v34 = vld [vmem:[%s4442_s5 + $0x10] sm:$0xff] (!%p2247_p5) }
 0x16e   : > { %v1066_v48 = vadd.f32 %v1065_v35, %v1003_v40  ;;  %v931_v38 = vadd.f32 %v930_v58, %v2723_v27  ;;  %v1008_v27 = vmul.f32 %v2751_v4, %v2751_v4  ;;  %v1170_v40 = vld [vmem:[%s4442_s5 + $0x18] sm:$0xff] (!%p2247_p5)  ;;  %v1171_v58 = vld [vmem:[%s4442_s5 + $0x20] sm:$0xff] (!%p2247_p5) }
 0x170   : > { %v932_v41 = vadd.f32 %v931_v38, %v2748_v3  ;;  %v1067_v53 = vadd.f32 %v1066_v48, %v1004_v52  ;;  %v1009_v3 = vmul.f32 %v2776_v49, %v2776_v49  ;;  %v1172_v48 = vld [vmem:[%s4442_s5 + $0x28] sm:$0xff] (!%p2247_p5)  ;;  %v1173_v38 = vld [vmem:[%s4442_s5 + $0x30] sm:$0xff] (!%p2247_p5) }
 0x172   : > { %v1068_v42 = vadd.f32 %v1067_v53, %v1005_v26  ;;  %v933_v32 = vadd.f32 %v932_v41, %v2755_v11  ;;  %v1174_v26 = vld [vmem:[%s4442_s5 + $0x38] sm:$0xff] (!%p2247_p5)  ;;  %v1175_v41 = vld [vmem:[%s4442_s5 + $0x40] sm:$0xff] (!%p2247_p5)  ;;  %v1176_v53 = vld [vmem:[%s4442_s5 + $0x48] sm:$0xff] (!%p2247_p5) }
 0x174   : > { %v934_v16 = vadd.f32 %v933_v32, %v2740_v59  ;;  %v1069_v44 = vadd.f32 %v1068_v42, %v1006_v43  ;;  %v1011_v59 = vmul.f32 %v2768_v36, %v2768_v36  ;;  %v1177_v42 = vld [vmem:[%s4442_s5 + $0x50] sm:$0xff] (!%p2247_p5) }
 0x176   : > { %v1070_v47 = vadd.f32 %v1069_v44, %v1007_v13  ;;  %v935_v56 = vadd.f32 %v934_v16, %v2751_v4  ;;  %v1012_v4 = vmul.f32 %v2779_v55, %v2779_v55  ;;  %v1178_v44 = vld [vmem:[%s4442_s5 + $0x58] sm:$0xff] (!%p2247_p5) }
 0x178   : > { %v936_v22 = vadd.f32 %v935_v56, %v2776_v49  ;;  %v1071_v57 = vadd.f32 %v1070_v47, %v1008_v27  ;;  %v1179_v27 = vld [vmem:[%s4442_s5 + $0x60] sm:$0xff] (!%p2247_p5)  ;;  %v1180_v47 = vld [vmem:[%s4442_s5 + $0x68] sm:$0xff] (!%p2247_p5) }
 0x17a   : > { %v1072_v9 = vadd.f32 %v1071_v57, %v1009_v3  ;;  %v937_v11 = vadd.f32 %v936_v22, %v2783_v63 }
 0x17c   : > { %v938_v62 = vadd.f32 %v937_v11, %v2768_v36  ;;  %v1073_v17 = vadd.f32 %v1072_v9, %v1010_v61 }
 0x17e   : > { %v939_v0 = vadd.f32 %v938_v62, %v2779_v55  ;;  %v1074_v1 = vadd.f32 %v1073_v17, %v1011_v59 }
 0x180   : > { %v940_v49 = vrot.slane %v939_v0, 4  ;;  %v1075_v45 = vadd.f32 %v1074_v1, %v1012_v4 }
 0x182   : > { %v941_v2 = vadd.f32 %v940_v49, %v939_v0  ;;  %v1076_v5 = vrot.slane %v1075_v45, 4 }
 0x184   : > { %v942_v7 = vrot.slane %v941_v2, 2  ;;  %v1077_v54 = vadd.f32 %v1076_v5, %v1075_v45 }
 0x186   : > { %v943_v8 = vadd.f32 %v942_v7, %v941_v2  ;;  %v1078_v63 = vrot.slane %v1077_v54, 2 }
 0x188   : > { %v944_v37 = vrot.slane %v943_v8, 1  ;;  %v1079_v10 = vadd.f32 %v1078_v63, %v1077_v54 }
 0x18a   : > { %v945_v46 = vadd.f32 %v944_v37, %v943_v8  ;;  %v1080_v36 = vrot.slane %v1079_v10, 1  ;;  %1153 = sbr.rel (%p2247_p5) target bundleno = 579 (0x243), region = 48 }
 0x18c   : > { %v946_v39 = vadd.f32 %v945_v46, %v876_v12  ;;  %v1081_v14 = vadd.f32 %v1080_v36, %v1079_v10  ;;  %v1181_v46 = vld [vmem:[%s4442_s5 + $0x70] sm:$0xff] (!%p2247_p5)  ;;  %v1182_v36 = vld [vmem:[%s4442_s5 + $0x78] sm:$0xff] (!%p2247_p5) }
 0x18e   : > { %947 = vst [vmem:[#allocation2] sm:$0x1] %v946_v39  ;;  %v1082_v19 = vadd.f32 %v1081_v14, %v948_v18 }
 0x190   : > { %1083 = vst [vmem:[#allocation3] sm:$0x1] %v1082_v19 }
 0x195   : > { %v1154_v55 = vld [vmem:[#allocation2] sm:$0x1] }
 0x196   : > { %v1155_v21 = vmul.f32 0.0006510417, %v1154_v55 }
 0x197   : > { %v1156_v20 = vld [vmem:[#allocation3] sm:$0x1] }
 0x198   : > { %v1157_v23 = vmul.f32 0.0006510417, %v1156_v20  ;;  %v1158_v24 = vmul.f32 %v1155_v21, %v1155_v21 }
 0x19a   : > { %v1159_v6 = vsub.f32 %v1157_v23, %v1158_v24  ;;  %v1183_v24 = vld [vmem:[%s4442_s5 + $0x80] sm:$0xff] }
 0x19c   : > { %v1161_v25 = vadd.f32 1e-05, %v1159_v6 }
 0x19e   : > { %2419 = vrsqrt.f32 %v1161_v25 }
 0x1a8   : > { %v2420_v50 = vpop.eup %2419 }
 0x1a9   : > { %v1163_v51 = vmul.f32 %v2420_v50, %v1160_v29  ;;  %v1184_v29 = vld [vmem:[%s4442_s5 + $0x88] sm:$0xff]  ;;  %v1186_v50 = vld [vmem:[%s4442_s5 + $0x98] sm:$0xff] }
 0x1ab   : > { %v1165_v35 = vmul.f32 %v1163_v51, %v1155_v21  ;;  %v2909_v52 = vrot.slane %v1163_v51, %v1234_v30 }
 0x1ad   : > { %v1166_v32 = vsub.f32 %v1164_v31, %v1165_v35  ;;  %v1237_v43 = vmul.f32 %v2909_v52, %v1167_v33  ;;  %v1238_v13 = vmul.f32 %v2909_v52, %v1168_v60  ;;  %v1239_v16 = vmul.f32 %v2909_v52, %v1169_v34  ;;  %v1187_v34 = vld [vmem:[%s4442_s5 + $0xa0] sm:$0xff] }
 0x1ae   : > { %v1240_v56 = vmul.f32 %v2909_v52, %v1170_v40  ;;  %v1241_v3 = vmul.f32 %v2909_v52, %v1171_v58  ;;  %v1242_v22 = vmul.f32 %v2909_v52, %v1172_v48  ;;  %v1243_v57 = vmul.f32 %v2909_v52, %v1173_v38  ;;  %v1188_v40 = vld [vmem:[%s4442_s5 + $0xa8] sm:$0xff] }
 0x1af   : > { %v2945_v9 = vrot.slane %v1166_v32, %v1234_v30  ;;  %v1244_v11 = vmul.f32 %v2909_v52, %v1174_v26  ;;  %v1245_v61 = vmul.f32 %v2909_v52, %v1175_v41  ;;  %v1246_v59 = vmul.f32 %v2909_v52, %v1176_v53  ;;  %v1185_v30 = vld [vmem:[%s4442_s5 + $0x90] sm:$0xff] }
 0x1b0   : > { %v1247_v62 = vmul.f32 %v2909_v52, %v1177_v42  ;;  %v1248_v17 = vmul.f32 %v2909_v52, %v1178_v44  ;;  %v1249_v4 = vmul.f32 %v2909_v52, %v1179_v27  ;;  %v1250_v0 = vmul.f32 %v2909_v52, %v1180_v47  ;;  %v1189_v32 = vld [vmem:[%s4442_s5 + $0xb0] sm:$0xff] }
 0x1b1   : > { %v1307_v1 = vadd.f32 %v2945_v9, %v1237_v43  ;;  %v1308_v49 = vadd.f32 %v2945_v9, %v1238_v13  ;;  %v1309_v45 = vadd.f32 %v2945_v9, %v1239_v16  ;;  %v1310_v2 = vadd.f32 %v2945_v9, %v1240_v56  ;;  %v1190_v43 = vld [vmem:[%s4442_s5 + $0xb8] sm:$0xff] }
 0x1b2   : > { %v1311_v5 = vadd.f32 %v2945_v9, %v1241_v3  ;;  %v1312_v7 = vadd.f32 %v2945_v9, %v1242_v22  ;;  %v1313_v54 = vadd.f32 %v2945_v9, %v1243_v57  ;;  %v1314_v8 = vadd.f32 %v2945_v9, %v1244_v11  ;;  %v1191_v57 = vld [vmem:[%s4442_s5 + $0xc0] sm:$0xff] }
 0x1b3   : > { %v1371_v63 = vmax.f32 %v1307_v1, 0.0  ;;  %v1372_v37 = vmax.f32 %v1308_v49, 0.0  ;;  %v1373_v10 = vmax.f32 %v1309_v45, 0.0  ;;  %v1374_v12 = vmax.f32 %v1310_v2, 0.0 }
 0x1b4   : > { %v1375_v18 = vmax.f32 %v1311_v5, 0.0  ;;  %v1376_v39 = vmax.f32 %v1312_v7, 0.0  ;;  %v1377_v14 = vmax.f32 %v1313_v54, 0.0  ;;  %v1378_v19 = vmax.f32 %v1314_v8, 0.0  ;;  %v1195_v5 = vld [vmem:[%s4442_s5 + $0xe0] sm:$0xff]  ;;  %v1196_v7 = vld [vmem:[%s4442_s5 + $0xe8] sm:$0xff] }
 0x1b5   : > { %1435 = vst [vmem:[%s4442_s5] sm:$0xff] %v1371_v63  ;;  %1436 = vst [vmem:[%s4442_s5 + $0x8] sm:$0xff] %v1372_v37  ;;  %v1315_v55 = vadd.f32 %v2945_v9, %v1245_v61  ;;  %v1316_v20 = vadd.f32 %v2945_v9, %v1246_v59  ;;  %v1317_v21 = vadd.f32 %v2945_v9, %v1247_v62 }
 0x1b6   : > { %1437 = vst [vmem:[%s4442_s5 + $0x10] sm:$0xff] %v1373_v10  ;;  %1438 = vst [vmem:[%s4442_s5 + $0x18] sm:$0xff] %v1374_v12  ;;  %v1318_v23 = vadd.f32 %v2945_v9, %v1248_v17  ;;  %v1319_v6 = vadd.f32 %v2945_v9, %v1249_v4  ;;  %v1320_v25 = vadd.f32 %v2945_v9, %v1250_v0  ;;  %v1192_v17 = vld [vmem:[%s4442_s5 + $0xc8] sm:$0xff]  ;;  %v1193_v4 = vld [vmem:[%s4442_s5 + $0xd0] sm:$0xff] }
 0x1b7   : > { %1439 = vst [vmem:[%s4442_s5 + $0x20] sm:$0xff] %v1375_v18  ;;  %1440 = vst [vmem:[%s4442_s5 + $0x28] sm:$0xff] %v1376_v39  ;;  %v1251_v28 = vmul.f32 %v2909_v52, %v1181_v46  ;;  %v1252_v15 = vmul.f32 %v2909_v52, %v1182_v36  ;;  %v1379_v51 = vmax.f32 %v1315_v55, 0.0  ;;  %v1380_v31 = vmax.f32 %v1316_v20, 0.0  ;;  %v1194_v0 = vld [vmem:[%s4442_s5 + $0xd8] sm:$0xff]  ;;  %v1197_v18 = vld [vmem:[%s4442_s5 + $0xf0] sm:$0xff] }
 0x1b8   : > { %1441 = vst [vmem:[%s4442_s5 + $0x30] sm:$0xff] %v1377_v14  ;;  %1442 = vst [vmem:[%s4442_s5 + $0x38] sm:$0xff] %v1378_v19  ;;  %v1381_v33 = vmax.f32 %v1317_v21, 0.0  ;;  %v1382_v60 = vmax.f32 %v1318_v23, 0.0  ;;  %v1383_v58 = vmax.f32 %v1319_v6, 0.0  ;;  %v1384_v35 = vmax.f32 %v1320_v25, 0.0 }
 0x1b9   : > { %v1321_v48 = vadd.f32 %v2945_v9, %v1251_v28  ;;  %v1322_v38 = vadd.f32 %v2945_v9, %v1252_v15  ;;  %1443 = vst [vmem:[%s4442_s5 + $0x40] sm:$0xff] %v1379_v51  ;;  %1444 = vst [vmem:[%s4442_s5 + $0x48] sm:$0xff] %v1380_v31  ;;  %v1253_v26 = vmul.f32 %v2909_v52, %v1183_v24  ;;  %v1198_v39 = vld [vmem:[%s4442_s5 + $0xf8] sm:$0xff]  ;;  %v1199_v25 = vld [vmem:[%s4442_s5 + $0x100] sm:$0xff] }
 0x1ba   : > { %1445 = vst [vmem:[%s4442_s5 + $0x50] sm:$0xff] %v1381_v33  ;;  %1446 = vst [vmem:[%s4442_s5 + $0x58] sm:$0xff] %v1382_v60  ;;  %v1254_v41 = vmul.f32 %v2909_v52, %v1184_v29  ;;  %v1255_v53 = vmul.f32 %v2909_v52, %v1185_v30  ;;  %v1256_v42 = vmul.f32 %v2909_v52, %v1186_v50  ;;  %v1200_v50 = vld [vmem:[%s4442_s5 + $0x108] sm:$0xff]  ;;  %v1201_v51 = vld [vmem:[%s4442_s5 + $0x110] sm:$0xff] }
 0x1bb   : > { %1447 = vst [vmem:[%s4442_s5 + $0x60] sm:$0xff] %v1383_v58  ;;  %1448 = vst [vmem:[%s4442_s5 + $0x68] sm:$0xff] %v1384_v35  ;;  %v1385_v13 = vmax.f32 %v1321_v48, 0.0  ;;  %v1386_v16 = vmax.f32 %v1322_v38, 0.0  ;;  %v1257_v44 = vmul.f32 %v2909_v52, %v1187_v34  ;;  %v1258_v27 = vmul.f32 %v2909_v52, %v1188_v40  ;;  %v1202_v31 = vld [vmem:[%s4442_s5 + $0x118] sm:$0xff]  ;;  %v1203_v58 = vld [vmem:[%s4442_s5 + $0x120] sm:$0xff] }
 0x1bc   : > { %v1323_v47 = vadd.f32 %v2945_v9, %v1253_v26  ;;  %v1324_v56 = vadd.f32 %v2945_v9, %v1254_v41  ;;  %v1325_v3 = vadd.f32 %v2945_v9, %v1255_v53  ;;  %v1326_v22 = vadd.f32 %v2945_v9, %v1256_v42  ;;  %v1204_v35 = vld [vmem:[%s4442_s5 + $0x128] sm:$0xff] }
 0x1bd   : > { %1449 = vst [vmem:[%s4442_s5 + $0x70] sm:$0xff] %v1385_v13  ;;  %1450 = vst [vmem:[%s4442_s5 + $0x78] sm:$0xff] %v1386_v16  ;;  %v1327_v11 = vadd.f32 %v2945_v9, %v1257_v44  ;;  %v1328_v61 = vadd.f32 %v2945_v9, %v1258_v27  ;;  %v1259_v59 = vmul.f32 %v2909_v52, %v1189_v32  ;;  %v1205_v13 = vld [vmem:[%s4442_s5 + $0x130] sm:$0xff]  ;;  %v1206_v16 = vld [vmem:[%s4442_s5 + $0x138] sm:$0xff] }
 0x1be   : > { %v1260_v62 = vmul.f32 %v2909_v52, %v1190_v43  ;;  %v1387_v1 = vmax.f32 %v1323_v47, 0.0  ;;  %v1388_v49 = vmax.f32 %v1324_v56, 0.0  ;;  %v1389_v45 = vmax.f32 %v1325_v3, 0.0 }
 0x1bf   : > { %v1390_v2 = vmax.f32 %v1326_v22, 0.0  ;;  %v1391_v54 = vmax.f32 %v1327_v11, 0.0  ;;  %v1392_v8 = vmax.f32 %v1328_v61, 0.0  ;;  %v1329_v63 = vadd.f32 %v2945_v9, %v1259_v59  ;;  %v1207_v61 = vld [vmem:[%s4442_s5 + $0x140] sm:$0xff] }
 0x1c0   : > { %v1330_v37 = vadd.f32 %v2945_v9, %v1260_v62  ;;  %1451 = vst [vmem:[%s4442_s5 + $0x80] sm:$0xff] %v1387_v1  ;;  %1452 = vst [vmem:[%s4442_s5 + $0x88] sm:$0xff] %v1388_v49  ;;  %v1261_v10 = vmul.f32 %v2909_v52, %v1191_v57  ;;  %v1262_v12 = vmul.f32 %v2909_v52, %v1192_v17  ;;  %v1209_v1 = vld [vmem:[%s4442_s5 + $0x150] sm:$0xff]  ;;  %v1210_v49 = vld [vmem:[%s4442_s5 + $0x158] sm:$0xff] }
 0x1c1   : > { %1453 = vst [vmem:[%s4442_s5 + $0x90] sm:$0xff] %v1389_v45  ;;  %1454 = vst [vmem:[%s4442_s5 + $0x98] sm:$0xff] %v1390_v2  ;;  %v1263_v46 = vmul.f32 %v2909_v52, %v1193_v4  ;;  %v1264_v36 = vmul.f32 %v2909_v52, %v1194_v0  ;;  %v1393_v14 = vmax.f32 %v1329_v63, 0.0  ;;  %v1265_v55 = vmul.f32 %v2909_v52, %v1195_v5  ;;  %v1208_v0 = vld [vmem:[%s4442_s5 + $0x148] sm:$0xff] }
 0x1c2   : > { %1455 = vst [vmem:[%s4442_s5 + $0xa0] sm:$0xff] %v1391_v54  ;;  %1456 = vst [vmem:[%s4442_s5 + $0xa8] sm:$0xff] %v1392_v8  ;;  %v1394_v19 = vmax.f32 %v1330_v37, 0.0  ;;  %v1266_v20 = vmul.f32 %v2909_v52, %v1196_v7  ;;  %v1331_v21 = vadd.f32 %v2945_v9, %v1261_v10  ;;  %v1332_v23 = vadd.f32 %v2945_v9, %v1262_v12  ;;  %v1211_v54 = vld [vmem:[%s4442_s5 + $0x160] sm:$0xff]  ;;  %v1212_v8 = vld [vmem:[%s4442_s5 + $0x168] sm:$0xff] }
 0x1c3   : > { %v1333_v24 = vadd.f32 %v2945_v9, %v1263_v46  ;;  %v1334_v6 = vadd.f32 %v2945_v9, %v1264_v36  ;;  %1457 = vst [vmem:[%s4442_s5 + $0xb0] sm:$0xff] %v1393_v14  ;;  %v1335_v28 = vadd.f32 %v2945_v9, %v1265_v55  ;;  %v1267_v29 = vmul.f32 %v2909_v52, %v1197_v18  ;;  %v1213_v14 = vld [vmem:[%s4442_s5 + $0x170] sm:$0xff] }
 0x1c4   : > { %1458 = vst [vmem:[%s4442_s5 + $0xb8] sm:$0xff] %v1394_v19  ;;  %v1336_v15 = vadd.f32 %v2945_v9, %v1266_v20  ;;  %v1268_v30 = vmul.f32 %v2909_v52, %v1198_v39  ;;  %v1395_v33 = vmax.f32 %v1331_v21, 0.0  ;;  %v1396_v60 = vmax.f32 %v1332_v23, 0.0  ;;  %v1214_v19 = vld [vmem:[%s4442_s5 + $0x178] sm:$0xff] }
 0x1c5   : > { %v1397_v34 = vmax.f32 %v1333_v24, 0.0  ;;  %v1398_v40 = vmax.f32 %v1334_v6, 0.0  ;;  %v1399_v48 = vmax.f32 %v1335_v28, 0.0  ;;  %v1337_v26 = vadd.f32 %v2945_v9, %v1267_v29 }
 0x1c6   : > { %v1400_v38 = vmax.f32 %v1336_v15, 0.0  ;;  %v1338_v41 = vadd.f32 %v2945_v9, %v1268_v30  ;;  %1459 = vst [vmem:[%s4442_s5 + $0xc0] sm:$0xff] %v1395_v33  ;;  %1460 = vst [vmem:[%s4442_s5 + $0xc8] sm:$0xff] %v1396_v60  ;;  %v1269_v53 = vmul.f32 %v2909_v52, %v1199_v25  ;;  %v1270_v42 = vmul.f32 %v2909_v52, %v1200_v50  ;;  %v1215_v15 = vld [vmem:[%s4442_s5 + $0x180] sm:$0xff]  ;;  %v1217_v33 = vld [vmem:[%s4442_s5 + $0x190] sm:$0xff] }
 0x1c7   : > { %1461 = vst [vmem:[%s4442_s5 + $0xd0] sm:$0xff] %v1397_v34  ;;  %1462 = vst [vmem:[%s4442_s5 + $0xd8] sm:$0xff] %v1398_v40  ;;  %v1271_v32 = vmul.f32 %v2909_v52, %v1201_v51  ;;  %v1272_v43 = vmul.f32 %v2909_v52, %v1202_v31  ;;  %v1401_v44 = vmax.f32 %v1337_v26, 0.0  ;;  %v1273_v47 = vmul.f32 %v2909_v52, %v1203_v58  ;;  %v1216_v31 = vld [vmem:[%s4442_s5 + $0x188] sm:$0xff]  ;;  %v1218_v60 = vld [vmem:[%s4442_s5 + $0x198] sm:$0xff] }
 0x1c8   : > { %1463 = vst [vmem:[%s4442_s5 + $0xe0] sm:$0xff] %v1399_v48  ;;  %1464 = vst [vmem:[%s4442_s5 + $0xe8] sm:$0xff] %v1400_v38  ;;  %v1402_v27 = vmax.f32 %v1338_v41, 0.0  ;;  %v1274_v56 = vmul.f32 %v2909_v52, %v1204_v35  ;;  %v1339_v3 = vadd.f32 %v2945_v9, %v1269_v53  ;;  %v1340_v22 = vadd.f32 %v2945_v9, %v1270_v42  ;;  %v1219_v48 = vld [vmem:[%s4442_s5 + $0x1a0] sm:$0xff]  ;;  %v1220_v38 = vld [vmem:[%s4442_s5 + $0x1a8] sm:$0xff] }
 0x1c9   : > { %v1341_v57 = vadd.f32 %v2945_v9, %v1271_v32  ;;  %v1342_v11 = vadd.f32 %v2945_v9, %v1272_v43  ;;  %1465 = vst [vmem:[%s4442_s5 + $0xf0] sm:$0xff] %v1401_v44  ;;  %v1343_v59 = vadd.f32 %v2945_v9, %v1273_v47  ;;  %v1275_v17 = vmul.f32 %v2909_v52, %v1205_v13  ;;  %v1221_v44 = vld [vmem:[%s4442_s5 + $0x1b0] sm:$0xff] }
 0x1ca   : > { %1466 = vst [vmem:[%s4442_s5 + $0xf8] sm:$0xff] %v1402_v27  ;;  %v1344_v62 = vadd.f32 %v2945_v9, %v1274_v56  ;;  %v1276_v4 = vmul.f32 %v2909_v52, %v1206_v16  ;;  %v1403_v45 = vmax.f32 %v1339_v3, 0.0  ;;  %v1404_v2 = vmax.f32 %v1340_v22, 0.0  ;;  %v1222_v27 = vld [vmem:[%s4442_s5 + $0x1b8] sm:$0xff] }
 0x1cb   : > { %v1405_v5 = vmax.f32 %v1341_v57, 0.0  ;;  %v1406_v7 = vmax.f32 %v1342_v11, 0.0  ;;  %v1407_v63 = vmax.f32 %v1343_v59, 0.0  ;;  %v1345_v10 = vadd.f32 %v2945_v9, %v1275_v17 }
 0x1cc   : > { %v1408_v37 = vmax.f32 %v1344_v62, 0.0  ;;  %v1346_v12 = vadd.f32 %v2945_v9, %v1276_v4  ;;  %1467 = vst [vmem:[%s4442_s5 + $0x100] sm:$0xff] %v1403_v45  ;;  %1468 = vst [vmem:[%s4442_s5 + $0x108] sm:$0xff] %v1404_v2  ;;  %v1277_v46 = vmul.f32 %v2909_v52, %v1207_v61  ;;  %v1278_v36 = vmul.f32 %v2909_v52, %v1208_v0  ;;  %v1223_v62 = vld [vmem:[%s4442_s5 + $0x1c0] sm:$0xff]  ;;  %v1225_v45 = vld [vmem:[%s4442_s5 + $0x1d0] sm:$0xff] }
 0x1cd   : > { %1469 = vst [vmem:[%s4442_s5 + $0x110] sm:$0xff] %v1405_v5  ;;  %1470 = vst [vmem:[%s4442_s5 + $0x118] sm:$0xff] %v1406_v7  ;;  %v1279_v18 = vmul.f32 %v2909_v52, %v1209_v1  ;;  %v1280_v39 = vmul.f32 %v2909_v52, %v1210_v49  ;;  %v1409_v55 = vmax.f32 %v1345_v10, 0.0  ;;  %v1281_v21 = vmul.f32 %v2909_v52, %v1211_v54  ;;  %v1224_v49 = vld [vmem:[%s4442_s5 + $0x1c8] sm:$0xff]  ;;  %v1226_v2 = vld [vmem:[%s4442_s5 + $0x1d8] sm:$0xff] }
 0x1ce   : > { %1471 = vst [vmem:[%s4442_s5 + $0x120] sm:$0xff] %v1407_v63  ;;  %1472 = vst [vmem:[%s4442_s5 + $0x128] sm:$0xff] %v1408_v37  ;;  %v1410_v20 = vmax.f32 %v1346_v12, 0.0  ;;  %v1282_v23 = vmul.f32 %v2909_v52, %v1212_v8  ;;  %v1347_v24 = vadd.f32 %v2945_v9, %v1277_v46  ;;  %v1348_v6 = vadd.f32 %v2945_v9, %v1278_v36  ;;  %v1227_v63 = vld [vmem:[%s4442_s5 + $0x1e0] sm:$0xff]  ;;  %v1228_v37 = vld [vmem:[%s4442_s5 + $0x1e8] sm:$0xff] }
 0x1cf   : > { %v1349_v25 = vadd.f32 %v2945_v9, %v1279_v18  ;;  %v1350_v28 = vadd.f32 %v2945_v9, %v1280_v39  ;;  %1473 = vst [vmem:[%s4442_s5 + $0x130] sm:$0xff] %v1409_v55  ;;  %v1351_v29 = vadd.f32 %v2945_v9, %v1281_v21  ;;  %v1283_v50 = vmul.f32 %v2909_v52, %v1213_v14  ;;  %v1229_v55 = vld [vmem:[%s4442_s5 + $0x1f0] sm:$0xff] }
 0x1d0   : > { %1474 = vst [vmem:[%s4442_s5 + $0x138] sm:$0xff] %v1410_v20  ;;  %v1352_v30 = vadd.f32 %v2945_v9, %v1282_v23  ;;  %v1284_v51 = vmul.f32 %v2909_v52, %v1214_v19  ;;  %v1411_v34 = vmax.f32 %v1347_v24, 0.0  ;;  %v1412_v40 = vmax.f32 %v1348_v6, 0.0  ;;  %v1230_v20 = vld [vmem:[%s4442_s5 + $0x1f8] sm:$0xff] }
 0x1d1   : > { %v1413_v58 = vmax.f32 %v1349_v25, 0.0  ;;  %v1414_v35 = vmax.f32 %v1350_v28, 0.0  ;;  %v1415_v26 = vmax.f32 %v1351_v29, 0.0  ;;  %v1353_v53 = vadd.f32 %v2945_v9, %v1283_v50 }
 0x1d2   : > { %v1416_v41 = vmax.f32 %v1352_v30, 0.0  ;;  %v1354_v42 = vadd.f32 %v2945_v9, %v1284_v51  ;;  %1475 = vst [vmem:[%s4442_s5 + $0x140] sm:$0xff] %v1411_v34  ;;  %1476 = vst [vmem:[%s4442_s5 + $0x148] sm:$0xff] %v1412_v40  ;;  %v1285_v32 = vmul.f32 %v2909_v52, %v1215_v15  ;;  %v1286_v43 = vmul.f32 %v2909_v52, %v1216_v31  ;;  %v1499_v30 = vld [vmem:[%s4442_s5 + $0x200] sm:$0xff]  ;;  %v1501_v34 = vld [vmem:[%s4442_s5 + $0x210] sm:$0xff] }
 0x1d3   : > { %1477 = vst [vmem:[%s4442_s5 + $0x150] sm:$0xff] %v1413_v58  ;;  %1478 = vst [vmem:[%s4442_s5 + $0x158] sm:$0xff] %v1414_v35  ;;  %v1287_v13 = vmul.f32 %v2909_v52, %v1217_v33  ;;  %v1288_v16 = vmul.f32 %v2909_v52, %v1218_v60  ;;  %v1417_v47 = vmax.f32 %v1353_v53, 0.0  ;;  %v1289_v3 = vmul.f32 %v2909_v52, %v1219_v48  ;;  %v1500_v60 = vld [vmem:[%s4442_s5 + $0x208] sm:$0xff]  ;;  %v1502_v40 = vld [vmem:[%s4442_s5 + $0x218] sm:$0xff] }
 0x1d4   : > { %1479 = vst [vmem:[%s4442_s5 + $0x160] sm:$0xff] %v1415_v26  ;;  %1480 = vst [vmem:[%s4442_s5 + $0x168] sm:$0xff] %v1416_v41  ;;  %v1418_v56 = vmax.f32 %v1354_v42, 0.0  ;;  %v1290_v22 = vmul.f32 %v2909_v52, %v1220_v38  ;;  %v1355_v57 = vadd.f32 %v2945_v9, %v1285_v32  ;;  %v1356_v11 = vadd.f32 %v2945_v9, %v1286_v43  ;;  %v1503_v26 = vld [vmem:[%s4442_s5 + $0x220] sm:$0xff]  ;;  %v1504_v41 = vld [vmem:[%s4442_s5 + $0x228] sm:$0xff] }
 0x1d5   : > { %v1357_v61 = vadd.f32 %v2945_v9, %v1287_v13  ;;  %v1358_v59 = vadd.f32 %v2945_v9, %v1288_v16  ;;  %1481 = vst [vmem:[%s4442_s5 + $0x170] sm:$0xff] %v1417_v47  ;;  %v1359_v17 = vadd.f32 %v2945_v9, %v1289_v3  ;;  %v1291_v0 = vmul.f32 %v2909_v52, %v1221_v44  ;;  %v1505_v47 = vld [vmem:[%s4442_s5 + $0x230] sm:$0xff] }
 0x1d6   : > { %1482 = vst [vmem:[%s4442_s5 + $0x178] sm:$0xff] %v1418_v56  ;;  %v1360_v4 = vadd.f32 %v2945_v9, %v1290_v22  ;;  %v1292_v1 = vmul.f32 %v2909_v52, %v1222_v27  ;;  %v1419_v5 = vmax.f32 %v1355_v57, 0.0  ;;  %v1420_v7 = vmax.f32 %v1356_v11, 0.0  ;;  %v1506_v56 = vld [vmem:[%s4442_s5 + $0x238] sm:$0xff] }
 0x1d7   : > { %v1421_v54 = vmax.f32 %v1357_v61, 0.0  ;;  %v1422_v8 = vmax.f32 %v1358_v59, 0.0  ;;  %v1423_v10 = vmax.f32 %v1359_v17, 0.0  ;;  %v1361_v46 = vadd.f32 %v2945_v9, %v1291_v0 }
 0x1d8   : > { %v1424_v12 = vmax.f32 %v1360_v4, 0.0  ;;  %v1362_v36 = vadd.f32 %v2945_v9, %v1292_v1  ;;  %1483 = vst [vmem:[%s4442_s5 + $0x180] sm:$0xff] %v1419_v5  ;;  %1484 = vst [vmem:[%s4442_s5 + $0x188] sm:$0xff] %v1420_v7  ;;  %v1293_v18 = vmul.f32 %v2909_v52, %v1223_v62  ;;  %v1294_v39 = vmul.f32 %v2909_v52, %v1224_v49  ;;  %v1507_v4 = vld [vmem:[%s4442_s5 + $0x240] sm:$0xff]  ;;  %v1509_v5 = vld [vmem:[%s4442_s5 + $0x250] sm:$0xff] }
 0x1d9   : > { %1485 = vst [vmem:[%s4442_s5 + $0x190] sm:$0xff] %v1421_v54  ;;  %1486 = vst [vmem:[%s4442_s5 + $0x198] sm:$0xff] %v1422_v8  ;;  %v1295_v14 = vmul.f32 %v2909_v52, %v1225_v45  ;;  %v1296_v19 = vmul.f32 %v2909_v52, %v1226_v2  ;;  %v1425_v21 = vmax.f32 %v1361_v46, 0.0  ;;  %v1297_v24 = vmul.f32 %v2909_v52, %v1227_v63  ;;  %v1508_v2 = vld [vmem:[%s4442_s5 + $0x248] sm:$0xff]  ;;  %v1510_v7 = vld [vmem:[%s4442_s5 + $0x258] sm:$0xff] }
 0x1da   : > { %1487 = vst [vmem:[%s4442_s5 + $0x1a0] sm:$0xff] %v1423_v10  ;;  %1488 = vst [vmem:[%s4442_s5 + $0x1a8] sm:$0xff] %v1424_v12  ;;  %v1426_v23 = vmax.f32 %v1362_v36, 0.0  ;;  %v1298_v6 = vmul.f32 %v2909_v52, %v1228_v37  ;;  %v1363_v25 = vadd.f32 %v2945_v9, %v1293_v18  ;;  %v1364_v28 = vadd.f32 %v2945_v9, %v1294_v39  ;;  %v1511_v10 = vld [vmem:[%s4442_s5 + $0x260] sm:$0xff]  ;;  %v1512_v12 = vld [vmem:[%s4442_s5 + $0x268] sm:$0xff] }
 0x1db   : > { %v1365_v15 = vadd.f32 %v2945_v9, %v1295_v14  ;;  %v1366_v29 = vadd.f32 %v2945_v9, %v1296_v19  ;;  %1489 = vst [vmem:[%s4442_s5 + $0x1b0] sm:$0xff] %v1425_v21  ;;  %v1367_v50 = vadd.f32 %v2945_v9, %v1297_v24  ;;  %v1299_v31 = vmul.f32 %v2909_v52, %v1229_v55  ;;  %v1513_v21 = vld [vmem:[%s4442_s5 + $0x270] sm:$0xff] }
 0x1dc   : > { %1490 = vst [vmem:[%s4442_s5 + $0x1b8] sm:$0xff] %v1426_v23  ;;  %v1368_v51 = vadd.f32 %v2945_v9, %v1298_v6  ;;  %v1300_v33 = vmul.f32 %v2909_v52, %v1230_v20  ;;  %v1427_v58 = vmax.f32 %v1363_v25, 0.0  ;;  %v1428_v35 = vmax.f32 %v1364_v28, 0.0  ;;  %v1514_v23 = vld [vmem:[%s4442_s5 + $0x278] sm:$0xff] }
 0x1dd   : > { %v1429_v48 = vmax.f32 %v1365_v15, 0.0  ;;  %v1430_v38 = vmax.f32 %v1366_v29, 0.0  ;;  %v1431_v53 = vmax.f32 %v1367_v50, 0.0  ;;  %v1369_v32 = vadd.f32 %v2945_v9, %v1299_v31 }
 0x1de   : > { %v1432_v42 = vmax.f32 %v1368_v51, 0.0  ;;  %v1370_v43 = vadd.f32 %v2945_v9, %v1300_v33  ;;  %1491 = vst [vmem:[%s4442_s5 + $0x1c0] sm:$0xff] %v1427_v58  ;;  %1492 = vst [vmem:[%s4442_s5 + $0x1c8] sm:$0xff] %v1428_v35  ;;  %v1563_v13 = vmul.f32 %v1499_v30, %v2909_v52  ;;  %v1564_v16 = vmul.f32 %v1500_v60, %v2909_v52  ;;  %v1515_v51 = vld [vmem:[%s4442_s5 + $0x280] sm:$0xff]  ;;  %v1517_v58 = vld [vmem:[%s4442_s5 + $0x290] sm:$0xff] }
 0x1df   : > { %1493 = vst [vmem:[%s4442_s5 + $0x1d0] sm:$0xff] %v1429_v48  ;;  %1494 = vst [vmem:[%s4442_s5 + $0x1d8] sm:$0xff] %v1430_v38  ;;  %v1565_v44 = vmul.f32 %v1501_v34, %v2909_v52  ;;  %v1566_v27 = vmul.f32 %v1502_v40, %v2909_v52  ;;  %v1433_v3 = vmax.f32 %v1369_v32, 0.0  ;;  %v1567_v57 = vmul.f32 %v1503_v26, %v2909_v52  ;;  %v1516_v40 = vld [vmem:[%s4442_s5 + $0x288] sm:$0xff]  ;;  %v1518_v35 = vld [vmem:[%s4442_s5 + $0x298] sm:$0xff] }
 0x1e0   : > { %1495 = vst [vmem:[%s4442_s5 + $0x1e0] sm:$0xff] %v1431_v53  ;;  %1496 = vst [vmem:[%s4442_s5 + $0x1e8] sm:$0xff] %v1432_v42  ;;  %v1434_v22 = vmax.f32 %v1370_v43, 0.0  ;;  %v1568_v11 = vmul.f32 %v1504_v41, %v2909_v52  ;;  %v1627_v61 = vadd.f32 %v1563_v13, %v2945_v9  ;;  %v1628_v59 = vadd.f32 %v1564_v16, %v2945_v9  ;;  %v1519_v53 = vld [vmem:[%s4442_s5 + $0x2a0] sm:$0xff]  ;;  %v1520_v42 = vld [vmem:[%s4442_s5 + $0x2a8] sm:$0xff] }
 0x1e1   : > { %v1629_v62 = vadd.f32 %v1565_v44, %v2945_v9  ;;  %v1630_v17 = vadd.f32 %v1566_v27, %v2945_v9  ;;  %1497 = vst [vmem:[%s4442_s5 + $0x1f0] sm:$0xff] %v1433_v3  ;;  %v1631_v0 = vadd.f32 %v1567_v57, %v2945_v9  ;;  %v1569_v49 = vmul.f32 %v1505_v47, %v2909_v52  ;;  %v1521_v3 = vld [vmem:[%s4442_s5 + $0x2b0] sm:$0xff] }
 0x1e2   : > { %1498 = vst [vmem:[%s4442_s5 + $0x1f8] sm:$0xff] %v1434_v22  ;;  %v1632_v1 = vadd.f32 %v1568_v11, %v2945_v9  ;;  %v1570_v45 = vmul.f32 %v1506_v56, %v2909_v52  ;;  %v1691_v54 = vmax.f32 %v1627_v61, 0.0  ;;  %v1692_v8 = vmax.f32 %v1628_v59, 0.0  ;;  %v1522_v22 = vld [vmem:[%s4442_s5 + $0x2b8] sm:$0xff] }
 0x1e3   : > { %v1693_v63 = vmax.f32 %v1629_v62, 0.0  ;;  %v1694_v37 = vmax.f32 %v1630_v17, 0.0  ;;  %v1695_v46 = vmax.f32 %v1631_v0, 0.0  ;;  %v1633_v18 = vadd.f32 %v1569_v49, %v2945_v9 }
 0x1e4   : > { %v1696_v36 = vmax.f32 %v1632_v1, 0.0  ;;  %v1634_v39 = vadd.f32 %v1570_v45, %v2945_v9  ;;  %1755 = vst [vmem:[%s4442_s5 + $0x200] sm:$0xff] %v1691_v54  ;;  %1756 = vst [vmem:[%s4442_s5 + $0x208] sm:$0xff] %v1692_v8  ;;  %v1571_v14 = vmul.f32 %v1507_v4, %v2909_v52  ;;  %v1572_v19 = vmul.f32 %v1508_v2, %v2909_v52  ;;  %v1523_v1 = vld [vmem:[%s4442_s5 + $0x2c0] sm:$0xff]  ;;  %v1525_v54 = vld [vmem:[%s4442_s5 + $0x2d0] sm:$0xff] }
 0x1e5   : > { %1757 = vst [vmem:[%s4442_s5 + $0x210] sm:$0xff] %v1693_v63  ;;  %1758 = vst [vmem:[%s4442_s5 + $0x218] sm:$0xff] %v1694_v37  ;;  %v1573_v55 = vmul.f32 %v1509_v5, %v2909_v52  ;;  %v1574_v20 = vmul.f32 %v1510_v7, %v2909_v52  ;;  %v1697_v24 = vmax.f32 %v1633_v18, 0.0  ;;  %v1575_v25 = vmul.f32 %v1511_v10, %v2909_v52  ;;  %v1524_v7 = vld [vmem:[%s4442_s5 + $0x2c8] sm:$0xff]  ;;  %v1526_v8 = vld [vmem:[%s4442_s5 + $0x2d8] sm:$0xff] }
 0x1e6   : > { %1759 = vst [vmem:[%s4442_s5 + $0x220] sm:$0xff] %v1695_v46  ;;  %1760 = vst [vmem:[%s4442_s5 + $0x228] sm:$0xff] %v1696_v36  ;;  %v1698_v6 = vmax.f32 %v1634_v39, 0.0  ;;  %v1576_v28 = vmul.f32 %v1512_v12, %v2909_v52  ;;  %v1635_v15 = vadd.f32 %v1571_v14, %v2945_v9  ;;  %v1636_v29 = vadd.f32 %v1572_v19, %v2945_v9  ;;  %v1527_v46 = vld [vmem:[%s4442_s5 + $0x2e0] sm:$0xff]  ;;  %v1528_v36 = vld [vmem:[%s4442_s5 + $0x2e8] sm:$0xff] }
 0x1e7   : > { %v1637_v30 = vadd.f32 %v1573_v55, %v2945_v9  ;;  %v1638_v50 = vadd.f32 %v1574_v20, %v2945_v9  ;;  %1761 = vst [vmem:[%s4442_s5 + $0x230] sm:$0xff] %v1697_v24  ;;  %v1639_v31 = vadd.f32 %v1575_v25, %v2945_v9  ;;  %v1577_v60 = vmul.f32 %v1513_v21, %v2909_v52  ;;  %v1529_v24 = vld [vmem:[%s4442_s5 + $0x2f0] sm:$0xff] }
 0x1e8   : > { %1762 = vst [vmem:[%s4442_s5 + $0x238] sm:$0xff] %v1698_v6  ;;  %v1640_v33 = vadd.f32 %v1576_v28, %v2945_v9  ;;  %v1578_v34 = vmul.f32 %v1514_v23, %v2909_v52  ;;  %v1699_v48 = vmax.f32 %v1635_v15, 0.0  ;;  %v1700_v38 = vmax.f32 %v1636_v29, 0.0  ;;  %v1530_v6 = vld [vmem:[%s4442_s5 + $0x2f8] sm:$0xff] }
 0x1e9   : > { %v1701_v26 = vmax.f32 %v1637_v30, 0.0  ;;  %v1702_v41 = vmax.f32 %v1638_v50, 0.0  ;;  %v1703_v32 = vmax.f32 %v1639_v31, 0.0  ;;  %v1641_v13 = vadd.f32 %v1577_v60, %v2945_v9 }
 0x1ea   : > { %v1704_v43 = vmax.f32 %v1640_v33, 0.0  ;;  %v1642_v16 = vadd.f32 %v1578_v34, %v2945_v9  ;;  %1763 = vst [vmem:[%s4442_s5 + $0x240] sm:$0xff] %v1699_v48  ;;  %1764 = vst [vmem:[%s4442_s5 + $0x248] sm:$0xff] %v1700_v38  ;;  %v1579_v44 = vmul.f32 %v1515_v51, %v2909_v52  ;;  %v1580_v27 = vmul.f32 %v1516_v40, %v2909_v52  ;;  %v1531_v33 = vld [vmem:[%s4442_s5 + $0x300] sm:$0xff]  ;;  %v1533_v48 = vld [vmem:[%s4442_s5 + $0x310] sm:$0xff] }
 0x1eb   : > { %1765 = vst [vmem:[%s4442_s5 + $0x250] sm:$0xff] %v1701_v26  ;;  %1766 = vst [vmem:[%s4442_s5 + $0x258] sm:$0xff] %v1702_v41  ;;  %v1581_v47 = vmul.f32 %v1517_v58, %v2909_v52  ;;  %v1582_v56 = vmul.f32 %v1518_v35, %v2909_v52  ;;  %v1705_v57 = vmax.f32 %v1641_v13, 0.0  ;;  %v1583_v61 = vmul.f32 %v1519_v53, %v2909_v52  ;;  %v1532_v35 = vld [vmem:[%s4442_s5 + $0x308] sm:$0xff]  ;;  %v1534_v38 = vld [vmem:[%s4442_s5 + $0x318] sm:$0xff] }
 0x1ec   : > { %1767 = vst [vmem:[%s4442_s5 + $0x260] sm:$0xff] %v1703_v32  ;;  %1768 = vst [vmem:[%s4442_s5 + $0x268] sm:$0xff] %v1704_v43  ;;  %v1706_v11 = vmax.f32 %v1642_v16, 0.0  ;;  %v1584_v59 = vmul.f32 %v1520_v42, %v2909_v52  ;;  %v1643_v62 = vadd.f32 %v1579_v44, %v2945_v9  ;;  %v1644_v17 = vadd.f32 %v1580_v27, %v2945_v9  ;;  %v1535_v32 = vld [vmem:[%s4442_s5 + $0x320] sm:$0xff]  ;;  %v1536_v43 = vld [vmem:[%s4442_s5 + $0x328] sm:$0xff] }
 0x1ed   : > { %v1645_v4 = vadd.f32 %v1581_v47, %v2945_v9  ;;  %v1646_v0 = vadd.f32 %v1582_v56, %v2945_v9  ;;  %1769 = vst [vmem:[%s4442_s5 + $0x270] sm:$0xff] %v1705_v57  ;;  %v1647_v49 = vadd.f32 %v1583_v61, %v2945_v9  ;;  %v1585_v2 = vmul.f32 %v1521_v3, %v2909_v52  ;;  %v1537_v57 = vld [vmem:[%s4442_s5 + $0x330] sm:$0xff] }
 0x1ee   : > { %1770 = vst [vmem:[%s4442_s5 + $0x278] sm:$0xff] %v1706_v11  ;;  %v1648_v45 = vadd.f32 %v1584_v59, %v2945_v9  ;;  %v1586_v5 = vmul.f32 %v1522_v22, %v2909_v52  ;;  %v1707_v63 = vmax.f32 %v1643_v62, 0.0  ;;  %v1708_v37 = vmax.f32 %v1644_v17, 0.0  ;;  %v1538_v11 = vld [vmem:[%s4442_s5 + $0x338] sm:$0xff] }
 0x1ef   : > { %v1709_v10 = vmax.f32 %v1645_v4, 0.0  ;;  %v1710_v12 = vmax.f32 %v1646_v0, 0.0  ;;  %v1711_v18 = vmax.f32 %v1647_v49, 0.0  ;;  %v1649_v14 = vadd.f32 %v1585_v2, %v2945_v9 }
 0x1f0   : > { %v1712_v39 = vmax.f32 %v1648_v45, 0.0  ;;  %v1650_v19 = vadd.f32 %v1586_v5, %v2945_v9  ;;  %1771 = vst [vmem:[%s4442_s5 + $0x280] sm:$0xff] %v1707_v63  ;;  %1772 = vst [vmem:[%s4442_s5 + $0x288] sm:$0xff] %v1708_v37  ;;  %v1587_v55 = vmul.f32 %v1523_v1, %v2909_v52  ;;  %v1588_v20 = vmul.f32 %v1524_v7, %v2909_v52  ;;  %v1539_v45 = vld [vmem:[%s4442_s5 + $0x340] sm:$0xff]  ;;  %v1541_v63 = vld [vmem:[%s4442_s5 + $0x350] sm:$0xff] }
 0x1f1   : > { %1773 = vst [vmem:[%s4442_s5 + $0x290] sm:$0xff] %v1709_v10  ;;  %1774 = vst [vmem:[%s4442_s5 + $0x298] sm:$0xff] %v1710_v12  ;;  %v1589_v21 = vmul.f32 %v1525_v54, %v2909_v52  ;;  %v1590_v23 = vmul.f32 %v1526_v8, %v2909_v52  ;;  %v1713_v25 = vmax.f32 %v1649_v14, 0.0  ;;  %v1591_v15 = vmul.f32 %v1527_v46, %v2909_v52  ;;  %v1540_v8 = vld [vmem:[%s4442_s5 + $0x348] sm:$0xff]  ;;  %v1542_v37 = vld [vmem:[%s4442_s5 + $0x358] sm:$0xff] }
 0x1f2   : > { %1775 = vst [vmem:[%s4442_s5 + $0x2a0] sm:$0xff] %v1711_v18  ;;  %1776 = vst [vmem:[%s4442_s5 + $0x2a8] sm:$0xff] %v1712_v39  ;;  %v1714_v28 = vmax.f32 %v1650_v19, 0.0  ;;  %v1592_v29 = vmul.f32 %v1528_v36, %v2909_v52  ;;  %v1651_v30 = vadd.f32 %v1587_v55, %v2945_v9  ;;  %v1652_v50 = vadd.f32 %v1588_v20, %v2945_v9  ;;  %v1543_v18 = vld [vmem:[%s4442_s5 + $0x360] sm:$0xff]  ;;  %v1544_v39 = vld [vmem:[%s4442_s5 + $0x368] sm:$0xff] }
 0x1f3   : > { %v1653_v51 = vadd.f32 %v1589_v21, %v2945_v9  ;;  %v1654_v31 = vadd.f32 %v1590_v23, %v2945_v9  ;;  %1777 = vst [vmem:[%s4442_s5 + $0x2b0] sm:$0xff] %v1713_v25  ;;  %v1655_v60 = vadd.f32 %v1591_v15, %v2945_v9  ;;  %v1593_v40 = vmul.f32 %v1529_v24, %v2909_v52  ;;  %v1545_v25 = vld [vmem:[%s4442_s5 + $0x370] sm:$0xff] }
 0x1f4   : > { %1778 = vst [vmem:[%s4442_s5 + $0x2b8] sm:$0xff] %v1714_v28  ;;  %v1656_v34 = vadd.f32 %v1592_v29, %v2945_v9  ;;  %v1594_v58 = vmul.f32 %v1530_v6, %v2909_v52  ;;  %v1715_v26 = vmax.f32 %v1651_v30, 0.0  ;;  %v1716_v41 = vmax.f32 %v1652_v50, 0.0  ;;  %v1546_v28 = vld [vmem:[%s4442_s5 + $0x378] sm:$0xff] }
 0x1f5   : > { %v1717_v53 = vmax.f32 %v1653_v51, 0.0  ;;  %v1718_v42 = vmax.f32 %v1654_v31, 0.0  ;;  %v1719_v13 = vmax.f32 %v1655_v60, 0.0  ;;  %v1657_v44 = vadd.f32 %v1593_v40, %v2945_v9 }
 0x1f6   : > { %v1720_v16 = vmax.f32 %v1656_v34, 0.0  ;;  %v1658_v27 = vadd.f32 %v1594_v58, %v2945_v9  ;;  %1779 = vst [vmem:[%s4442_s5 + $0x2c0] sm:$0xff] %v1715_v26  ;;  %1780 = vst [vmem:[%s4442_s5 + $0x2c8] sm:$0xff] %v1716_v41  ;;  %v1595_v47 = vmul.f32 %v1531_v33, %v2909_v52  ;;  %v1596_v56 = vmul.f32 %v1532_v35, %v2909_v52  ;;  %v1547_v34 = vld [vmem:[%s4442_s5 + $0x380] sm:$0xff]  ;;  %v1549_v26 = vld [vmem:[%s4442_s5 + $0x390] sm:$0xff] }
 0x1f7   : > { %1781 = vst [vmem:[%s4442_s5 + $0x2d0] sm:$0xff] %v1717_v53  ;;  %1782 = vst [vmem:[%s4442_s5 + $0x2d8] sm:$0xff] %v1718_v42  ;;  %v1597_v3 = vmul.f32 %v1533_v48, %v2909_v52  ;;  %v1598_v22 = vmul.f32 %v1534_v38, %v2909_v52  ;;  %v1721_v61 = vmax.f32 %v1657_v44, 0.0  ;;  %v1599_v62 = vmul.f32 %v1535_v32, %v2909_v52  ;;  %v1548_v38 = vld [vmem:[%s4442_s5 + $0x388] sm:$0xff]  ;;  %v1550_v41 = vld [vmem:[%s4442_s5 + $0x398] sm:$0xff] }
 0x1f8   : > { %1783 = vst [vmem:[%s4442_s5 + $0x2e0] sm:$0xff] %v1719_v13  ;;  %1784 = vst [vmem:[%s4442_s5 + $0x2e8] sm:$0xff] %v1720_v16  ;;  %v1722_v59 = vmax.f32 %v1658_v27, 0.0  ;;  %v1600_v17 = vmul.f32 %v1536_v43, %v2909_v52  ;;  %v1659_v4 = vadd.f32 %v1595_v47, %v2945_v9  ;;  %v1660_v0 = vadd.f32 %v1596_v56, %v2945_v9  ;;  %v1551_v13 = vld [vmem:[%s4442_s5 + $0x3a0] sm:$0xff]  ;;  %v1552_v16 = vld [vmem:[%s4442_s5 + $0x3a8] sm:$0xff] }
 0x1f9   : > { %v1661_v1 = vadd.f32 %v1597_v3, %v2945_v9  ;;  %v1662_v49 = vadd.f32 %v1598_v22, %v2945_v9  ;;  %1785 = vst [vmem:[%s4442_s5 + $0x2f0] sm:$0xff] %v1721_v61  ;;  %v1663_v2 = vadd.f32 %v1599_v62, %v2945_v9  ;;  %v1601_v7 = vmul.f32 %v1537_v57, %v2909_v52  ;;  %v1553_v61 = vld [vmem:[%s4442_s5 + $0x3b0] sm:$0xff] }
 0x1fa   : > { %1786 = vst [vmem:[%s4442_s5 + $0x2f8] sm:$0xff] %v1722_v59  ;;  %v1664_v5 = vadd.f32 %v1600_v17, %v2945_v9  ;;  %v1602_v54 = vmul.f32 %v1538_v11, %v2909_v52  ;;  %v1723_v10 = vmax.f32 %v1659_v4, 0.0  ;;  %v1724_v12 = vmax.f32 %v1660_v0, 0.0  ;;  %v1554_v59 = vld [vmem:[%s4442_s5 + $0x3b8] sm:$0xff] }
 0x1fb   : > { %v1725_v46 = vmax.f32 %v1661_v1, 0.0  ;;  %v1726_v36 = vmax.f32 %v1662_v49, 0.0  ;;  %v1727_v14 = vmax.f32 %v1663_v2, 0.0  ;;  %v1665_v55 = vadd.f32 %v1601_v7, %v2945_v9 }
 0x1fc   : > { %v1728_v19 = vmax.f32 %v1664_v5, 0.0  ;;  %v1666_v20 = vadd.f32 %v1602_v54, %v2945_v9  ;;  %1787 = vst [vmem:[%s4442_s5 + $0x300] sm:$0xff] %v1723_v10  ;;  %1788 = vst [vmem:[%s4442_s5 + $0x308] sm:$0xff] %v1724_v12  ;;  %v1603_v21 = vmul.f32 %v1539_v45, %v2909_v52  ;;  %v1604_v23 = vmul.f32 %v1540_v8, %v2909_v52  ;;  %v1555_v5 = vld [vmem:[%s4442_s5 + $0x3c0] sm:$0xff]  ;;  %v1557_v10 = vld [vmem:[%s4442_s5 + $0x3d0] sm:$0xff] }
 0x1fd   : > { %1789 = vst [vmem:[%s4442_s5 + $0x310] sm:$0xff] %v1725_v46  ;;  %1790 = vst [vmem:[%s4442_s5 + $0x318] sm:$0xff] %v1726_v36  ;;  %v1605_v24 = vmul.f32 %v1541_v63, %v2909_v52  ;;  %v1606_v6 = vmul.f32 %v1542_v37, %v2909_v52  ;;  %v1729_v15 = vmax.f32 %v1665_v55, 0.0  ;;  %v1607_v30 = vmul.f32 %v1543_v18, %v2909_v52  ;;  %v1556_v37 = vld [vmem:[%s4442_s5 + $0x3c8] sm:$0xff]  ;;  %v1558_v12 = vld [vmem:[%s4442_s5 + $0x3d8] sm:$0xff] }
 0x1fe   : > { %1791 = vst [vmem:[%s4442_s5 + $0x320] sm:$0xff] %v1727_v14  ;;  %1792 = vst [vmem:[%s4442_s5 + $0x328] sm:$0xff] %v1728_v19  ;;  %v1730_v29 = vmax.f32 %v1666_v20, 0.0  ;;  %v1608_v50 = vmul.f32 %v1544_v39, %v2909_v52  ;;  %v1667_v51 = vadd.f32 %v1603_v21, %v2945_v9  ;;  %v1668_v31 = vadd.f32 %v1604_v23, %v2945_v9  ;;  %v1559_v14 = vld [vmem:[%s4442_s5 + $0x3e0] sm:$0xff]  ;;  %v1560_v19 = vld [vmem:[%s4442_s5 + $0x3e8] sm:$0xff] }
 0x1ff   : > { %v1669_v33 = vadd.f32 %v1605_v24, %v2945_v9  ;;  %v1670_v60 = vadd.f32 %v1606_v6, %v2945_v9  ;;  %1793 = vst [vmem:[%s4442_s5 + $0x330] sm:$0xff] %v1729_v15  ;;  %v1671_v40 = vadd.f32 %v1607_v30, %v2945_v9  ;;  %v1609_v35 = vmul.f32 %v1545_v25, %v2909_v52  ;;  %v1561_v15 = vld [vmem:[%s4442_s5 + $0x3f0] sm:$0xff] }
 0x200   : > { %1794 = vst [vmem:[%s4442_s5 + $0x338] sm:$0xff] %v1730_v29  ;;  %v1672_v58 = vadd.f32 %v1608_v50, %v2945_v9  ;;  %v1610_v48 = vmul.f32 %v1546_v28, %v2909_v52  ;;  %v1731_v53 = vmax.f32 %v1667_v51, 0.0  ;;  %v1732_v42 = vmax.f32 %v1668_v31, 0.0  ;;  %v1562_v29 = vld [vmem:[%s4442_s5 + $0x3f8] sm:$0xff] }
 0x201   : > { %v1733_v32 = vmax.f32 %v1669_v33, 0.0  ;;  %v1734_v43 = vmax.f32 %v1670_v60, 0.0  ;;  %v1735_v44 = vmax.f32 %v1671_v40, 0.0  ;;  %v1673_v47 = vadd.f32 %v1609_v35, %v2945_v9 }
 0x202   : > { %v1736_v27 = vmax.f32 %v1672_v58, 0.0  ;;  %v1674_v56 = vadd.f32 %v1610_v48, %v2945_v9  ;;  %1795 = vst [vmem:[%s4442_s5 + $0x340] sm:$0xff] %v1731_v53  ;;  %1796 = vst [vmem:[%s4442_s5 + $0x348] sm:$0xff] %v1732_v42  ;;  %v1611_v3 = vmul.f32 %v1547_v34, %v2909_v52  ;;  %v1612_v22 = vmul.f32 %v1548_v38, %v2909_v52  ;;  %v1819_v58 = vld [vmem:[%s4442_s5 + $0x400] sm:$0xff]  ;;  %v1821_v53 = vld [vmem:[%s4442_s5 + $0x410] sm:$0xff] }
 0x203   : > { %1797 = vst [vmem:[%s4442_s5 + $0x350] sm:$0xff] %v1733_v32  ;;  %1798 = vst [vmem:[%s4442_s5 + $0x358] sm:$0xff] %v1734_v43  ;;  %v1613_v57 = vmul.f32 %v1549_v26, %v2909_v52  ;;  %v1614_v11 = vmul.f32 %v1550_v41, %v2909_v52  ;;  %v1737_v62 = vmax.f32 %v1673_v47, 0.0  ;;  %v1615_v4 = vmul.f32 %v1551_v13, %v2909_v52  ;;  %v1820_v41 = vld [vmem:[%s4442_s5 + $0x408] sm:$0xff]  ;;  %v1822_v42 = vld [vmem:[%s4442_s5 + $0x418] sm:$0xff] }
 0x204   : > { %1799 = vst [vmem:[%s4442_s5 + $0x360] sm:$0xff] %v1735_v44  ;;  %1800 = vst [vmem:[%s4442_s5 + $0x368] sm:$0xff] %v1736_v27  ;;  %v1738_v17 = vmax.f32 %v1674_v56, 0.0  ;;  %v1616_v0 = vmul.f32 %v1552_v16, %v2909_v52  ;;  %v1675_v1 = vadd.f32 %v1611_v3, %v2945_v9  ;;  %v1676_v49 = vadd.f32 %v1612_v22, %v2945_v9  ;;  %v1823_v44 = vld [vmem:[%s4442_s5 + $0x420] sm:$0xff]  ;;  %v1824_v27 = vld [vmem:[%s4442_s5 + $0x428] sm:$0xff] }
 0x205   : > { %v1677_v45 = vadd.f32 %v1613_v57, %v2945_v9  ;;  %v1678_v2 = vadd.f32 %v1614_v11, %v2945_v9  ;;  %1801 = vst [vmem:[%s4442_s5 + $0x370] sm:$0xff] %v1737_v62  ;;  %v1679_v7 = vadd.f32 %v1615_v4, %v2945_v9  ;;  %v1617_v8 = vmul.f32 %v1553_v61, %v2909_v52  ;;  %v1825_v62 = vld [vmem:[%s4442_s5 + $0x430] sm:$0xff] }
 0x206   : > { %1802 = vst [vmem:[%s4442_s5 + $0x378] sm:$0xff] %v1738_v17  ;;  %v1680_v54 = vadd.f32 %v1616_v0, %v2945_v9  ;;  %v1618_v63 = vmul.f32 %v1554_v59, %v2909_v52  ;;  %v1739_v46 = vmax.f32 %v1675_v1, 0.0  ;;  %v1740_v36 = vmax.f32 %v1676_v49, 0.0  ;;  %v1826_v17 = vld [vmem:[%s4442_s5 + $0x438] sm:$0xff] }
 0x207   : > { %v1741_v18 = vmax.f32 %v1677_v45, 0.0  ;;  %v1742_v39 = vmax.f32 %v1678_v2, 0.0  ;;  %v1743_v55 = vmax.f32 %v1679_v7, 0.0  ;;  %v1681_v21 = vadd.f32 %v1617_v8, %v2945_v9 }
 0x208   : > { %v1744_v20 = vmax.f32 %v1680_v54, 0.0  ;;  %v1682_v23 = vadd.f32 %v1618_v63, %v2945_v9  ;;  %1803 = vst [vmem:[%s4442_s5 + $0x380] sm:$0xff] %v1739_v46  ;;  %1804 = vst [vmem:[%s4442_s5 + $0x388] sm:$0xff] %v1740_v36  ;;  %v1619_v24 = vmul.f32 %v1555_v5, %v2909_v52  ;;  %v1620_v6 = vmul.f32 %v1556_v37, %v2909_v52  ;;  %v1827_v54 = vld [vmem:[%s4442_s5 + $0x440] sm:$0xff]  ;;  %v1829_v46 = vld [vmem:[%s4442_s5 + $0x450] sm:$0xff] }
 0x209   : > { %1805 = vst [vmem:[%s4442_s5 + $0x390] sm:$0xff] %v1741_v18  ;;  %1806 = vst [vmem:[%s4442_s5 + $0x398] sm:$0xff] %v1742_v39  ;;  %v1621_v25 = vmul.f32 %v1557_v10, %v2909_v52  ;;  %v1622_v28 = vmul.f32 %v1558_v12, %v2909_v52  ;;  %v1745_v30 = vmax.f32 %v1681_v21, 0.0  ;;  %v1623_v51 = vmul.f32 %v1559_v14, %v2909_v52  ;;  %v1828_v12 = vld [vmem:[%s4442_s5 + $0x448] sm:$0xff]  ;;  %v1830_v36 = vld [vmem:[%s4442_s5 + $0x458] sm:$0xff] }
 0x20a   : > { %1807 = vst [vmem:[%s4442_s5 + $0x3a0] sm:$0xff] %v1743_v55  ;;  %1808 = vst [vmem:[%s4442_s5 + $0x3a8] sm:$0xff] %v1744_v20  ;;  %v1746_v50 = vmax.f32 %v1682_v23, 0.0  ;;  %v1624_v31 = vmul.f32 %v1560_v19, %v2909_v52  ;;  %v1683_v33 = vadd.f32 %v1619_v24, %v2945_v9  ;;  %v1684_v60 = vadd.f32 %v1620_v6, %v2945_v9  ;;  %v1831_v55 = vld [vmem:[%s4442_s5 + $0x460] sm:$0xff]  ;;  %v1832_v20 = vld [vmem:[%s4442_s5 + $0x468] sm:$0xff] }
 0x20b   : > { %v1685_v34 = vadd.f32 %v1621_v25, %v2945_v9  ;;  %v1686_v40 = vadd.f32 %v1622_v28, %v2945_v9  ;;  %1809 = vst [vmem:[%s4442_s5 + $0x3b0] sm:$0xff] %v1745_v30  ;;  %v1687_v35 = vadd.f32 %v1623_v51, %v2945_v9  ;;  %v1625_v38 = vmul.f32 %v1561_v15, %v2909_v52  ;;  %v1833_v30 = vld [vmem:[%s4442_s5 + $0x470] sm:$0xff] }
 0x20c   : > { %1810 = vst [vmem:[%s4442_s5 + $0x3b8] sm:$0xff] %v1746_v50  ;;  %v1688_v48 = vadd.f32 %v1624_v31, %v2945_v9  ;;  %v1626_v26 = vmul.f32 %v1562_v29, %v2909_v52  ;;  %v1747_v32 = vmax.f32 %v1683_v33, 0.0  ;;  %v1748_v43 = vmax.f32 %v1684_v60, 0.0  ;;  %v1834_v50 = vld [vmem:[%s4442_s5 + $0x478] sm:$0xff] }
 0x20d   : > { %v1749_v13 = vmax.f32 %v1685_v34, 0.0  ;;  %v1750_v16 = vmax.f32 %v1686_v40, 0.0  ;;  %v1751_v47 = vmax.f32 %v1687_v35, 0.0  ;;  %v1689_v3 = vadd.f32 %v1625_v38, %v2945_v9 }
 0x20e   : > { %v1752_v56 = vmax.f32 %v1688_v48, 0.0  ;;  %v1690_v22 = vadd.f32 %v1626_v26, %v2945_v9  ;;  %1811 = vst [vmem:[%s4442_s5 + $0x3c0] sm:$0xff] %v1747_v32  ;;  %1812 = vst [vmem:[%s4442_s5 + $0x3c8] sm:$0xff] %v1748_v43  ;;  %v1883_v57 = vmul.f32 %v1819_v58, %v2909_v52  ;;  %v1884_v11 = vmul.f32 %v1820_v41, %v2909_v52  ;;  %v1835_v48 = vld [vmem:[%s4442_s5 + $0x480] sm:$0xff]  ;;  %v1837_v32 = vld [vmem:[%s4442_s5 + $0x490] sm:$0xff] }
 0x20f   : > { %1813 = vst [vmem:[%s4442_s5 + $0x3d0] sm:$0xff] %v1749_v13  ;;  %1814 = vst [vmem:[%s4442_s5 + $0x3d8] sm:$0xff] %v1750_v16  ;;  %v1885_v61 = vmul.f32 %v1821_v53, %v2909_v52  ;;  %v1886_v59 = vmul.f32 %v1822_v42, %v2909_v52  ;;  %v1753_v4 = vmax.f32 %v1689_v3, 0.0  ;;  %v1887_v1 = vmul.f32 %v1823_v44, %v2909_v52  ;;  %v1836_v42 = vld [vmem:[%s4442_s5 + $0x488] sm:$0xff]  ;;  %v1838_v43 = vld [vmem:[%s4442_s5 + $0x498] sm:$0xff] }
 0x210   : > { %1815 = vst [vmem:[%s4442_s5 + $0x3e0] sm:$0xff] %v1751_v47  ;;  %1816 = vst [vmem:[%s4442_s5 + $0x3e8] sm:$0xff] %v1752_v56  ;;  %v1754_v0 = vmax.f32 %v1690_v22, 0.0  ;;  %v1888_v49 = vmul.f32 %v1824_v27, %v2909_v52  ;;  %v1947_v45 = vadd.f32 %v1883_v57, %v2945_v9  ;;  %v1948_v2 = vadd.f32 %v1884_v11, %v2945_v9  ;;  %v1839_v47 = vld [vmem:[%s4442_s5 + $0x4a0] sm:$0xff]  ;;  %v1840_v56 = vld [vmem:[%s4442_s5 + $0x4a8] sm:$0xff] }
 0x211   : > { %v1949_v5 = vadd.f32 %v1885_v61, %v2945_v9  ;;  %v1950_v7 = vadd.f32 %v1886_v59, %v2945_v9  ;;  %1817 = vst [vmem:[%s4442_s5 + $0x3f0] sm:$0xff] %v1753_v4  ;;  %v1951_v8 = vadd.f32 %v1887_v1, %v2945_v9  ;;  %v1889_v37 = vmul.f32 %v1825_v62, %v2909_v52  ;;  %v1841_v4 = vld [vmem:[%s4442_s5 + $0x4b0] sm:$0xff] }
 0x212   : > { %1818 = vst [vmem:[%s4442_s5 + $0x3f8] sm:$0xff] %v1754_v0  ;;  %v1952_v63 = vadd.f32 %v1888_v49, %v2945_v9  ;;  %v1890_v10 = vmul.f32 %v1826_v17, %v2909_v52  ;;  %v2011_v18 = vmax.f32 %v1947_v45, 0.0  ;;  %v2012_v39 = vmax.f32 %v1948_v2, 0.0  ;;  %v1842_v0 = vld [vmem:[%s4442_s5 + $0x4b8] sm:$0xff] }
 0x213   : > { %v2013_v14 = vmax.f32 %v1949_v5, 0.0  ;;  %v2014_v19 = vmax.f32 %v1950_v7, 0.0  ;;  %v2015_v21 = vmax.f32 %v1951_v8, 0.0  ;;  %v1953_v24 = vadd.f32 %v1889_v37, %v2945_v9 }
 0x214   : > { %v2016_v23 = vmax.f32 %v1952_v63, 0.0  ;;  %v1954_v6 = vadd.f32 %v1890_v10, %v2945_v9  ;;  %2075 = vst [vmem:[%s4442_s5 + $0x400] sm:$0xff] %v2011_v18  ;;  %2076 = vst [vmem:[%s4442_s5 + $0x408] sm:$0xff] %v2012_v39  ;;  %v1891_v25 = vmul.f32 %v1827_v54, %v2909_v52  ;;  %v1892_v28 = vmul.f32 %v1828_v12, %v2909_v52  ;;  %v1843_v63 = vld [vmem:[%s4442_s5 + $0x4c0] sm:$0xff]  ;;  %v1845_v18 = vld [vmem:[%s4442_s5 + $0x4d0] sm:$0xff] }
 0x215   : > { %2077 = vst [vmem:[%s4442_s5 + $0x410] sm:$0xff] %v2013_v14  ;;  %2078 = vst [vmem:[%s4442_s5 + $0x418] sm:$0xff] %v2014_v19  ;;  %v1893_v15 = vmul.f32 %v1829_v46, %v2909_v52  ;;  %v1894_v29 = vmul.f32 %v1830_v36, %v2909_v52  ;;  %v2017_v51 = vmax.f32 %v1953_v24, 0.0  ;;  %v1895_v33 = vmul.f32 %v1831_v55, %v2909_v52  ;;  %v1844_v36 = vld [vmem:[%s4442_s5 + $0x4c8] sm:$0xff]  ;;  %v1846_v39 = vld [vmem:[%s4442_s5 + $0x4d8] sm:$0xff] }
 0x216   : > { %2079 = vst [vmem:[%s4442_s5 + $0x420] sm:$0xff] %v2015_v21  ;;  %2080 = vst [vmem:[%s4442_s5 + $0x428] sm:$0xff] %v2016_v23  ;;  %v2018_v31 = vmax.f32 %v1954_v6, 0.0  ;;  %v1896_v60 = vmul.f32 %v1832_v20, %v2909_v52  ;;  %v1955_v34 = vadd.f32 %v1891_v25, %v2945_v9  ;;  %v1956_v40 = vadd.f32 %v1892_v28, %v2945_v9  ;;  %v1847_v21 = vld [vmem:[%s4442_s5 + $0x4e0] sm:$0xff]  ;;  %v1848_v23 = vld [vmem:[%s4442_s5 + $0x4e8] sm:$0xff] }
 0x217   : > { %v1957_v58 = vadd.f32 %v1893_v15, %v2945_v9  ;;  %v1958_v35 = vadd.f32 %v1894_v29, %v2945_v9  ;;  %2081 = vst [vmem:[%s4442_s5 + $0x430] sm:$0xff] %v2017_v51  ;;  %v1959_v38 = vadd.f32 %v1895_v33, %v2945_v9  ;;  %v1897_v41 = vmul.f32 %v1833_v30, %v2909_v52  ;;  %v1849_v51 = vld [vmem:[%s4442_s5 + $0x4f0] sm:$0xff] }
 0x218   : > { %2082 = vst [vmem:[%s4442_s5 + $0x438] sm:$0xff] %v2018_v31  ;;  %v1960_v26 = vadd.f32 %v1896_v60, %v2945_v9  ;;  %v1898_v53 = vmul.f32 %v1834_v50, %v2909_v52  ;;  %v2019_v13 = vmax.f32 %v1955_v34, 0.0  ;;  %v2020_v16 = vmax.f32 %v1956_v40, 0.0  ;;  %v1850_v31 = vld [vmem:[%s4442_s5 + $0x4f8] sm:$0xff] }
 0x219   : > { %v2021_v44 = vmax.f32 %v1957_v58, 0.0  ;;  %v2022_v27 = vmax.f32 %v1958_v35, 0.0  ;;  %v2023_v3 = vmax.f32 %v1959_v38, 0.0  ;;  %v1961_v57 = vadd.f32 %v1897_v41, %v2945_v9 }
 0x21a   : > { %v2024_v22 = vmax.f32 %v1960_v26, 0.0  ;;  %v1962_v11 = vadd.f32 %v1898_v53, %v2945_v9  ;;  %2083 = vst [vmem:[%s4442_s5 + $0x440] sm:$0xff] %v2019_v13  ;;  %2084 = vst [vmem:[%s4442_s5 + $0x448] sm:$0xff] %v2020_v16  ;;  %v1899_v61 = vmul.f32 %v1835_v48, %v2909_v52  ;;  %v1900_v59 = vmul.f32 %v1836_v42, %v2909_v52  ;;  %v1851_v26 = vld [vmem:[%s4442_s5 + $0x500] sm:$0xff]  ;;  %v1853_v13 = vld [vmem:[%s4442_s5 + $0x510] sm:$0xff] }
 0x21b   : > { %2085 = vst [vmem:[%s4442_s5 + $0x450] sm:$0xff] %v2021_v44  ;;  %2086 = vst [vmem:[%s4442_s5 + $0x458] sm:$0xff] %v2022_v27  ;;  %v1901_v62 = vmul.f32 %v1837_v32, %v2909_v52  ;;  %v1902_v17 = vmul.f32 %v1838_v43, %v2909_v52  ;;  %v2025_v1 = vmax.f32 %v1961_v57, 0.0  ;;  %v1903_v45 = vmul.f32 %v1839_v47, %v2909_v52  ;;  %v1852_v43 = vld [vmem:[%s4442_s5 + $0x508] sm:$0xff]  ;;  %v1854_v16 = vld [vmem:[%s4442_s5 + $0x518] sm:$0xff] }
 0x21c   : > { %2087 = vst [vmem:[%s4442_s5 + $0x460] sm:$0xff] %v2023_v3  ;;  %2088 = vst [vmem:[%s4442_s5 + $0x468] sm:$0xff] %v2024_v22  ;;  %v2026_v49 = vmax.f32 %v1962_v11, 0.0  ;;  %v1904_v2 = vmul.f32 %v1840_v56, %v2909_v52  ;;  %v1963_v5 = vadd.f32 %v1899_v61, %v2945_v9  ;;  %v1964_v7 = vadd.f32 %v1900_v59, %v2945_v9  ;;  %v1855_v3 = vld [vmem:[%s4442_s5 + $0x520] sm:$0xff]  ;;  %v1856_v22 = vld [vmem:[%s4442_s5 + $0x528] sm:$0xff] }
 0x21d   : > { %v1965_v54 = vadd.f32 %v1901_v62, %v2945_v9  ;;  %v1966_v8 = vadd.f32 %v1902_v17, %v2945_v9  ;;  %2089 = vst [vmem:[%s4442_s5 + $0x470] sm:$0xff] %v2025_v1  ;;  %v1967_v37 = vadd.f32 %v1903_v45, %v2945_v9  ;;  %v1905_v12 = vmul.f32 %v1841_v4, %v2909_v52  ;;  %v1857_v1 = vld [vmem:[%s4442_s5 + $0x530] sm:$0xff] }
 0x21e   : > { %2090 = vst [vmem:[%s4442_s5 + $0x478] sm:$0xff] %v2026_v49  ;;  %v1968_v10 = vadd.f32 %v1904_v2, %v2945_v9  ;;  %v1906_v46 = vmul.f32 %v1842_v0, %v2909_v52  ;;  %v2027_v14 = vmax.f32 %v1963_v5, 0.0  ;;  %v2028_v19 = vmax.f32 %v1964_v7, 0.0  ;;  %v1858_v49 = vld [vmem:[%s4442_s5 + $0x538] sm:$0xff] }
 0x21f   : > { %v2029_v55 = vmax.f32 %v1965_v54, 0.0  ;;  %v2030_v20 = vmax.f32 %v1966_v8, 0.0  ;;  %v2031_v24 = vmax.f32 %v1967_v37, 0.0  ;;  %v1969_v25 = vadd.f32 %v1905_v12, %v2945_v9 }
 0x220   : > { %v2032_v6 = vmax.f32 %v1968_v10, 0.0  ;;  %v1970_v28 = vadd.f32 %v1906_v46, %v2945_v9  ;;  %2091 = vst [vmem:[%s4442_s5 + $0x480] sm:$0xff] %v2027_v14  ;;  %2092 = vst [vmem:[%s4442_s5 + $0x488] sm:$0xff] %v2028_v19  ;;  %v1907_v15 = vmul.f32 %v1843_v63, %v2909_v52  ;;  %v1908_v29 = vmul.f32 %v1844_v36, %v2909_v52  ;;  %v1859_v10 = vld [vmem:[%s4442_s5 + $0x540] sm:$0xff]  ;;  %v1861_v14 = vld [vmem:[%s4442_s5 + $0x550] sm:$0xff] }
 0x221   : > { %2093 = vst [vmem:[%s4442_s5 + $0x490] sm:$0xff] %v2029_v55  ;;  %2094 = vst [vmem:[%s4442_s5 + $0x498] sm:$0xff] %v2030_v20  ;;  %v1909_v30 = vmul.f32 %v1845_v18, %v2909_v52  ;;  %v1910_v50 = vmul.f32 %v1846_v39, %v2909_v52  ;;  %v2033_v33 = vmax.f32 %v1969_v25, 0.0  ;;  %v1911_v34 = vmul.f32 %v1847_v21, %v2909_v52  ;;  %v1860_v39 = vld [vmem:[%s4442_s5 + $0x548] sm:$0xff]  ;;  %v1862_v19 = vld [vmem:[%s4442_s5 + $0x558] sm:$0xff] }
 0x222   : > { %2095 = vst [vmem:[%s4442_s5 + $0x4a0] sm:$0xff] %v2031_v24  ;;  %2096 = vst [vmem:[%s4442_s5 + $0x4a8] sm:$0xff] %v2032_v6  ;;  %v2034_v60 = vmax.f32 %v1970_v28, 0.0  ;;  %v1912_v40 = vmul.f32 %v1848_v23, %v2909_v52  ;;  %v1971_v58 = vadd.f32 %v1907_v15, %v2945_v9  ;;  %v1972_v35 = vadd.f32 %v1908_v29, %v2945_v9  ;;  %v1863_v24 = vld [vmem:[%s4442_s5 + $0x560] sm:$0xff]  ;;  %v1864_v6 = vld [vmem:[%s4442_s5 + $0x568] sm:$0xff] }
 0x223   : > { %v1973_v48 = vadd.f32 %v1909_v30, %v2945_v9  ;;  %v1974_v38 = vadd.f32 %v1910_v50, %v2945_v9  ;;  %2097 = vst [vmem:[%s4442_s5 + $0x4b0] sm:$0xff] %v2033_v33  ;;  %v1975_v41 = vadd.f32 %v1911_v34, %v2945_v9  ;;  %v1913_v42 = vmul.f32 %v1849_v51, %v2909_v52  ;;  %v1865_v33 = vld [vmem:[%s4442_s5 + $0x570] sm:$0xff] }
 0x224   : > { %2098 = vst [vmem:[%s4442_s5 + $0x4b8] sm:$0xff] %v2034_v60  ;;  %v1976_v53 = vadd.f32 %v1912_v40, %v2945_v9  ;;  %v1914_v32 = vmul.f32 %v1850_v31, %v2909_v52  ;;  %v2035_v44 = vmax.f32 %v1971_v58, 0.0  ;;  %v2036_v27 = vmax.f32 %v1972_v35, 0.0  ;;  %v1866_v60 = vld [vmem:[%s4442_s5 + $0x578] sm:$0xff] }
 0x225   : > { %v2037_v47 = vmax.f32 %v1973_v48, 0.0  ;;  %v2038_v56 = vmax.f32 %v1974_v38, 0.0  ;;  %v2039_v57 = vmax.f32 %v1975_v41, 0.0  ;;  %v1977_v61 = vadd.f32 %v1913_v42, %v2945_v9 }
 0x226   : > { %v2040_v11 = vmax.f32 %v1976_v53, 0.0  ;;  %v1978_v59 = vadd.f32 %v1914_v32, %v2945_v9  ;;  %2099 = vst [vmem:[%s4442_s5 + $0x4c0] sm:$0xff] %v2035_v44  ;;  %2100 = vst [vmem:[%s4442_s5 + $0x4c8] sm:$0xff] %v2036_v27  ;;  %v1915_v62 = vmul.f32 %v1851_v26, %v2909_v52  ;;  %v1916_v17 = vmul.f32 %v1852_v43, %v2909_v52  ;;  %v1867_v53 = vld [vmem:[%s4442_s5 + $0x580] sm:$0xff]  ;;  %v1869_v44 = vld [vmem:[%s4442_s5 + $0x590] sm:$0xff] }
 0x227   : > { %2101 = vst [vmem:[%s4442_s5 + $0x4d0] sm:$0xff] %v2037_v47  ;;  %2102 = vst [vmem:[%s4442_s5 + $0x4d8] sm:$0xff] %v2038_v56  ;;  %v1917_v4 = vmul.f32 %v1853_v13, %v2909_v52  ;;  %v1918_v0 = vmul.f32 %v1854_v16, %v2909_v52  ;;  %v2041_v45 = vmax.f32 %v1977_v61, 0.0  ;;  %v1919_v5 = vmul.f32 %v1855_v3, %v2909_v52  ;;  %v1868_v16 = vld [vmem:[%s4442_s5 + $0x588] sm:$0xff]  ;;  %v1870_v27 = vld [vmem:[%s4442_s5 + $0x598] sm:$0xff] }
 0x228   : > { %2103 = vst [vmem:[%s4442_s5 + $0x4e0] sm:$0xff] %v2039_v57  ;;  %2104 = vst [vmem:[%s4442_s5 + $0x4e8] sm:$0xff] %v2040_v11  ;;  %v2042_v2 = vmax.f32 %v1978_v59, 0.0  ;;  %v1920_v7 = vmul.f32 %v1856_v22, %v2909_v52  ;;  %v1979_v54 = vadd.f32 %v1915_v62, %v2945_v9  ;;  %v1980_v8 = vadd.f32 %v1916_v17, %v2945_v9  ;;  %v1871_v57 = vld [vmem:[%s4442_s5 + $0x5a0] sm:$0xff]  ;;  %v1872_v11 = vld [vmem:[%s4442_s5 + $0x5a8] sm:$0xff] }
 0x229   : > { %v1981_v63 = vadd.f32 %v1917_v4, %v2945_v9  ;;  %v1982_v37 = vadd.f32 %v1918_v0, %v2945_v9  ;;  %2105 = vst [vmem:[%s4442_s5 + $0x4f0] sm:$0xff] %v2041_v45  ;;  %v1983_v12 = vadd.f32 %v1919_v5, %v2945_v9  ;;  %v1921_v36 = vmul.f32 %v1857_v1, %v2909_v52  ;;  %v1873_v45 = vld [vmem:[%s4442_s5 + $0x5b0] sm:$0xff] }
 0x22a   : > { %2106 = vst [vmem:[%s4442_s5 + $0x4f8] sm:$0xff] %v2042_v2  ;;  %v1984_v46 = vadd.f32 %v1920_v7, %v2945_v9  ;;  %v1922_v18 = vmul.f32 %v1858_v49, %v2909_v52  ;;  %v2043_v55 = vmax.f32 %v1979_v54, 0.0  ;;  %v2044_v20 = vmax.f32 %v1980_v8, 0.0  ;;  %v1874_v2 = vld [vmem:[%s4442_s5 + $0x5b8] sm:$0xff] }
 0x22b   : > { %v2045_v21 = vmax.f32 %v1981_v63, 0.0  ;;  %v2046_v23 = vmax.f32 %v1982_v37, 0.0  ;;  %v2047_v25 = vmax.f32 %v1983_v12, 0.0  ;;  %v1985_v15 = vadd.f32 %v1921_v36, %v2945_v9 }
 0x22c   : > { %v2048_v28 = vmax.f32 %v1984_v46, 0.0  ;;  %v1986_v29 = vadd.f32 %v1922_v18, %v2945_v9  ;;  %2107 = vst [vmem:[%s4442_s5 + $0x500] sm:$0xff] %v2043_v55  ;;  %2108 = vst [vmem:[%s4442_s5 + $0x508] sm:$0xff] %v2044_v20  ;;  %v1923_v30 = vmul.f32 %v1859_v10, %v2909_v52  ;;  %v1924_v50 = vmul.f32 %v1860_v39, %v2909_v52  ;;  %v1875_v46 = vld [vmem:[%s4442_s5 + $0x5c0] sm:$0xff]  ;;  %v1877_v55 = vld [vmem:[%s4442_s5 + $0x5d0] sm:$0xff] }
 0x22d   : > { %2109 = vst [vmem:[%s4442_s5 + $0x510] sm:$0xff] %v2045_v21  ;;  %2110 = vst [vmem:[%s4442_s5 + $0x518] sm:$0xff] %v2046_v23  ;;  %v1925_v51 = vmul.f32 %v1861_v14, %v2909_v52  ;;  %v1926_v31 = vmul.f32 %v1862_v19, %v2909_v52  ;;  %v2049_v34 = vmax.f32 %v1985_v15, 0.0  ;;  %v1927_v58 = vmul.f32 %v1863_v24, %v2909_v52  ;;  %v1876_v19 = vld [vmem:[%s4442_s5 + $0x5c8] sm:$0xff]  ;;  %v1878_v20 = vld [vmem:[%s4442_s5 + $0x5d8] sm:$0xff] }
 0x22e   : > { %2111 = vst [vmem:[%s4442_s5 + $0x520] sm:$0xff] %v2047_v25  ;;  %2112 = vst [vmem:[%s4442_s5 + $0x528] sm:$0xff] %v2048_v28  ;;  %v2050_v40 = vmax.f32 %v1986_v29, 0.0  ;;  %v1928_v35 = vmul.f32 %v1864_v6, %v2909_v52  ;;  %v1987_v48 = vadd.f32 %v1923_v30, %v2945_v9  ;;  %v1988_v38 = vadd.f32 %v1924_v50, %v2945_v9  ;;  %v1879_v25 = vld [vmem:[%s4442_s5 + $0x5e0] sm:$0xff]  ;;  %v1880_v28 = vld [vmem:[%s4442_s5 + $0x5e8] sm:$0xff] }
 0x22f   : > { %v1989_v26 = vadd.f32 %v1925_v51, %v2945_v9  ;;  %v1990_v41 = vadd.f32 %v1926_v31, %v2945_v9  ;;  %2113 = vst [vmem:[%s4442_s5 + $0x530] sm:$0xff] %v2049_v34  ;;  %v1991_v42 = vadd.f32 %v1927_v58, %v2945_v9  ;;  %v1929_v43 = vmul.f32 %v1865_v33, %v2909_v52  ;;  %v1881_v34 = vld [vmem:[%s4442_s5 + $0x5f0] sm:$0xff] }
 0x230   : > { %2114 = vst [vmem:[%s4442_s5 + $0x538] sm:$0xff] %v2050_v40  ;;  %v1992_v32 = vadd.f32 %v1928_v35, %v2945_v9  ;;  %v1930_v13 = vmul.f32 %v1866_v60, %v2909_v52  ;;  %v2051_v47 = vmax.f32 %v1987_v48, 0.0  ;;  %v2052_v56 = vmax.f32 %v1988_v38, 0.0  ;;  %v1882_v40 = vld [vmem:[%s4442_s5 + $0x5f8] sm:$0xff] }
 0x231   : > { %v2053_v3 = vmax.f32 %v1989_v26, 0.0  ;;  %v2054_v22 = vmax.f32 %v1990_v41, 0.0  ;;  %v2055_v61 = vmax.f32 %v1991_v42, 0.0  ;;  %v1993_v62 = vadd.f32 %v1929_v43, %v2945_v9 }
 0x232   : > { %v2056_v59 = vmax.f32 %v1992_v32, 0.0  ;;  %v1994_v17 = vadd.f32 %v1930_v13, %v2945_v9  ;;  %2115 = vst [vmem:[%s4442_s5 + $0x540] sm:$0xff] %v2051_v47  ;;  %2116 = vst [vmem:[%s4442_s5 + $0x548] sm:$0xff] %v2052_v56  ;;  %v1931_v4 = vmul.f32 %v1867_v53, %v2909_v52  ;;  %v1932_v0 = vmul.f32 %v1868_v16, %v2909_v52 }
 0x233   : > { %2117 = vst [vmem:[%s4442_s5 + $0x550] sm:$0xff] %v2053_v3  ;;  %2118 = vst [vmem:[%s4442_s5 + $0x558] sm:$0xff] %v2054_v22  ;;  %v1933_v1 = vmul.f32 %v1869_v44, %v2909_v52  ;;  %v1934_v49 = vmul.f32 %v1870_v27, %v2909_v52  ;;  %v2057_v5 = vmax.f32 %v1993_v62, 0.0  ;;  %v1935_v54 = vmul.f32 %v1871_v57, %v2909_v52 }
 0x234   : > { %2119 = vst [vmem:[%s4442_s5 + $0x560] sm:$0xff] %v2055_v61  ;;  %2120 = vst [vmem:[%s4442_s5 + $0x568] sm:$0xff] %v2056_v59  ;;  %v2058_v7 = vmax.f32 %v1994_v17, 0.0  ;;  %v1936_v8 = vmul.f32 %v1872_v11, %v2909_v52  ;;  %v1995_v63 = vadd.f32 %v1931_v4, %v2945_v9  ;;  %v1996_v37 = vadd.f32 %v1932_v0, %v2945_v9 }
 0x235   : > { %v1997_v10 = vadd.f32 %v1933_v1, %v2945_v9  ;;  %v1998_v12 = vadd.f32 %v1934_v49, %v2945_v9  ;;  %2121 = vst [vmem:[%s4442_s5 + $0x570] sm:$0xff] %v2057_v5  ;;  %v1999_v36 = vadd.f32 %v1935_v54, %v2945_v9  ;;  %v1937_v39 = vmul.f32 %v1873_v45, %v2909_v52 }
 0x236   : > { %2122 = vst [vmem:[%s4442_s5 + $0x578] sm:$0xff] %v2058_v7  ;;  %v2000_v18 = vadd.f32 %v1936_v8, %v2945_v9  ;;  %v1938_v14 = vmul.f32 %v1874_v2, %v2909_v52  ;;  %v2059_v21 = vmax.f32 %v1995_v63, 0.0  ;;  %v2060_v23 = vmax.f32 %v1996_v37, 0.0 }
 0x237   : > { %v2061_v24 = vmax.f32 %v1997_v10, 0.0  ;;  %v2062_v6 = vmax.f32 %v1998_v12, 0.0  ;;  %v2063_v15 = vmax.f32 %v1999_v36, 0.0  ;;  %v2001_v30 = vadd.f32 %v1937_v39, %v2945_v9 }
 0x238   : > { %v2064_v29 = vmax.f32 %v2000_v18, 0.0  ;;  %v2002_v50 = vadd.f32 %v1938_v14, %v2945_v9  ;;  %2123 = vst [vmem:[%s4442_s5 + $0x580] sm:$0xff] %v2059_v21  ;;  %2124 = vst [vmem:[%s4442_s5 + $0x588] sm:$0xff] %v2060_v23  ;;  %v1939_v51 = vmul.f32 %v1875_v46, %v2909_v52  ;;  %v1940_v31 = vmul.f32 %v1876_v19, %v2909_v52 }
 0x239   : > { %2125 = vst [vmem:[%s4442_s5 + $0x590] sm:$0xff] %v2061_v24  ;;  %2126 = vst [vmem:[%s4442_s5 + $0x598] sm:$0xff] %v2062_v6  ;;  %v1941_v33 = vmul.f32 %v1877_v55, %v2909_v52  ;;  %v1942_v60 = vmul.f32 %v1878_v20, %v2909_v52  ;;  %v2065_v58 = vmax.f32 %v2001_v30, 0.0  ;;  %v1943_v48 = vmul.f32 %v1879_v25, %v2909_v52 }
 0x23a   : > { %2127 = vst [vmem:[%s4442_s5 + $0x5a0] sm:$0xff] %v2063_v15  ;;  %2128 = vst [vmem:[%s4442_s5 + $0x5a8] sm:$0xff] %v2064_v29  ;;  %v2066_v35 = vmax.f32 %v2002_v50, 0.0  ;;  %v1944_v38 = vmul.f32 %v1880_v28, %v2909_v52  ;;  %v2003_v26 = vadd.f32 %v1939_v51, %v2945_v9  ;;  %v2004_v41 = vadd.f32 %v1940_v31, %v2945_v9 }
 0x23b   : > { %v2005_v53 = vadd.f32 %v1941_v33, %v2945_v9  ;;  %v2006_v42 = vadd.f32 %v1942_v60, %v2945_v9  ;;  %2129 = vst [vmem:[%s4442_s5 + $0x5b0] sm:$0xff] %v2065_v58  ;;  %v2007_v32 = vadd.f32 %v1943_v48, %v2945_v9  ;;  %v1945_v13 = vmul.f32 %v1881_v34, %v2909_v52 }
 0x23c   : > { %2130 = vst [vmem:[%s4442_s5 + $0x5b8] sm:$0xff] %v2066_v35  ;;  %v2008_v43 = vadd.f32 %v1944_v38, %v2945_v9  ;;  %v1946_v16 = vmul.f32 %v1882_v40, %v2909_v52  ;;  %v2067_v44 = vmax.f32 %v2003_v26, 0.0  ;;  %v2068_v27 = vmax.f32 %v2004_v41, 0.0 }
 0x23d   : > { %v2069_v47 = vmax.f32 %v2005_v53, 0.0  ;;  %v2070_v56 = vmax.f32 %v2006_v42, 0.0  ;;  %v2071_v3 = vmax.f32 %v2007_v32, 0.0  ;;  %v2009_v57 = vadd.f32 %v1945_v13, %v2945_v9 }
 0x23e   : > { %v2072_v22 = vmax.f32 %v2008_v43, 0.0  ;;  %v2010_v11 = vadd.f32 %v1946_v16, %v2945_v9  ;;  %2131 = vst [vmem:[%s4442_s5 + $0x5c0] sm:$0xff] %v2067_v44  ;;  %2132 = vst [vmem:[%s4442_s5 + $0x5c8] sm:$0xff] %v2068_v27 }
 0x23f   : > { %2133 = vst [vmem:[%s4442_s5 + $0x5d0] sm:$0xff] %v2069_v47  ;;  %2134 = vst [vmem:[%s4442_s5 + $0x5d8] sm:$0xff] %v2070_v56  ;;  %v2073_v52 = vmax.f32 %v2009_v57, 0.0 }
 0x240   : > { %2135 = vst [vmem:[%s4442_s5 + $0x5e0] sm:$0xff] %v2071_v3  ;;  %2136 = vst [vmem:[%s4442_s5 + $0x5e8] sm:$0xff] %v2072_v22  ;;  %v2074_v9 = vmax.f32 %v2010_v11, 0.0 }
 0x241   : > { %2137 = vst [vmem:[%s4442_s5 + $0x5f0] sm:$0xff] %v2073_v52 }
 0x242   : > { %2138 = vst [vmem:[%s4442_s5 + $0x5f8] sm:$0xff] %v2074_v9 }
 0x243 PF: > { %s15_s18 = sadd.s32 1, %s2427_s18  }
 0x244   : > { %p12_p6 = scmp.ge.s32.totalorder %s15_s18, 5  }
 0x246   :  { %14 = sbr.rel (!%p12_p6) target bundleno = 1 (0x1), region = 75 }

</bundles_post_ra>
